<compile_context>
chip_gen: v6e
topology: v6e:2x2x1
jax: 0.10.0
libtpu: 0.0.40
codegen_flags: <defaults>
</compile_context>

<pallas_src>
import functools

import jax
import jax.numpy as jnp
from jax.experimental import pallas as pl
from jax.experimental.pallas import tpu as pltpu


# ----------------------------------------------------------------------------
# Fused kernel
# ----------------------------------------------------------------------------
def _stock_block_kernel(*refs, time_step, multi, with_backcast):
    T = time_step
    MT = multi * T

    x_ref, l_ref = refs[0], refs[1]
    glu_refs = refs[2:26]                       # 3 layers x (real, img) x (wl,bl,wr,br)
    cheb_ref = refs[26]                         # (4*MT, MT)
    fw_ref, fb_ref, frw_ref, frb_ref = refs[27:31]
    if with_backcast:
        bw_ref, bb_ref, bsw_ref, bsb_ref = refs[31:35]
        fc_ref, bc_ref = refs[35], refs[36]
        real_buf, img_buf, gcat_buf = refs[37], refs[38], refs[39]
    else:
        fc_ref = refs[31]
        real_buf, img_buf, gcat_buf = refs[32], refs[33], refs[34]

    x = x_ref[0, 0]                             # (N, T)
    N = x.shape[0]

    # ---- graph conv: one stacked matmul  (4N, N) @ (N, T) -> (4N, T) --------
    g = jnp.dot(l_ref[...], x, preferred_element_type=jnp.float32)
    g0 = g[0 * N:1 * N]
    g1 = g[1 * N:2 * N]
    g2 = g[2 * N:3 * N]
    g3 = g[3 * N:4 * N]

    # ---- length-4 DFT along the Chebyshev axis (analytic butterflies) -------
    # F0 = g0+g1+g2+g3 (real); F1 = (g0-g2) + i(g3-g1); F2 = g0-g1+g2-g3 (real)
    # F3 = conj(F1).
    f0r = g0 + g1 + g2 + g3
    f1r = g0 - g2
    f2r = g0 - g1 + g2 - g3
    f1i = g3 - g1
    zero = jnp.zeros_like(g0)

    # Assemble the torch permute(0,2,1,3).reshape(B,N,4T) layout directly in
    # VMEM: lane block k of real/img <- bin k.
    real_buf[:, 0 * T:1 * T] = f0r
    real_buf[:, 1 * T:2 * T] = f1r
    real_buf[:, 2 * T:3 * T] = f2r
    real_buf[:, 3 * T:4 * T] = f1r
    img_buf[:, 0 * T:1 * T] = zero
    img_buf[:, 1 * T:2 * T] = f1i
    img_buf[:, 2 * T:3 * T] = zero
    img_buf[:, 3 * T:4 * T] = -f1i

    real = real_buf[...]                        # (N, 4T)
    img = img_buf[...]                          # (N, 4T)

    # ---- 3 x GLU for real and imaginary chains (VMEM resident) --------------
    def _glu(h, wl_ref, bl_ref, wr_ref, br_ref):
        left = jnp.dot(h, wl_ref[...], preferred_element_type=jnp.float32) + bl_ref[...]
        right = jnp.dot(h, wr_ref[...], preferred_element_type=jnp.float32) + br_ref[...]
        return left * jax.nn.sigmoid(right)

    for i in range(3):
        real = _glu(real, *glu_refs[8 * i + 0: 8 * i + 4])
        img = _glu(img, *glu_refs[8 * i + 4: 8 * i + 8])
    # real/img: (N, 4*MT); lane block k corresponds to frequency bin k.

    # ---- irfft(n=4) along the Chebyshev axis (uses bins 0..2; imag of the
    #      DC / Nyquist bins is dropped, matching torch.fft.irfft) ------------
    r0 = real[:, 0 * MT:1 * MT]
    r1 = real[:, 1 * MT:2 * MT]
    r2 = real[:, 2 * MT:3 * MT]
    i1 = img[:, 1 * MT:2 * MT]
    gcat_buf[:, 0 * MT:1 * MT] = (r0 + r2 + 2.0 * r1) * 0.25
    gcat_buf[:, 1 * MT:2 * MT] = (r0 - r2 - 2.0 * i1) * 0.25
    gcat_buf[:, 2 * MT:3 * MT] = (r0 + r2 - 2.0 * r1) * 0.25
    gcat_buf[:, 3 * MT:4 * MT] = (r0 - r2 + 2.0 * i1) * 0.25

    # ---- Chebyshev-weight contraction + k-sum as ONE stacked GEMM -----------
    # sum_k y_k @ W_k  ==  [y0|y1|y2|y3] @ vstack(W_0..W_3)
    igfted = jnp.dot(gcat_buf[...], cheb_ref[...],
                     preferred_element_type=jnp.float32)       # (N, MT)

    # ---- forecast branch ----------------------------------------------------
    fsrc = jax.nn.sigmoid(
        jnp.dot(igfted, fw_ref[...], preferred_element_type=jnp.float32) + fb_ref[...])
    forecast = jnp.dot(fsrc, frw_ref[...],
                       preferred_element_type=jnp.float32) + frb_ref[...]
    fc_ref[0] = forecast                                       # (N, T)

    # ---- backcast branch (stack_cnt == 0) -----------------------------------
    if with_backcast:
        bshort = jnp.dot(x, bsw_ref[...],
                         preferred_element_type=jnp.float32) + bsb_ref[...]
        bsrc = jax.nn.sigmoid(
            jnp.dot(igfted, bw_ref[...], preferred_element_type=jnp.float32)
            + bb_ref[...] - bshort)
        bc_ref[0, 0] = bsrc                                    # (N, T)


# ----------------------------------------------------------------------------
# Wrapper: builds the single fused pallas_call
# ----------------------------------------------------------------------------
def stock_block_forward(x, mul_L, params, *, time_step, multi, stack_cnt=0):
    """x: (B, 1, N, T), mul_L: (4, N, N).  Returns (forecast, backcast_source)."""
    B, _, N, T = x.shape
    assert T == time_step
    MT = multi * T
    with_backcast = (stack_cnt == 0)

    # Stack the Chebyshev matrices / weights once (trivial weight-side layout).
    mul_L2d = mul_L.reshape(4 * N, N)                      # (4N, N)
    cheb2d = params["cheb_weight"].reshape(4 * MT, MT)     # (4MT, MT)

    inputs = [x, mul_L2d]
    for i in range(3):
        inputs.extend(params["glu_real"][i])               # wl, bl, wr, br
        inputs.extend(params["glu_img"][i])                # wl, bl, wr, br
    inputs.append(cheb2d)
    inputs.extend(params["forecast"])
    inputs.extend(params["forecast_result"])
    if with_backcast:
        inputs.extend(params["backcast"])
        inputs.extend(params["backcast_short_cut"])

    def resident_spec(arr):
        nd = arr.ndim
        return pl.BlockSpec(arr.shape, lambda b, _nd=nd: (0,) * _nd)

    in_specs = [pl.BlockSpec((1, 1, N, T), lambda b: (b, 0, 0, 0))]
    in_specs += [resident_spec(a) for a in inputs[1:]]

    if with_backcast:
        out_shape = (jax.ShapeDtypeStruct((B, N, T), jnp.float32),
                     jax.ShapeDtypeStruct((B, 1, N, T), jnp.float32))
        out_specs = (pl.BlockSpec((1, N, T), lambda b: (b, 0, 0)),
                     pl.BlockSpec((1, 1, N, T), lambda b: (b, 0, 0, 0)))
    else:
        out_shape = jax.ShapeDtypeStruct((B, N, T), jnp.float32)
        out_specs = pl.BlockSpec((1, N, T), lambda b: (b, 0, 0))

    kernel = functools.partial(_stock_block_kernel, time_step=T, multi=multi,
                               with_backcast=with_backcast)

    outs = pl.pallas_call(
        kernel,
        out_shape=out_shape,
        grid=(B,),
        in_specs=in_specs,
        out_specs=out_specs,
        scratch_shapes=[
            pltpu.VMEM((N, 4 * T), jnp.float32),    # real (N, 4T) assembly
            pltpu.VMEM((N, 4 * T), jnp.float32),    # img  (N, 4T) assembly
            pltpu.VMEM((N, 4 * MT), jnp.float32),   # [y0|y1|y2|y3]
        ],
        compiler_params=pltpu.CompilerParams(
            dimension_semantics=("parallel",)),
    )(*inputs)

    if with_backcast:
        forecast, backcast_source = outs
    else:
        forecast, backcast_source = outs, None
    return forecast, backcast_source


# ----------------------------------------------------------------------------
# Pure-JAX reference (mirrors the PyTorch forward; used only for self-check)
# ----------------------------------------------------------------------------
def stock_block_reference(x, mul_L, params, *, time_step, multi, stack_cnt=0):
    B, _, N, T = x.shape
    MT = multi * T
    gfted = jnp.einsum("knm,bmt->bknt", mul_L, x[:, 0])          # (B,4,N,T)
    g0, g1, g2, g3 = gfted[:, 0], gfted[:, 1], gfted[:, 2], gfted[:, 3]
    f0r = g0 + g1 + g2 + g3
    f1r = g0 - g2
    f2r = g0 - g1 + g2 - g3
    f1i = g3 - g1
    zero = jnp.zeros_like(g0)
    real = jnp.stack([f0r, f1r, f2r, f1r], axis=1)               # (B,4,N,T)
    img = jnp.stack([zero, f1i, zero, -f1i], axis=1)
    real = jnp.transpose(real, (0, 2, 1, 3)).reshape(B, N, 4 * T)
    img = jnp.transpose(img, (0, 2, 1, 3)).reshape(B, N, 4 * T)
    for i in range(3):
        wl, bl, wr, br = params["glu_real"][i]
        real = (real @ wl + bl) * jax.nn.sigmoid(real @ wr + br)
        wl, bl, wr, br = params["glu_img"][i]
        img = (img @ wl + bl) * jax.nn.sigmoid(img @ wr + br)
    real = jnp.transpose(real.reshape(B, N, 4, MT), (0, 2, 1, 3))
    img = jnp.transpose(img.reshape(B, N, 4, MT), (0, 2, 1, 3))
    r0, r1, r2 = real[:, 0], real[:, 1], real[:, 2]
    i1 = img[:, 1]
    y = jnp.stack([(r0 + r2 + 2.0 * r1) * 0.25,
                   (r0 - r2 - 2.0 * i1) * 0.25,
                   (r0 + r2 - 2.0 * r1) * 0.25,
                   (r0 - r2 + 2.0 * i1) * 0.25], axis=1)          # (B,4,N,MT)
    igfted = jnp.einsum("bknm,kmo->bno", y, params["cheb_weight"])
    fw, fb = params["forecast"]
    forecast_source = jax.nn.sigmoid(igfted @ fw + fb)
    frw, frb = params["forecast_result"]
    forecast = forecast_source @ frw + frb                        # (B,N,T)
    if stack_cnt == 0:
        bsw, bsb = params["backcast_short_cut"]
        backcast_short = x[:, 0] @ bsw + bsb                      # (B,N,T)
        bw, bb = params["backcast"]
        backcast_source = jax.nn.sigmoid(igfted @ bw + bb - backcast_short)
        backcast_source = backcast_source[:, None]                # (B,1,N,T)
    else:
        backcast_source = None
    return forecast, backcast_source


# ----------------------------------------------------------------------------
# Deterministic parameter initialization (matches module __init__ shapes)
# ----------------------------------------------------------------------------
def init_params(key, time_step, multi):
    T = time_step
    MT = multi * T
    OC = 4 * multi * T  # time_step * output_channel

    keys = iter(jax.random.split(key, 64))

    def linear_params(fan_in, fan_out):
        bound = 1.0 / (fan_in ** 0.5)
        w = jax.random.uniform(next(keys), (fan_in, fan_out), jnp.float32, -bound, bound)
        b = jax.random.uniform(next(keys), (1, fan_out), jnp.float32, -bound, bound)
        return w, b

    def glu_params(fan_in, fan_out):
        return (*linear_params(fan_in, fan_out), *linear_params(fan_in, fan_out))

    glu_dims = [(4 * T, OC), (OC, OC), (OC, OC)]
    params = {
        "glu_real": [glu_params(i, o) for (i, o) in glu_dims],
        "glu_img": [glu_params(i, o) for (i, o) in glu_dims],
        # nn.Parameter(1, 4, 1, MT, MT) with xavier_normal_; stored as (4, MT, MT)
        "cheb_weight": jax.random.normal(next(keys), (4, MT, MT), jnp.float32)
        * (2.0 / (5.0 * MT * MT)) ** 0.5,
        "forecast": linear_params(MT, MT),
        "forecast_result": linear_params(MT, T),
        "backcast": linear_params(MT, T),
        "backcast_short_cut": linear_params(T, T),
    }
    return params


# ----------------------------------------------------------------------------
if __name__ == "__main__":
    # Keep XLA-side reference matmuls in f32 so the numeric check is tight.
    jax.config.update("jax_default_matmul_precision", "highest")

    B, N, T, MULTI = 2, 16, 8, 2  # batch, node_cnt(unit), time_step, multi_layer

    key = jax.random.PRNGKey(0)
    kx, kl, kp = jax.random.split(key, 3)
    x = jax.random.normal(kx, (B, 1, N, T), dtype=jnp.float32)
    mul_L = jax.random.normal(kl, (4, N, N), dtype=jnp.float32) * 0.1
    params = init_params(kp, T, MULTI)

    fwd = jax.jit(functools.partial(
        stock_block_forward, time_step=T, multi=MULTI, stack_cnt=0))
    forecast, backcast_source = fwd(x, mul_L, params)
    jax.block_until_ready((forecast, backcast_source))

    assert forecast.shape == (B, N, T), forecast.shape
    assert backcast_source.shape == (B, 1, N, T), backcast_source.shape
    assert forecast.dtype == jnp.float32 and backcast_source.dtype == jnp.float32

    ref_fc, ref_bc = stock_block_reference(
        x, mul_L, params, time_step=T, multi=MULTI, stack_cnt=0)
    assert jnp.allclose(forecast, ref_fc, rtol=2e-3, atol=2e-3)
    assert jnp.allclose(backcast_source, ref_bc, rtol=2e-3, atol=2e-3)

    print("KERNEL_OK")
</pallas_src>

<mosaic_0001>
module attributes {stable_mosaic.version = 11 : i64} {
  func.func @_stock_block_kernel(%arg0: i32, %arg1: memref<1x1x16x8xf32, #tpu.memory_space<vmem>>, %arg2: memref<64x16xf32, #tpu.memory_space<vmem>>, %arg3: memref<32x64xf32, #tpu.memory_space<vmem>>, %arg4: memref<1x64xf32, #tpu.memory_space<vmem>>, %arg5: memref<32x64xf32, #tpu.memory_space<vmem>>, %arg6: memref<1x64xf32, #tpu.memory_space<vmem>>, %arg7: memref<32x64xf32, #tpu.memory_space<vmem>>, %arg8: memref<1x64xf32, #tpu.memory_space<vmem>>, %arg9: memref<32x64xf32, #tpu.memory_space<vmem>>, %arg10: memref<1x64xf32, #tpu.memory_space<vmem>>, %arg11: memref<64x64xf32, #tpu.memory_space<vmem>>, %arg12: memref<1x64xf32, #tpu.memory_space<vmem>>, %arg13: memref<64x64xf32, #tpu.memory_space<vmem>>, %arg14: memref<1x64xf32, #tpu.memory_space<vmem>>, %arg15: memref<64x64xf32, #tpu.memory_space<vmem>>, %arg16: memref<1x64xf32, #tpu.memory_space<vmem>>, %arg17: memref<64x64xf32, #tpu.memory_space<vmem>>, %arg18: memref<1x64xf32, #tpu.memory_space<vmem>>, %arg19: memref<64x64xf32, #tpu.memory_space<vmem>>, %arg20: memref<1x64xf32, #tpu.memory_space<vmem>>, %arg21: memref<64x64xf32, #tpu.memory_space<vmem>>, %arg22: memref<1x64xf32, #tpu.memory_space<vmem>>, %arg23: memref<64x64xf32, #tpu.memory_space<vmem>>, %arg24: memref<1x64xf32, #tpu.memory_space<vmem>>, %arg25: memref<64x64xf32, #tpu.memory_space<vmem>>, %arg26: memref<1x64xf32, #tpu.memory_space<vmem>>, %arg27: memref<64x16xf32, #tpu.memory_space<vmem>>, %arg28: memref<16x16xf32, #tpu.memory_space<vmem>>, %arg29: memref<1x16xf32, #tpu.memory_space<vmem>>, %arg30: memref<16x8xf32, #tpu.memory_space<vmem>>, %arg31: memref<1x8xf32, #tpu.memory_space<vmem>>, %arg32: memref<16x8xf32, #tpu.memory_space<vmem>>, %arg33: memref<1x8xf32, #tpu.memory_space<vmem>>, %arg34: memref<8x8xf32, #tpu.memory_space<vmem>>, %arg35: memref<1x8xf32, #tpu.memory_space<vmem>>, %arg36: memref<1x16x8xf32, #tpu.memory_space<vmem>>, %arg37: memref<1x1x16x8xf32, #tpu.memory_space<vmem>>, %arg38: memref<16x32xf32, #tpu.memory_space<vmem>>, %arg39: memref<16x32xf32, #tpu.memory_space<vmem>>, %arg40: memref<16x64xf32, #tpu.memory_space<vmem>>) attributes {dimension_semantics = [#tpu.dimension_semantics<parallel>], iteration_bounds = array<i64: 2>, scalar_prefetch = 0 : i64, scratch_operands = 3 : i64, tpu.core_type = #tpu.core_type<tc>, window_params = [{transform_indices = @transform_0, window_bounds = array<i64: 1, 1, 16, 8>}, {pipeline_mode = #tpu.pipeline_mode<synchronous>, transform_indices = @transform_1, window_bounds = array<i64: 64, 16>}, {pipeline_mode = #tpu.pipeline_mode<synchronous>, transform_indices = @transform_2, window_bounds = array<i64: 32, 64>}, {pipeline_mode = #tpu.pipeline_mode<synchronous>, transform_indices = @transform_3, window_bounds = array<i64: 1, 64>}, {pipeline_mode = #tpu.pipeline_mode<synchronous>, transform_indices = @transform_4, window_bounds = array<i64: 32, 64>}, {pipeline_mode = #tpu.pipeline_mode<synchronous>, transform_indices = @transform_5, window_bounds = array<i64: 1, 64>}, {pipeline_mode = #tpu.pipeline_mode<synchronous>, transform_indices = @transform_6, window_bounds = array<i64: 32, 64>}, {pipeline_mode = #tpu.pipeline_mode<synchronous>, transform_indices = @transform_7, window_bounds = array<i64: 1, 64>}, {pipeline_mode = #tpu.pipeline_mode<synchronous>, transform_indices = @transform_8, window_bounds = array<i64: 32, 64>}, {pipeline_mode = #tpu.pipeline_mode<synchronous>, transform_indices = @transform_9, window_bounds = array<i64: 1, 64>}, {pipeline_mode = #tpu.pipeline_mode<synchronous>, transform_indices = @transform_10, window_bounds = array<i64: 64, 64>}, {pipeline_mode = #tpu.pipeline_mode<synchronous>, transform_indices = @transform_11, window_bounds = array<i64: 1, 64>}, {pipeline_mode = #tpu.pipeline_mode<synchronous>, transform_indices = @transform_12, window_bounds = array<i64: 64, 64>}, {pipeline_mode = #tpu.pipeline_mode<synchronous>, transform_indices = @transform_13, window_bounds = array<i64: 1, 64>}, {pipeline_mode = #tpu.pipeline_mode<synchronous>, transform_indices = @transform_14, window_bounds = array<i64: 64, 64>}, {pipeline_mode = #tpu.pipeline_mode<synchronous>, transform_indices = @transform_15, window_bounds = array<i64: 1, 64>}, {pipeline_mode = #tpu.pipeline_mode<synchronous>, transform_indices = @transform_16, window_bounds = array<i64: 64, 64>}, {pipeline_mode = #tpu.pipeline_mode<synchronous>, transform_indices = @transform_17, window_bounds = array<i64: 1, 64>}, {pipeline_mode = #tpu.pipeline_mode<synchronous>, transform_indices = @transform_18, window_bounds = array<i64: 64, 64>}, {pipeline_mode = #tpu.pipeline_mode<synchronous>, transform_indices = @transform_19, window_bounds = array<i64: 1, 64>}, {pipeline_mode = #tpu.pipeline_mode<synchronous>, transform_indices = @transform_20, window_bounds = array<i64: 64, 64>}, {pipeline_mode = #tpu.pipeline_mode<synchronous>, transform_indices = @transform_21, window_bounds = array<i64: 1, 64>}, {pipeline_mode = #tpu.pipeline_mode<synchronous>, transform_indices = @transform_22, window_bounds = array<i64: 64, 64>}, {pipeline_mode = #tpu.pipeline_mode<synchronous>, transform_indices = @transform_23, window_bounds = array<i64: 1, 64>}, {pipeline_mode = #tpu.pipeline_mode<synchronous>, transform_indices = @transform_24, window_bounds = array<i64: 64, 64>}, {pipeline_mode = #tpu.pipeline_mode<synchronous>, transform_indices = @transform_25, window_bounds = array<i64: 1, 64>}, {pipeline_mode = #tpu.pipeline_mode<synchronous>, transform_indices = @transform_26, window_bounds = array<i64: 64, 16>}, {pipeline_mode = #tpu.pipeline_mode<synchronous>, transform_indices = @transform_27, window_bounds = array<i64: 16, 16>}, {pipeline_mode = #tpu.pipeline_mode<synchronous>, transform_indices = @transform_28, window_bounds = array<i64: 1, 16>}, {pipeline_mode = #tpu.pipeline_mode<synchronous>, transform_indices = @transform_29, window_bounds = array<i64: 16, 8>}, {pipeline_mode = #tpu.pipeline_mode<synchronous>, transform_indices = @transform_30, window_bounds = array<i64: 1, 8>}, {pipeline_mode = #tpu.pipeline_mode<synchronous>, transform_indices = @transform_31, window_bounds = array<i64: 16, 8>}, {pipeline_mode = #tpu.pipeline_mode<synchronous>, transform_indices = @transform_32, window_bounds = array<i64: 1, 8>}, {pipeline_mode = #tpu.pipeline_mode<synchronous>, transform_indices = @transform_33, window_bounds = array<i64: 8, 8>}, {pipeline_mode = #tpu.pipeline_mode<synchronous>, transform_indices = @transform_34, window_bounds = array<i64: 1, 8>}, {transform_indices = @transform_35, window_bounds = array<i64: 1, 16, 8>}, {transform_indices = @transform_36, window_bounds = array<i64: 1, 1, 16, 8>}]} {
    %c0 = arith.constant 0 : index
    %c0_0 = arith.constant 0 : index
    %c0_1 = arith.constant 0 : index
    %c0_2 = arith.constant 0 : index
    %0 = vector.load %arg1[%c0, %c0_0, %c0_1, %c0_2] : memref<1x1x16x8xf32, #tpu.memory_space<vmem>>, vector<1x1x16x8xf32>
    %1 = vector.shape_cast %0 : vector<1x1x16x8xf32> to vector<16x8xf32>
    %c0_3 = arith.constant 0 : index
    %c0_4 = arith.constant 0 : index
    %2 = vector.load %arg2[%c0_3, %c0_4] : memref<64x16xf32, #tpu.memory_space<vmem>>, vector<64x16xf32>
    %cst = arith.constant dense<0.000000e+00> : vector<64x8xf32>
    %3 = tpu.matmul %2, %1, %cst {dimension_numbers = #tpu.dot_dimension_numbers<[1], [0], [0], [1], [0, 0, 1, 1], [], []>, precision = #tpu.contract_precision<fp32>} : vector<64x16xf32>, vector<16x8xf32>, vector<64x8xf32> -> vector<64x8xf32>
    %4 = vector.extract_strided_slice %3 {offsets = [0, 0], sizes = [16, 8], strides = [1, 1]} : vector<64x8xf32> to vector<16x8xf32>
    %5 = vector.extract_strided_slice %3 {offsets = [16, 0], sizes = [16, 8], strides = [1, 1]} : vector<64x8xf32> to vector<16x8xf32>
    %6 = vector.extract_strided_slice %3 {offsets = [32, 0], sizes = [16, 8], strides = [1, 1]} : vector<64x8xf32> to vector<16x8xf32>
    %7 = vector.extract_strided_slice %3 {offsets = [48, 0], sizes = [16, 8], strides = [1, 1]} : vector<64x8xf32> to vector<16x8xf32>
    %8 = arith.addf %4, %5 : vector<16x8xf32>
    %9 = arith.addf %8, %6 : vector<16x8xf32>
    %10 = arith.addf %9, %7 : vector<16x8xf32>
    %11 = arith.subf %4, %6 : vector<16x8xf32>
    %12 = arith.subf %4, %5 : vector<16x8xf32>
    %13 = arith.addf %12, %6 : vector<16x8xf32>
    %14 = arith.subf %13, %7 : vector<16x8xf32>
    %15 = arith.subf %7, %5 : vector<16x8xf32>
    %cst_5 = arith.constant 0.000000e+00 : f32
    %16 = vector.broadcast %cst_5 : f32 to vector<16x8xf32>
    %c0_6 = arith.constant 0 : index
    %c0_7 = arith.constant 0 : index
    %17 = vector.load %arg38[%c0_6, %c0_7] : memref<16x32xf32, #tpu.memory_space<vmem>>, vector<16x8xf32>
    tpu.vector_store %arg38[%c0_6, %c0_7], %10 {strides = array<i32>} : memref<16x32xf32, #tpu.memory_space<vmem>>, vector<16x8xf32>,
    %c0_8 = arith.constant 0 : index
    %c8 = arith.constant 8 : index
    %18 = vector.load %arg38[%c0_8, %c8] : memref<16x32xf32, #tpu.memory_space<vmem>>, vector<16x8xf32>
    tpu.vector_store %arg38[%c0_8, %c8], %11 {strides = array<i32>} : memref<16x32xf32, #tpu.memory_space<vmem>>, vector<16x8xf32>,
    %c0_9 = arith.constant 0 : index
    %c16 = arith.constant 16 : index
    %19 = vector.load %arg38[%c0_9, %c16] : memref<16x32xf32, #tpu.memory_space<vmem>>, vector<16x8xf32>
    tpu.vector_store %arg38[%c0_9, %c16], %14 {strides = array<i32>} : memref<16x32xf32, #tpu.memory_space<vmem>>, vector<16x8xf32>,
    %c0_10 = arith.constant 0 : index
    %c24 = arith.constant 24 : index
    %20 = vector.load %arg38[%c0_10, %c24] : memref<16x32xf32, #tpu.memory_space<vmem>>, vector<16x8xf32>
    tpu.vector_store %arg38[%c0_10, %c24], %11 {strides = array<i32>} : memref<16x32xf32, #tpu.memory_space<vmem>>, vector<16x8xf32>,
    %c0_11 = arith.constant 0 : index
    %c0_12 = arith.constant 0 : index
    %21 = vector.load %arg39[%c0_11, %c0_12] : memref<16x32xf32, #tpu.memory_space<vmem>>, vector<16x8xf32>
    tpu.vector_store %arg39[%c0_11, %c0_12], %16 {strides = array<i32>} : memref<16x32xf32, #tpu.memory_space<vmem>>, vector<16x8xf32>,
    %c0_13 = arith.constant 0 : index
    %c8_14 = arith.constant 8 : index
    %22 = vector.load %arg39[%c0_13, %c8_14] : memref<16x32xf32, #tpu.memory_space<vmem>>, vector<16x8xf32>
    tpu.vector_store %arg39[%c0_13, %c8_14], %15 {strides = array<i32>} : memref<16x32xf32, #tpu.memory_space<vmem>>, vector<16x8xf32>,
    %c0_15 = arith.constant 0 : index
    %c16_16 = arith.constant 16 : index
    %23 = vector.load %arg39[%c0_15, %c16_16] : memref<16x32xf32, #tpu.memory_space<vmem>>, vector<16x8xf32>
    tpu.vector_store %arg39[%c0_15, %c16_16], %16 {strides = array<i32>} : memref<16x32xf32, #tpu.memory_space<vmem>>, vector<16x8xf32>,
    %cst_17 = arith.constant 0.000000e+00 : f32
    %24 = vector.broadcast %cst_17 : f32 to vector<16x8xf32>
    %25 = arith.subf %24, %15 : vector<16x8xf32>
    %c0_18 = arith.constant 0 : index
    %c24_19 = arith.constant 24 : index
    %26 = vector.load %arg39[%c0_18, %c24_19] : memref<16x32xf32, #tpu.memory_space<vmem>>, vector<16x8xf32>
    tpu.vector_store %arg39[%c0_18, %c24_19], %25 {strides = array<i32>} : memref<16x32xf32, #tpu.memory_space<vmem>>, vector<16x8xf32>,
    %c0_20 = arith.constant 0 : index
    %c0_21 = arith.constant 0 : index
    %27 = vector.load %arg38[%c0_20, %c0_21] : memref<16x32xf32, #tpu.memory_space<vmem>>, vector<16x32xf32>
    %c0_22 = arith.constant 0 : index
    %c0_23 = arith.constant 0 : index
    %28 = vector.load %arg39[%c0_22, %c0_23] : memref<16x32xf32, #tpu.memory_space<vmem>>, vector<16x32xf32>
    %c0_24 = arith.constant 0 : index
    %c0_25 = arith.constant 0 : index
    %29 = vector.load %arg3[%c0_24, %c0_25] : memref<32x64xf32, #tpu.memory_space<vmem>>, vector<32x64xf32>
    %cst_26 = arith.constant dense<0.000000e+00> : vector<16x64xf32>
    %30 = tpu.matmul %27, %29, %cst_26 {dimension_numbers = #tpu.dot_dimension_numbers<[1], [0], [0], [1], [0, 0, 1, 1], [], []>, precision = #tpu.contract_precision<fp32>} : vector<16x32xf32>, vector<32x64xf32>, vector<16x64xf32> -> vector<16x64xf32>
    %c0_27 = arith.constant 0 : index
    %c0_28 = arith.constant 0 : index
    %31 = vector.load %arg4[%c0_27, %c0_28] : memref<1x64xf32, #tpu.memory_space<vmem>>, vector<1x64xf32>
    %32 = vector.broadcast %31 : vector<1x64xf32> to vector<16x64xf32>
    %33 = arith.addf %30, %32 : vector<16x64xf32>
    %c0_29 = arith.constant 0 : index
    %c0_30 = arith.constant 0 : index
    %34 = vector.load %arg5[%c0_29, %c0_30] : memref<32x64xf32, #tpu.memory_space<vmem>>, vector<32x64xf32>
    %cst_31 = arith.constant dense<0.000000e+00> : vector<16x64xf32>
    %35 = tpu.matmul %27, %34, %cst_31 {dimension_numbers = #tpu.dot_dimension_numbers<[1], [0], [0], [1], [0, 0, 1, 1], [], []>, precision = #tpu.contract_precision<fp32>} : vector<16x32xf32>, vector<32x64xf32>, vector<16x64xf32> -> vector<16x64xf32>
    %c0_32 = arith.constant 0 : index
    %c0_33 = arith.constant 0 : index
    %36 = vector.load %arg6[%c0_32, %c0_33] : memref<1x64xf32, #tpu.memory_space<vmem>>, vector<1x64xf32>
    %37 = vector.broadcast %36 : vector<1x64xf32> to vector<16x64xf32>
    %38 = arith.addf %35, %37 : vector<16x64xf32>
    %39 = arith.negf %38 : vector<16x64xf32>
    %40 = math.exp %39 : vector<16x64xf32>
    %cst_34 = arith.constant 1.000000e+00 : f32
    %41 = vector.broadcast %cst_34 : f32 to vector<16x64xf32>
    %42 = arith.addf %41, %40 : vector<16x64xf32>
    %43 = arith.divf %41, %42 : vector<16x64xf32>
    %44 = arith.mulf %33, %43 : vector<16x64xf32>
    %c0_35 = arith.constant 0 : index
    %c0_36 = arith.constant 0 : index
    %45 = vector.load %arg7[%c0_35, %c0_36] : memref<32x64xf32, #tpu.memory_space<vmem>>, vector<32x64xf32>
    %cst_37 = arith.constant dense<0.000000e+00> : vector<16x64xf32>
    %46 = tpu.matmul %28, %45, %cst_37 {dimension_numbers = #tpu.dot_dimension_numbers<[1], [0], [0], [1], [0, 0, 1, 1], [], []>, precision = #tpu.contract_precision<fp32>} : vector<16x32xf32>, vector<32x64xf32>, vector<16x64xf32> -> vector<16x64xf32>
    %c0_38 = arith.constant 0 : index
    %c0_39 = arith.constant 0 : index
    %47 = vector.load %arg8[%c0_38, %c0_39] : memref<1x64xf32, #tpu.memory_space<vmem>>, vector<1x64xf32>
    %48 = vector.broadcast %47 : vector<1x64xf32> to vector<16x64xf32>
    %49 = arith.addf %46, %48 : vector<16x64xf32>
    %c0_40 = arith.constant 0 : index
    %c0_41 = arith.constant 0 : index
    %50 = vector.load %arg9[%c0_40, %c0_41] : memref<32x64xf32, #tpu.memory_space<vmem>>, vector<32x64xf32>
    %cst_42 = arith.constant dense<0.000000e+00> : vector<16x64xf32>
    %51 = tpu.matmul %28, %50, %cst_42 {dimension_numbers = #tpu.dot_dimension_numbers<[1], [0], [0], [1], [0, 0, 1, 1], [], []>, precision = #tpu.contract_precision<fp32>} : vector<16x32xf32>, vector<32x64xf32>, vector<16x64xf32> -> vector<16x64xf32>
    %c0_43 = arith.constant 0 : index
    %c0_44 = arith.constant 0 : index
    %52 = vector.load %arg10[%c0_43, %c0_44] : memref<1x64xf32, #tpu.memory_space<vmem>>, vector<1x64xf32>
    %53 = vector.broadcast %52 : vector<1x64xf32> to vector<16x64xf32>
    %54 = arith.addf %51, %53 : vector<16x64xf32>
    %55 = arith.negf %54 : vector<16x64xf32>
    %56 = math.exp %55 : vector<16x64xf32>
    %cst_45 = arith.constant 1.000000e+00 : f32
    %57 = vector.broadcast %cst_45 : f32 to vector<16x64xf32>
    %58 = arith.addf %57, %56 : vector<16x64xf32>
    %59 = arith.divf %57, %58 : vector<16x64xf32>
    %60 = arith.mulf %49, %59 : vector<16x64xf32>
    %c0_46 = arith.constant 0 : index
    %c0_47 = arith.constant 0 : index
    %61 = vector.load %arg11[%c0_46, %c0_47] : memref<64x64xf32, #tpu.memory_space<vmem>>, vector<64x64xf32>
    %cst_48 = arith.constant dense<0.000000e+00> : vector<16x64xf32>
    %62 = tpu.matmul %44, %61, %cst_48 {dimension_numbers = #tpu.dot_dimension_numbers<[1], [0], [0], [1], [0, 0, 1, 1], [], []>, precision = #tpu.contract_precision<fp32>} : vector<16x64xf32>, vector<64x64xf32>, vector<16x64xf32> -> vector<16x64xf32>
    %c0_49 = arith.constant 0 : index
    %c0_50 = arith.constant 0 : index
    %63 = vector.load %arg12[%c0_49, %c0_50] : memref<1x64xf32, #tpu.memory_space<vmem>>, vector<1x64xf32>
    %64 = vector.broadcast %63 : vector<1x64xf32> to vector<16x64xf32>
    %65 = arith.addf %62, %64 : vector<16x64xf32>
    %c0_51 = arith.constant 0 : index
    %c0_52 = arith.constant 0 : index
    %66 = vector.load %arg13[%c0_51, %c0_52] : memref<64x64xf32, #tpu.memory_space<vmem>>, vector<64x64xf32>
    %cst_53 = arith.constant dense<0.000000e+00> : vector<16x64xf32>
    %67 = tpu.matmul %44, %66, %cst_53 {dimension_numbers = #tpu.dot_dimension_numbers<[1], [0], [0], [1], [0, 0, 1, 1], [], []>, precision = #tpu.contract_precision<fp32>} : vector<16x64xf32>, vector<64x64xf32>, vector<16x64xf32> -> vector<16x64xf32>
    %c0_54 = arith.constant 0 : index
    %c0_55 = arith.constant 0 : index
    %68 = vector.load %arg14[%c0_54, %c0_55] : memref<1x64xf32, #tpu.memory_space<vmem>>, vector<1x64xf32>
    %69 = vector.broadcast %68 : vector<1x64xf32> to vector<16x64xf32>
    %70 = arith.addf %67, %69 : vector<16x64xf32>
    %71 = arith.negf %70 : vector<16x64xf32>
    %72 = math.exp %71 : vector<16x64xf32>
    %cst_56 = arith.constant 1.000000e+00 : f32
    %73 = vector.broadcast %cst_56 : f32 to vector<16x64xf32>
    %74 = arith.addf %73, %72 : vector<16x64xf32>
    %75 = arith.divf %73, %74 : vector<16x64xf32>
    %76 = arith.mulf %65, %75 : vector<16x64xf32>
    %c0_57 = arith.constant 0 : index
    %c0_58 = arith.constant 0 : index
    %77 = vector.load %arg15[%c0_57, %c0_58] : memref<64x64xf32, #tpu.memory_space<vmem>>, vector<64x64xf32>
    %cst_59 = arith.constant dense<0.000000e+00> : vector<16x64xf32>
    %78 = tpu.matmul %60, %77, %cst_59 {dimension_numbers = #tpu.dot_dimension_numbers<[1], [0], [0], [1], [0, 0, 1, 1], [], []>, precision = #tpu.contract_precision<fp32>} : vector<16x64xf32>, vector<64x64xf32>, vector<16x64xf32> -> vector<16x64xf32>
    %c0_60 = arith.constant 0 : index
    %c0_61 = arith.constant 0 : index
    %79 = vector.load %arg16[%c0_60, %c0_61] : memref<1x64xf32, #tpu.memory_space<vmem>>, vector<1x64xf32>
    %80 = vector.broadcast %79 : vector<1x64xf32> to vector<16x64xf32>
    %81 = arith.addf %78, %80 : vector<16x64xf32>
    %c0_62 = arith.constant 0 : index
    %c0_63 = arith.constant 0 : index
    %82 = vector.load %arg17[%c0_62, %c0_63] : memref<64x64xf32, #tpu.memory_space<vmem>>, vector<64x64xf32>
    %cst_64 = arith.constant dense<0.000000e+00> : vector<16x64xf32>
    %83 = tpu.matmul %60, %82, %cst_64 {dimension_numbers = #tpu.dot_dimension_numbers<[1], [0], [0], [1], [0, 0, 1, 1], [], []>, precision = #tpu.contract_precision<fp32>} : vector<16x64xf32>, vector<64x64xf32>, vector<16x64xf32> -> vector<16x64xf32>
    %c0_65 = arith.constant 0 : index
    %c0_66 = arith.constant 0 : index
    %84 = vector.load %arg18[%c0_65, %c0_66] : memref<1x64xf32, #tpu.memory_space<vmem>>, vector<1x64xf32>
    %85 = vector.broadcast %84 : vector<1x64xf32> to vector<16x64xf32>
    %86 = arith.addf %83, %85 : vector<16x64xf32>
    %87 = arith.negf %86 : vector<16x64xf32>
    %88 = math.exp %87 : vector<16x64xf32>
    %cst_67 = arith.constant 1.000000e+00 : f32
    %89 = vector.broadcast %cst_67 : f32 to vector<16x64xf32>
    %90 = arith.addf %89, %88 : vector<16x64xf32>
    %91 = arith.divf %89, %90 : vector<16x64xf32>
    %92 = arith.mulf %81, %91 : vector<16x64xf32>
    %c0_68 = arith.constant 0 : index
    %c0_69 = arith.constant 0 : index
    %93 = vector.load %arg19[%c0_68, %c0_69] : memref<64x64xf32, #tpu.memory_space<vmem>>, vector<64x64xf32>
    %cst_70 = arith.constant dense<0.000000e+00> : vector<16x64xf32>
    %94 = tpu.matmul %76, %93, %cst_70 {dimension_numbers = #tpu.dot_dimension_numbers<[1], [0], [0], [1], [0, 0, 1, 1], [], []>, precision = #tpu.contract_precision<fp32>} : vector<16x64xf32>, vector<64x64xf32>, vector<16x64xf32> -> vector<16x64xf32>
    %c0_71 = arith.constant 0 : index
    %c0_72 = arith.constant 0 : index
    %95 = vector.load %arg20[%c0_71, %c0_72] : memref<1x64xf32, #tpu.memory_space<vmem>>, vector<1x64xf32>
    %96 = vector.broadcast %95 : vector<1x64xf32> to vector<16x64xf32>
    %97 = arith.addf %94, %96 : vector<16x64xf32>
    %c0_73 = arith.constant 0 : index
    %c0_74 = arith.constant 0 : index
    %98 = vector.load %arg21[%c0_73, %c0_74] : memref<64x64xf32, #tpu.memory_space<vmem>>, vector<64x64xf32>
    %cst_75 = arith.constant dense<0.000000e+00> : vector<16x64xf32>
    %99 = tpu.matmul %76, %98, %cst_75 {dimension_numbers = #tpu.dot_dimension_numbers<[1], [0], [0], [1], [0, 0, 1, 1], [], []>, precision = #tpu.contract_precision<fp32>} : vector<16x64xf32>, vector<64x64xf32>, vector<16x64xf32> -> vector<16x64xf32>
    %c0_76 = arith.constant 0 : index
    %c0_77 = arith.constant 0 : index
    %100 = vector.load %arg22[%c0_76, %c0_77] : memref<1x64xf32, #tpu.memory_space<vmem>>, vector<1x64xf32>
    %101 = vector.broadcast %100 : vector<1x64xf32> to vector<16x64xf32>
    %102 = arith.addf %99, %101 : vector<16x64xf32>
    %103 = arith.negf %102 : vector<16x64xf32>
    %104 = math.exp %103 : vector<16x64xf32>
    %cst_78 = arith.constant 1.000000e+00 : f32
    %105 = vector.broadcast %cst_78 : f32 to vector<16x64xf32>
    %106 = arith.addf %105, %104 : vector<16x64xf32>
    %107 = arith.divf %105, %106 : vector<16x64xf32>
    %108 = arith.mulf %97, %107 : vector<16x64xf32>
    %c0_79 = arith.constant 0 : index
    %c0_80 = arith.constant 0 : index
    %109 = vector.load %arg23[%c0_79, %c0_80] : memref<64x64xf32, #tpu.memory_space<vmem>>, vector<64x64xf32>
    %cst_81 = arith.constant dense<0.000000e+00> : vector<16x64xf32>
    %110 = tpu.matmul %92, %109, %cst_81 {dimension_numbers = #tpu.dot_dimension_numbers<[1], [0], [0], [1], [0, 0, 1, 1], [], []>, precision = #tpu.contract_precision<fp32>} : vector<16x64xf32>, vector<64x64xf32>, vector<16x64xf32> -> vector<16x64xf32>
    %c0_82 = arith.constant 0 : index
    %c0_83 = arith.constant 0 : index
    %111 = vector.load %arg24[%c0_82, %c0_83] : memref<1x64xf32, #tpu.memory_space<vmem>>, vector<1x64xf32>
    %112 = vector.broadcast %111 : vector<1x64xf32> to vector<16x64xf32>
    %113 = arith.addf %110, %112 : vector<16x64xf32>
    %c0_84 = arith.constant 0 : index
    %c0_85 = arith.constant 0 : index
    %114 = vector.load %arg25[%c0_84, %c0_85] : memref<64x64xf32, #tpu.memory_space<vmem>>, vector<64x64xf32>
    %cst_86 = arith.constant dense<0.000000e+00> : vector<16x64xf32>
    %115 = tpu.matmul %92, %114, %cst_86 {dimension_numbers = #tpu.dot_dimension_numbers<[1], [0], [0], [1], [0, 0, 1, 1], [], []>, precision = #tpu.contract_precision<fp32>} : vector<16x64xf32>, vector<64x64xf32>, vector<16x64xf32> -> vector<16x64xf32>
    %c0_87 = arith.constant 0 : index
    %c0_88 = arith.constant 0 : index
    %116 = vector.load %arg26[%c0_87, %c0_88] : memref<1x64xf32, #tpu.memory_space<vmem>>, vector<1x64xf32>
    %117 = vector.broadcast %116 : vector<1x64xf32> to vector<16x64xf32>
    %118 = arith.addf %115, %117 : vector<16x64xf32>
    %119 = arith.negf %118 : vector<16x64xf32>
    %120 = math.exp %119 : vector<16x64xf32>
    %cst_89 = arith.constant 1.000000e+00 : f32
    %121 = vector.broadcast %cst_89 : f32 to vector<16x64xf32>
    %122 = arith.addf %121, %120 : vector<16x64xf32>
    %123 = arith.divf %121, %122 : vector<16x64xf32>
    %124 = arith.mulf %113, %123 : vector<16x64xf32>
    %125 = vector.extract_strided_slice %108 {offsets = [0, 0], sizes = [16, 16], strides = [1, 1]} : vector<16x64xf32> to vector<16x16xf32>
    %126 = vector.extract_strided_slice %108 {offsets = [0, 16], sizes = [16, 16], strides = [1, 1]} : vector<16x64xf32> to vector<16x16xf32>
    %127 = vector.extract_strided_slice %108 {offsets = [0, 32], sizes = [16, 16], strides = [1, 1]} : vector<16x64xf32> to vector<16x16xf32>
    %128 = vector.extract_strided_slice %124 {offsets = [0, 16], sizes = [16, 16], strides = [1, 1]} : vector<16x64xf32> to vector<16x16xf32>
    %129 = arith.addf %125, %127 : vector<16x16xf32>
    %cst_90 = arith.constant 2.000000e+00 : f32
    %130 = vector.broadcast %cst_90 : f32 to vector<16x16xf32>
    %131 = arith.mulf %130, %126 : vector<16x16xf32>
    %132 = arith.addf %129, %131 : vector<16x16xf32>
    %cst_91 = arith.constant 2.500000e-01 : f32
    %133 = vector.broadcast %cst_91 : f32 to vector<16x16xf32>
    %134 = arith.mulf %132, %133 : vector<16x16xf32>
    %c0_92 = arith.constant 0 : index
    %c0_93 = arith.constant 0 : index
    %135 = vector.load %arg40[%c0_92, %c0_93] : memref<16x64xf32, #tpu.memory_space<vmem>>, vector<16x16xf32>
    tpu.vector_store %arg40[%c0_92, %c0_93], %134 {strides = array<i32>} : memref<16x64xf32, #tpu.memory_space<vmem>>, vector<16x16xf32>,
    %136 = arith.subf %125, %127 : vector<16x16xf32>
    %cst_94 = arith.constant 2.000000e+00 : f32
    %137 = vector.broadcast %cst_94 : f32 to vector<16x16xf32>
    %138 = arith.mulf %137, %128 : vector<16x16xf32>
    %139 = arith.subf %136, %138 : vector<16x16xf32>
    %cst_95 = arith.constant 2.500000e-01 : f32
    %140 = vector.broadcast %cst_95 : f32 to vector<16x16xf32>
    %141 = arith.mulf %139, %140 : vector<16x16xf32>
    %c0_96 = arith.constant 0 : index
    %c16_97 = arith.constant 16 : index
    %142 = vector.load %arg40[%c0_96, %c16_97] : memref<16x64xf32, #tpu.memory_space<vmem>>, vector<16x16xf32>
    tpu.vector_store %arg40[%c0_96, %c16_97], %141 {strides = array<i32>} : memref<16x64xf32, #tpu.memory_space<vmem>>, vector<16x16xf32>,
    %143 = arith.addf %125, %127 : vector<16x16xf32>
    %cst_98 = arith.constant 2.000000e+00 : f32
    %144 = vector.broadcast %cst_98 : f32 to vector<16x16xf32>
    %145 = arith.mulf %144, %126 : vector<16x16xf32>
    %146 = arith.subf %143, %145 : vector<16x16xf32>
    %cst_99 = arith.constant 2.500000e-01 : f32
    %147 = vector.broadcast %cst_99 : f32 to vector<16x16xf32>
    %148 = arith.mulf %146, %147 : vector<16x16xf32>
    %c0_100 = arith.constant 0 : index
    %c32 = arith.constant 32 : index
    %149 = vector.load %arg40[%c0_100, %c32] : memref<16x64xf32, #tpu.memory_space<vmem>>, vector<16x16xf32>
    tpu.vector_store %arg40[%c0_100, %c32], %148 {strides = array<i32>} : memref<16x64xf32, #tpu.memory_space<vmem>>, vector<16x16xf32>,
    %150 = arith.subf %125, %127 : vector<16x16xf32>
    %cst_101 = arith.constant 2.000000e+00 : f32
    %151 = vector.broadcast %cst_101 : f32 to vector<16x16xf32>
    %152 = arith.mulf %151, %128 : vector<16x16xf32>
    %153 = arith.addf %150, %152 : vector<16x16xf32>
    %cst_102 = arith.constant 2.500000e-01 : f32
    %154 = vector.broadcast %cst_102 : f32 to vector<16x16xf32>
    %155 = arith.mulf %153, %154 : vector<16x16xf32>
    %c0_103 = arith.constant 0 : index
    %c48 = arith.constant 48 : index
    %156 = vector.load %arg40[%c0_103, %c48] : memref<16x64xf32, #tpu.memory_space<vmem>>, vector<16x16xf32>
    tpu.vector_store %arg40[%c0_103, %c48], %155 {strides = array<i32>} : memref<16x64xf32, #tpu.memory_space<vmem>>, vector<16x16xf32>,
    %c0_104 = arith.constant 0 : index
    %c0_105 = arith.constant 0 : index
    %157 = vector.load %arg40[%c0_104, %c0_105] : memref<16x64xf32, #tpu.memory_space<vmem>>, vector<16x64xf32>
    %c0_106 = arith.constant 0 : index
    %c0_107 = arith.constant 0 : index
    %158 = vector.load %arg27[%c0_106, %c0_107] : memref<64x16xf32, #tpu.memory_space<vmem>>, vector<64x16xf32>
    %cst_108 = arith.constant dense<0.000000e+00> : vector<16x16xf32>
    %159 = tpu.matmul %157, %158, %cst_108 {dimension_numbers = #tpu.dot_dimension_numbers<[1], [0], [0], [1], [0, 0, 1, 1], [], []>, precision = #tpu.contract_precision<fp32>} : vector<16x64xf32>, vector<64x16xf32>, vector<16x16xf32> -> vector<16x16xf32>
    %c0_109 = arith.constant 0 : index
    %c0_110 = arith.constant 0 : index
    %160 = vector.load %arg28[%c0_109, %c0_110] : memref<16x16xf32, #tpu.memory_space<vmem>>, vector<16x16xf32>
    %cst_111 = arith.constant dense<0.000000e+00> : vector<16x16xf32>
    %161 = tpu.matmul %159, %160, %cst_111 {dimension_numbers = #tpu.dot_dimension_numbers<[1], [0], [0], [1], [0, 0, 1, 1], [], []>, precision = #tpu.contract_precision<fp32>} : vector<16x16xf32>, vector<16x16xf32>, vector<16x16xf32> -> vector<16x16xf32>
    %c0_112 = arith.constant 0 : index
    %c0_113 = arith.constant 0 : index
    %162 = vector.load %arg29[%c0_112, %c0_113] : memref<1x16xf32, #tpu.memory_space<vmem>>, vector<1x16xf32>
    %163 = vector.broadcast %162 : vector<1x16xf32> to vector<16x16xf32>
    %164 = arith.addf %161, %163 : vector<16x16xf32>
    %165 = arith.negf %164 : vector<16x16xf32>
    %166 = math.exp %165 : vector<16x16xf32>
    %cst_114 = arith.constant 1.000000e+00 : f32
    %167 = vector.broadcast %cst_114 : f32 to vector<16x16xf32>
    %168 = arith.addf %167, %166 : vector<16x16xf32>
    %169 = arith.divf %167, %168 : vector<16x16xf32>
    %c0_115 = arith.constant 0 : index
    %c0_116 = arith.constant 0 : index
    %170 = vector.load %arg30[%c0_115, %c0_116] : memref<16x8xf32, #tpu.memory_space<vmem>>, vector<16x8xf32>
    %cst_117 = arith.constant dense<0.000000e+00> : vector<16x8xf32>
    %171 = tpu.matmul %169, %170, %cst_117 {dimension_numbers = #tpu.dot_dimension_numbers<[1], [0], [0], [1], [0, 0, 1, 1], [], []>, precision = #tpu.contract_precision<fp32>} : vector<16x16xf32>, vector<16x8xf32>, vector<16x8xf32> -> vector<16x8xf32>
    %c0_118 = arith.constant 0 : index
    %c0_119 = arith.constant 0 : index
    %172 = vector.load %arg31[%c0_118, %c0_119] : memref<1x8xf32, #tpu.memory_space<vmem>>, vector<1x8xf32>
    %173 = vector.broadcast %172 : vector<1x8xf32> to vector<16x8xf32>
    %174 = arith.addf %171, %173 : vector<16x8xf32>
    %c0_120 = arith.constant 0 : index
    %c0_121 = arith.constant 0 : index
    %c0_122 = arith.constant 0 : index
    %175 = vector.load %arg36[%c0_120, %c0_121, %c0_122] : memref<1x16x8xf32, #tpu.memory_space<vmem>>, vector<1x16x8xf32>
    %176 = vector.shape_cast %175 : vector<1x16x8xf32> to vector<16x8xf32>
    %177 = vector.shape_cast %174 : vector<16x8xf32> to vector<1x16x8xf32>
    tpu.vector_store %arg36[%c0_120, %c0_121, %c0_122], %177 {strides = array<i32>} : memref<1x16x8xf32, #tpu.memory_space<vmem>>, vector<1x16x8xf32>,
    %c0_123 = arith.constant 0 : index
    %c0_124 = arith.constant 0 : index
    %178 = vector.load %arg34[%c0_123, %c0_124] : memref<8x8xf32, #tpu.memory_space<vmem>>, vector<8x8xf32>
    %cst_125 = arith.constant dense<0.000000e+00> : vector<16x8xf32>
    %179 = tpu.matmul %1, %178, %cst_125 {dimension_numbers = #tpu.dot_dimension_numbers<[1], [0], [0], [1], [0, 0, 1, 1], [], []>, precision = #tpu.contract_precision<fp32>} : vector<16x8xf32>, vector<8x8xf32>, vector<16x8xf32> -> vector<16x8xf32>
    %c0_126 = arith.constant 0 : index
    %c0_127 = arith.constant 0 : index
    %180 = vector.load %arg35[%c0_126, %c0_127] : memref<1x8xf32, #tpu.memory_space<vmem>>, vector<1x8xf32>
    %181 = vector.broadcast %180 : vector<1x8xf32> to vector<16x8xf32>
    %182 = arith.addf %179, %181 : vector<16x8xf32>
    %c0_128 = arith.constant 0 : index
    %c0_129 = arith.constant 0 : index
    %183 = vector.load %arg32[%c0_128, %c0_129] : memref<16x8xf32, #tpu.memory_space<vmem>>, vector<16x8xf32>
    %cst_130 = arith.constant dense<0.000000e+00> : vector<16x8xf32>
    %184 = tpu.matmul %159, %183, %cst_130 {dimension_numbers = #tpu.dot_dimension_numbers<[1], [0], [0], [1], [0, 0, 1, 1], [], []>, precision = #tpu.contract_precision<fp32>} : vector<16x16xf32>, vector<16x8xf32>, vector<16x8xf32> -> vector<16x8xf32>
    %c0_131 = arith.constant 0 : index
    %c0_132 = arith.constant 0 : index
    %185 = vector.load %arg33[%c0_131, %c0_132] : memref<1x8xf32, #tpu.memory_space<vmem>>, vector<1x8xf32>
    %186 = vector.broadcast %185 : vector<1x8xf32> to vector<16x8xf32>
    %187 = arith.addf %184, %186 : vector<16x8xf32>
    %188 = arith.subf %187, %182 : vector<16x8xf32>
    %189 = arith.negf %188 : vector<16x8xf32>
    %190 = math.exp %189 : vector<16x8xf32>
    %cst_133 = arith.constant 1.000000e+00 : f32
    %191 = vector.broadcast %cst_133 : f32 to vector<16x8xf32>
    %192 = arith.addf %191, %190 : vector<16x8xf32>
    %193 = arith.divf %191, %192 : vector<16x8xf32>
    %c0_134 = arith.constant 0 : index
    %c0_135 = arith.constant 0 : index
    %c0_136 = arith.constant 0 : index
    %c0_137 = arith.constant 0 : index
    %194 = vector.load %arg37[%c0_134, %c0_135, %c0_136, %c0_137] : memref<1x1x16x8xf32, #tpu.memory_space<vmem>>, vector<1x1x16x8xf32>
    %195 = vector.shape_cast %194 : vector<1x1x16x8xf32> to vector<16x8xf32>
    %196 = vector.shape_cast %193 : vector<16x8xf32> to vector<1x1x16x8xf32>
    tpu.vector_store %arg37[%c0_134, %c0_135, %c0_136, %c0_137], %196 {strides = array<i32>} : memref<1x1x16x8xf32, #tpu.memory_space<vmem>>, vector<1x1x16x8xf32>,
    return
  }
  func.func @transform_0(%arg0: i32) -> (i32, i32, i32, i32) {
    %c0_i32 = arith.constant 0 : i32
    %c0_i32_0 = arith.constant 0 : i32
    %c0_i32_1 = arith.constant 0 : i32
    %c0_i32_2 = arith.constant 0 : i32
    return %arg0, %c0_i32, %c0_i32_0, %c0_i32_1 : i32, i32, i32, i32
  }
  func.func @transform_1(%arg0: i32) -> (i32, i32) {
    %c0_i32 = arith.constant 0 : i32
    %c0_i32_0 = arith.constant 0 : i32
    %c0_i32_1 = arith.constant 0 : i32
    return %c0_i32, %c0_i32_0 : i32, i32
  }
  func.func @transform_2(%arg0: i32) -> (i32, i32) {
    %c0_i32 = arith.constant 0 : i32
    %c0_i32_0 = arith.constant 0 : i32
    %c0_i32_1 = arith.constant 0 : i32
    return %c0_i32, %c0_i32_0 : i32, i32
  }
  func.func @transform_3(%arg0: i32) -> (i32, i32) {
    %c0_i32 = arith.constant 0 : i32
    %c0_i32_0 = arith.constant 0 : i32
    %c0_i32_1 = arith.constant 0 : i32
    return %c0_i32, %c0_i32_0 : i32, i32
  }
  func.func @transform_4(%arg0: i32) -> (i32, i32) {
    %c0_i32 = arith.constant 0 : i32
    %c0_i32_0 = arith.constant 0 : i32
    %c0_i32_1 = arith.constant 0 : i32
    return %c0_i32, %c0_i32_0 : i32, i32
  }
  func.func @transform_5(%arg0: i32) -> (i32, i32) {
    %c0_i32 = arith.constant 0 : i32
    %c0_i32_0 = arith.constant 0 : i32
    %c0_i32_1 = arith.constant 0 : i32
    return %c0_i32, %c0_i32_0 : i32, i32
  }
  func.func @transform_6(%arg0: i32) -> (i32, i32) {
    %c0_i32 = arith.constant 0 : i32
    %c0_i32_0 = arith.constant 0 : i32
    %c0_i32_1 = arith.constant 0 : i32
    return %c0_i32, %c0_i32_0 : i32, i32
  }
  func.func @transform_7(%arg0: i32) -> (i32, i32) {
    %c0_i32 = arith.constant 0 : i32
    %c0_i32_0 = arith.constant 0 : i32
    %c0_i32_1 = arith.constant 0 : i32
    return %c0_i32, %c0_i32_0 : i32, i32
  }
  func.func @transform_8(%arg0: i32) -> (i32, i32) {
    %c0_i32 = arith.constant 0 : i32
    %c0_i32_0 = arith.constant 0 : i32
    %c0_i32_1 = arith.constant 0 : i32
    return %c0_i32, %c0_i32_0 : i32, i32
  }
  func.func @transform_9(%arg0: i32) -> (i32, i32) {
    %c0_i32 = arith.constant 0 : i32
    %c0_i32_0 = arith.constant 0 : i32
    %c0_i32_1 = arith.constant 0 : i32
    return %c0_i32, %c0_i32_0 : i32, i32
  }
  func.func @transform_10(%arg0: i32) -> (i32, i32) {
    %c0_i32 = arith.constant 0 : i32
    %c0_i32_0 = arith.constant 0 : i32
    %c0_i32_1 = arith.constant 0 : i32
    return %c0_i32, %c0_i32_0 : i32, i32
  }
  func.func @transform_11(%arg0: i32) -> (i32, i32) {
    %c0_i32 = arith.constant 0 : i32
    %c0_i32_0 = arith.constant 0 : i32
    %c0_i32_1 = arith.constant 0 : i32
    return %c0_i32, %c0_i32_0 : i32, i32
  }
  func.func @transform_12(%arg0: i32) -> (i32, i32) {
    %c0_i32 = arith.constant 0 : i32
    %c0_i32_0 = arith.constant 0 : i32
    %c0_i32_1 = arith.constant 0 : i32
    return %c0_i32, %c0_i32_0 : i32, i32
  }
  func.func @transform_13(%arg0: i32) -> (i32, i32) {
    %c0_i32 = arith.constant 0 : i32
    %c0_i32_0 = arith.constant 0 : i32
    %c0_i32_1 = arith.constant 0 : i32
    return %c0_i32, %c0_i32_0 : i32, i32
  }
  func.func @transform_14(%arg0: i32) -> (i32, i32) {
    %c0_i32 = arith.constant 0 : i32
    %c0_i32_0 = arith.constant 0 : i32
    %c0_i32_1 = arith.constant 0 : i32
    return %c0_i32, %c0_i32_0 : i32, i32
  }
  func.func @transform_15(%arg0: i32) -> (i32, i32) {
    %c0_i32 = arith.constant 0 : i32
    %c0_i32_0 = arith.constant 0 : i32
    %c0_i32_1 = arith.constant 0 : i32
    return %c0_i32, %c0_i32_0 : i32, i32
  }
  func.func @transform_16(%arg0: i32) -> (i32, i32) {
    %c0_i32 = arith.constant 0 : i32
    %c0_i32_0 = arith.constant 0 : i32
    %c0_i32_1 = arith.constant 0 : i32
    return %c0_i32, %c0_i32_0 : i32, i32
  }
  func.func @transform_17(%arg0: i32) -> (i32, i32) {
    %c0_i32 = arith.constant 0 : i32
    %c0_i32_0 = arith.constant 0 : i32
    %c0_i32_1 = arith.constant 0 : i32
    return %c0_i32, %c0_i32_0 : i32, i32
  }
  func.func @transform_18(%arg0: i32) -> (i32, i32) {
    %c0_i32 = arith.constant 0 : i32
    %c0_i32_0 = arith.constant 0 : i32
    %c0_i32_1 = arith.constant 0 : i32
    return %c0_i32, %c0_i32_0 : i32, i32
  }
  func.func @transform_19(%arg0: i32) -> (i32, i32) {
    %c0_i32 = arith.constant 0 : i32
    %c0_i32_0 = arith.constant 0 : i32
    %c0_i32_1 = arith.constant 0 : i32
    return %c0_i32, %c0_i32_0 : i32, i32
  }
  func.func @transform_20(%arg0: i32) -> (i32, i32) {
    %c0_i32 = arith.constant 0 : i32
    %c0_i32_0 = arith.constant 0 : i32
    %c0_i32_1 = arith.constant 0 : i32
    return %c0_i32, %c0_i32_0 : i32, i32
  }
  func.func @transform_21(%arg0: i32) -> (i32, i32) {
    %c0_i32 = arith.constant 0 : i32
    %c0_i32_0 = arith.constant 0 : i32
    %c0_i32_1 = arith.constant 0 : i32
    return %c0_i32, %c0_i32_0 : i32, i32
  }
  func.func @transform_22(%arg0: i32) -> (i32, i32) {
    %c0_i32 = arith.constant 0 : i32
    %c0_i32_0 = arith.constant 0 : i32
    %c0_i32_1 = arith.constant 0 : i32
    return %c0_i32, %c0_i32_0 : i32, i32
  }
  func.func @transform_23(%arg0: i32) -> (i32, i32) {
    %c0_i32 = arith.constant 0 : i32
    %c0_i32_0 = arith.constant 0 : i32
    %c0_i32_1 = arith.constant 0 : i32
    return %c0_i32, %c0_i32_0 : i32, i32
  }
  func.func @transform_24(%arg0: i32) -> (i32, i32) {
    %c0_i32 = arith.constant 0 : i32
    %c0_i32_0 = arith.constant 0 : i32
    %c0_i32_1 = arith.constant 0 : i32
    return %c0_i32, %c0_i32_0 : i32, i32
  }
  func.func @transform_25(%arg0: i32) -> (i32, i32) {
    %c0_i32 = arith.constant 0 : i32
    %c0_i32_0 = arith.constant 0 : i32
    %c0_i32_1 = arith.constant 0 : i32
    return %c0_i32, %c0_i32_0 : i32, i32
  }
  func.func @transform_26(%arg0: i32) -> (i32, i32) {
    %c0_i32 = arith.constant 0 : i32
    %c0_i32_0 = arith.constant 0 : i32
    %c0_i32_1 = arith.constant 0 : i32
    return %c0_i32, %c0_i32_0 : i32, i32
  }
  func.func @transform_27(%arg0: i32) -> (i32, i32) {
    %c0_i32 = arith.constant 0 : i32
    %c0_i32_0 = arith.constant 0 : i32
    %c0_i32_1 = arith.constant 0 : i32
    return %c0_i32, %c0_i32_0 : i32, i32
  }
  func.func @transform_28(%arg0: i32) -> (i32, i32) {
    %c0_i32 = arith.constant 0 : i32
    %c0_i32_0 = arith.constant 0 : i32
    %c0_i32_1 = arith.constant 0 : i32
    return %c0_i32, %c0_i32_0 : i32, i32
  }
  func.func @transform_29(%arg0: i32) -> (i32, i32) {
    %c0_i32 = arith.constant 0 : i32
    %c0_i32_0 = arith.constant 0 : i32
    %c0_i32_1 = arith.constant 0 : i32
    return %c0_i32, %c0_i32_0 : i32, i32
  }
  func.func @transform_30(%arg0: i32) -> (i32, i32) {
    %c0_i32 = arith.constant 0 : i32
    %c0_i32_0 = arith.constant 0 : i32
    %c0_i32_1 = arith.constant 0 : i32
    return %c0_i32, %c0_i32_0 : i32, i32
  }
  func.func @transform_31(%arg0: i32) -> (i32, i32) {
    %c0_i32 = arith.constant 0 : i32
    %c0_i32_0 = arith.constant 0 : i32
    %c0_i32_1 = arith.constant 0 : i32
    return %c0_i32, %c0_i32_0 : i32, i32
  }
  func.func @transform_32(%arg0: i32) -> (i32, i32) {
    %c0_i32 = arith.constant 0 : i32
    %c0_i32_0 = arith.constant 0 : i32
    %c0_i32_1 = arith.constant 0 : i32
    return %c0_i32, %c0_i32_0 : i32, i32
  }
  func.func @transform_33(%arg0: i32) -> (i32, i32) {
    %c0_i32 = arith.constant 0 : i32
    %c0_i32_0 = arith.constant 0 : i32
    %c0_i32_1 = arith.constant 0 : i32
    return %c0_i32, %c0_i32_0 : i32, i32
  }
  func.func @transform_34(%arg0: i32) -> (i32, i32) {
    %c0_i32 = arith.constant 0 : i32
    %c0_i32_0 = arith.constant 0 : i32
    %c0_i32_1 = arith.constant 0 : i32
    return %c0_i32, %c0_i32_0 : i32, i32
  }
  func.func @transform_35(%arg0: i32) -> (i32, i32, i32) {
    %c0_i32 = arith.constant 0 : i32
    %c0_i32_0 = arith.constant 0 : i32
    %c0_i32_1 = arith.constant 0 : i32
    return %arg0, %c0_i32, %c0_i32_0 : i32, i32, i32
  }
  func.func @transform_36(%arg0: i32) -> (i32, i32, i32, i32) {
    %c0_i32 = arith.constant 0 : i32
    %c0_i32_0 = arith.constant 0 : i32
    %c0_i32_1 = arith.constant 0 : i32
    %c0_i32_2 = arith.constant 0 : i32
    return %arg0, %c0_i32, %c0_i32_0, %c0_i32_1 : i32, i32, i32, i32
  }
}

</mosaic_0001>

<bundles_post_ra>
// kernel: stock_block_forward.1
= control target key start
LH: loop header
LB: loop body
LE: loop exit
PB: predicated region body
PF: predicated region fallthrough
CT: control target
= control target key end

     0   :  { %s15857_s6 = smov 1   ;;  %s15858_s10 = smov 2   ;;  %s18982_s0 = inlined_call_operand.smem [shape: u32[37], index: -1, kind: input, shape index: {}] }
   0x1   :  { %s15933_s5 = sld [smem:[%s18982_s0]]   ;;  %s15859_s14 = smov 3  }
   0x2   :  { %s15938_s9 = sld [smem:[%s18982_s0 + %s15857_s6]]   ;;  %s15860_s18 = smov 4  }
   0x3   :  { %s15943_s13 = sld [smem:[%s18982_s0 + %s15858_s10]]   ;;  %s15861_s22 = smov 5  }
   0x4   :  { %s15948_s17 = sld [smem:[%s18982_s0 + %s15859_s14]]   ;;  %s15862_s26 = smov 6  }
   0x5   :  { %s15953_s21 = sld [smem:[%s18982_s0 + %s15860_s18]]   ;;  %s15863_s30 = smov 7  }
   0x6   :  { %s15958_s25 = sld [smem:[%s18982_s0 + %s15861_s22]]   ;;  %s15864_s4 = smov 8  }
   0x7   :  { %18993 = sst [smem:[#allocation51_spill]] %s15933_s5  ;;  %s15865_s10 = smov 9  }
   0x8   :  { %18994 = sst [smem:[#allocation52_spill]] %s15938_s9  ;;  %s15866_s15 = smov 10  }
   0x9   :  { %s15963_s29 = sld [smem:[%s18982_s0 + %s15862_s26]]   ;;  %s15867_s20 = smov 11  }
   0xa   :  { %18995 = sst [smem:[#allocation53_spill]] %s15948_s17  ;;  %s15868_s26 = smov 12  }
   0xb   :  { %s15968_s3 = sld [smem:[%s18982_s0 + %s15863_s30]]   ;;  %s15869_s1 = smov 13  }
   0xc   :  { %18996 = sst [smem:[#allocation54_spill]] %s15958_s25  ;;  %s15870_s7 = smov 14  }
   0xd   :  { %s15973_s8 = sld [smem:[%s18982_s0 + %s15864_s4]]   ;;  %s15872_s22 = smov 16  }
   0xe   :  { %s15978_s14 = sld [smem:[%s18982_s0 + %s15865_s10]]   ;;  %s15873_s28 = smov 17  }
   0xf   :  { %s15983_s19 = sld [smem:[%s18982_s0 + %s15866_s15]]   ;;  %s15871_s15 = smov 15  }
  0x10   :  { %s15988_s24 = sld [smem:[%s18982_s0 + %s15867_s20]]  }
  0x11   :  { %18997 = sst [smem:[#allocation55_spill]] %s15968_s3 }
  0x12   :  { %s15993_s30 = sld [smem:[%s18982_s0 + %s15868_s26]]  }
  0x13   :  { %s15998_s6 = sld [smem:[%s18982_s0 + %s15869_s1]]  }
  0x14   :  { %s16003_s12 = sld [smem:[%s18982_s0 + %s15870_s7]]   ;;  %s15874_s7 = smov 18  }
  0x15   :  { %18998 = sst [smem:[#allocation56_spill]] %s15983_s19 }
  0x16   :  { %18999 = sst [smem:[#allocation57_spill]] %s15988_s24 }
  0x17   :  { %s16008_s20 = sld [smem:[%s18982_s0 + %s15871_s15]]   ;;  %s15875_s15 = smov 19  }
  0x18   :  { %s16013_s27 = sld [smem:[%s18982_s0 + %s15872_s22]]   ;;  %s15876_s22 = smov 20  }
  0x19   :  { %19000 = sst [smem:[#allocation58_spill]] %s15998_s6 }
  0x1a   :  { %s16018_s4 = sld [smem:[%s18982_s0 + %s15873_s28]]   ;;  %s15877_s28 = smov 21  }
  0x1b   :  { %s16023_s24 = sld [smem:[%s18982_s0 + %s15874_s7]]   ;;  %s15878_s7 = smov 22  }
  0x1c   :  { %s16028_s6 = sld [smem:[%s18982_s0 + %s15875_s15]]   ;;  %s15879_s15 = smov 23  }
  0x1d   :  { %19001 = sst [smem:[#allocation59_spill]] %s16008_s20 }
  0x1e   :  { %s16033_s17 = sld [smem:[%s18982_s0 + %s15876_s22]]   ;;  %s15880_s22 = smov 24  }
  0x1f   :  { %s16038_s25 = sld [smem:[%s18982_s0 + %s15877_s28]]   ;;  %s15881_s28 = smov 25  }
  0x20   :  { %19002 = sst [smem:[#allocation60_spill]] %s16018_s4 }
  0x21   :  { %s16043_s19 = sld [smem:[%s18982_s0 + %s15878_s7]]   ;;  %s15882_s7 = smov 26  }
  0x22   :  { %19003 = sst [smem:[#allocation61_spill]] %s16028_s6 }
  0x23   :  { %s16048_s6 = sld [smem:[%s18982_s0 + %s15879_s15]]   ;;  %s15883_s15 = smov 27  }
  0x24   :  { %19004 = sst [smem:[#allocation62_spill]] %s16033_s17 }
  0x25   :  { %19005 = sst [smem:[#allocation63_spill]] %s16038_s25 }
  0x26   :  { %s16053_s9 = sld [smem:[%s18982_s0 + %s15880_s22]]   ;;  %s15884_s22 = smov 28  }
  0x27   :  { %s16058_s25 = sld [smem:[%s18982_s0 + %s15881_s28]]   ;;  %s15885_s28 = smov 29  }
  0x28   :  { %s16063_s5 = sld [smem:[%s18982_s0 + %s15882_s7]]   ;;  %s15886_s7 = smov 30  }
  0x29   :  { %19006 = sst [smem:[#allocation64_spill]] %s16048_s6 }
  0x2a   :  { %s16068_s6 = sld [smem:[%s18982_s0 + %s15883_s15]]   ;;  %s15887_s15 = smov 31  }
  0x2b   :  { %s16083_s17 = sld [smem:[%s18982_s0 + %s15886_s7]]   ;;  %s15890_s7 = smov 34  }
  0x2c   :  { %19007 = sst [smem:[#allocation65_spill]] %s16053_s9 }
  0x2d   :  { %19008 = sst [smem:[#allocation66_spill]] %s16058_s25 }
  0x2e   :  { %19009 = sst [smem:[#allocation67_spill]] %s16063_s5 }
  0x2f   :  { %s16073_s9 = sld [smem:[%s18982_s0 + %s15884_s22]]   ;;  %s15888_s22 = smov 32  }
  0x30   :  { %19010 = sst [smem:[#allocation68_spill]] %s16068_s6 }
  0x31   :  { %s16078_s25 = sld [smem:[%s18982_s0 + %s15885_s28]]   ;;  %s15889_s28 = smov 33  }
  0x32   :  { %19012 = sst [smem:[#allocation70_spill]] %s16083_s17 }
  0x33   :  { %s16088_s6 = sld [smem:[%s18982_s0 + %s15887_s15]]   ;;  %s15891_s15 = smov 35  }
  0x34   :  { %s16093_s4 = sld [smem:[%s18982_s0 + %s15888_s22]]   ;;  %s15892_s22 = smov 36  }
  0x35   :  { %s16103_s17 = sld [smem:[%s18982_s0 + %s15890_s7]]  }
  0x36   :  { %s16113_s20 = sld [smem:[%s18982_s0 + %s15892_s22]]  }
  0x37   :  { %19011 = sst [smem:[#allocation69_spill]] %s16078_s25 }
  0x38   :  { %s16098_s25 = sld [smem:[%s18982_s0 + %s15889_s28]]  }
  0x39   :  { %19013 = sst [smem:[#allocation71_spill]] %s16088_s6 }
  0x3a   :  { %19014 = sst [smem:[#allocation72_spill]] %s16093_s4 }
  0x3b   :  { %s16108_s6 = sld [smem:[%s18982_s0 + %s15891_s15]]  }
  0x3c   :  { %79 = vsyncpa [#allocation6], 0 }
  0x3d   :  { %80 = vsyncpa [#allocation8], 0 }
  0x3e   :  { %81 = vsyncpa [#allocation11], 0 }
  0x3f   :  { %82 = vsyncpa [#allocation14], 0 }
  0x40   :  { %83 = vsyncpa [#allocation17], 0 }
  0x41   :  { %84 = vsyncpa [#allocation20], 0 }
  0x42   :  { %85 = vsyncpa [#allocation23], 0 }
  0x43   :  { %86 = vsyncpa [#allocation26], 0 }
  0x44   :  { %87 = vsyncpa [#allocation29], 0 }
  0x45   :  { %88 = vsyncpa [#allocation32], 0 }
  0x46   :  { %89 = vsyncpa [#allocation35], 0 }
  0x47   :  { %90 = vsyncpa [#allocation38], 0  ;;  %s16115_s28 = smov 0  }
  0x48 LB: > { %s16121_s0 = sadd.s32 4294967295, %s15855_s28   ;;  %p12422_p0 = scmp.ge.s32.totalorder %s15855_s28, 1  ;;  %s15855_s28 = sphi %s16115_s28, %s96_s28  }
  0x49   : > { %p893_p1 = scmp.lt.s32.totalorder %s15855_s28, 3  ;;  %p18989_p2 = scmp.eq.s32.totalorder %s16121_s0, 0 }
  0x4a   : > { %s15893_s2 = smov [#allocation7]   ;;  %s15894_s10 = smov [#allocation10]  }
  0x4b   : > { %p16126_p3 = pnand %p12422_p0, %p893_p1  ;;  %s924_s7 = sshll.u32 %s15893_s2, 4  ;;  %s925_s7 = int_to_ptr.vmem [resolvable:$true] %s924_s7 }
  0x4c   : > { %s954_s11 = sshll.u32 %s15894_s10, 4  ;;  %s15895_s16 = smov [#allocation13]   ;;  %s16132_s11 = int_to_ptr.vmem [resolvable:$true] %s954_s11 }
  0x4d   : > { %s19015_s1 = scalar_select %p16126_p3, 1, 0 }
  0x4e   : > { %p14976_p4 = pneg %p16126_p3  ;;  %s978_s18 = sshll.u32 %s15895_s16, 4  ;;  %s16140_s18 = int_to_ptr.vmem [resolvable:$true] %s978_s18 }
  0x4f   : > { %s15896_s22 = smov [#allocation16]   ;;  %s15240_s2 = scalar_lea.vmem %s925_s7, 512 }
  0x50   : > { %p16136_p5 = pnand %p18989_p2, %p14976_p4  ;;  %s16142_s23 = sshll.u32 %s15896_s22, 4  ;;  %s1011_s23 = int_to_ptr.vmem [resolvable:$true] %s16142_s23 }
  0x51   : > { %p15241_p7 = scmp.ne.s32.totalorder %s925_s7, %s15240_s2  ;;  %p15248_p10 = scmp.lt.s32.totalorder %s925_s7, %s925_s7 }
  0x52   : > { %p16146_p6 = pneg %p16136_p5  ;;  %p15249_p11 = scmp.lt.s32.totalorder %s15240_s2, %s15240_s2 }
  0x54   : > { %p15243_p8 = pnand %p15241_p7, %p16146_p6  ;;  %p15250_p12 = por %p15249_p11, %p15248_p10 }
  0x56   : > { %p15244_p9 = pneg %p15243_p8 }
  0x58   : > { %p15251_p13 = pnand %p15250_p12, %p15244_p9 }
  0x5a   : > { %15254 = shalt.err (!%p15251_p13)
}
  0x5b   : > { %s18987_s10 = smov 128   ;;  %s18991_s16 = smov 8  }
  0x5c   : > { %14982 = dma.hbm_to_vmem [thread:$0]  (!%p16136_p5), %s15953_s21, 512, %s925_s7, [#allocation8], %s18987_s10, %s18987_s10, %s18991_s16  }
  0x5d   : > { %s15266_s22 = scalar_lea.vmem %s16132_s11, 16  ;;  %s15273_s2 = scalar_lea.vmem %s16132_s11, 32 }
  0x5e   : > { %p15267_p0 = scmp.ne.s32.totalorder %s16132_s11, %s15266_s22  ;;  %p15274_p7 = scmp.lt.s32.totalorder %s16132_s11, %s16132_s11 }
  0x5f   : > { %p15275_p8 = scmp.lt.s32.totalorder %s15273_s2, %s15266_s22 }
  0x60   : > { %p15269_p1 = pnand %p15267_p0, %p16146_p6 }
  0x61   : > { %p15276_p9 = por %p15275_p8, %p15274_p7 }
  0x62   : > { %p15270_p4 = pneg %p15269_p1 }
  0x64   : > { %p15277_p10 = pnand %p15276_p9, %p15270_p4 }
  0x66   : > { %15280 = shalt.err (!%p15277_p10)
}
  0x67   : > { %s19018_s3 = sld [smem:[#allocation55_spill]]  ;;  %s15292_s7 = scalar_lea.vmem %s16140_s18, 16 }
  0x68   : > { %p15293_p11 = scmp.ne.s32.totalorder %s16140_s18, %s15292_s7  ;;  %s15299_s10 = scalar_lea.vmem %s16140_s18, 32 }
  0x69   : > { %p15300_p0 = scmp.lt.s32.totalorder %s16140_s18, %s16140_s18  ;;  %p15301_p1 = scmp.lt.s32.totalorder %s15299_s10, %s15292_s7 }
  0x6a   : > { %p15295_p12 = pnand %p15293_p11, %p16146_p6 }
  0x6b   : > { %p15302_p4 = por %p15301_p1, %p15300_p0 }
  0x6c   : > { %p15296_p13 = pneg %p15295_p12 }
  0x6d   : > { %14988 = dma.hbm_to_vmem [thread:$0]  (!%p16136_p5), %s19018_s3, 16, %s16132_s11, [#allocation11]  }
  0x6e   : > { %p15303_p7 = pnand %p15302_p4, %p15296_p13 }
  0x70   : > { %15306 = shalt.err (!%p15303_p7)
}
  0x71   : > { %14994 = dma.hbm_to_vmem [thread:$0]  (!%p16136_p5), %s15978_s14, 16, %s16140_s18, [#allocation14]  }
  0x72   : > { %s15318_s11 = scalar_lea.vmem %s1011_s23, 1024  ;;  %p15326_p11 = scmp.lt.s32.totalorder %s1011_s23, %s1011_s23 }
  0x73   : > { %p15319_p8 = scmp.ne.s32.totalorder %s1011_s23, %s15318_s11  ;;  %p15327_p12 = scmp.lt.s32.totalorder %s15318_s11, %s15318_s11 }
  0x75   : > { %p15321_p9 = pnand %p15319_p8, %p16146_p6  ;;  %p15328_p2 = por %p15327_p12, %p15326_p11 }
  0x77   : > { %p15322_p10 = pneg %p15321_p9 }
  0x79   : > { %p15329_p3 = pnand %p15328_p2, %p15322_p10 }
  0x7b   : > { %15332 = shalt.err (!%p15329_p3)
}
  0x7c   : > { %s19019_s10 = smov 128   ;;  %s15899_s18 = smov [#allocation19]  }
  0x7d   : > { %15000 = dma.hbm_to_vmem [thread:$0]  (!%p16136_p5), %s16003_s12, 1024, %s1011_s23, [#allocation17], %s19019_s10, %s19019_s10, %s18991_s16  }
  0x7e   : > { %s1034_s22 = sshll.u32 %s15899_s18, 4  ;;  %s15900_s2 = smov [#allocation22]   ;;  %s1035_s22 = int_to_ptr.vmem [resolvable:$true] %s1034_s22 }
  0x7f   : > { %s1058_s7 = sshll.u32 %s15900_s2, 4  ;;  %s15344_s3 = scalar_lea.vmem %s1035_s22, 1024  ;;  %s1059_s7 = int_to_ptr.vmem [resolvable:$true] %s1058_s7 }
  0x80   : > { %p15345_p13 = scmp.ne.s32.totalorder %s1035_s22, %s15344_s3  ;;  %p15352_p2 = scmp.lt.s32.totalorder %s1035_s22, %s1035_s22 }
  0x81   : > { %p15353_p3 = scmp.lt.s32.totalorder %s15344_s3, %s15344_s3 }
  0x82   : > { %p15347_p0 = pnand %p15345_p13, %p16146_p6 }
  0x83   : > { %p15354_p4 = por %p15353_p3, %p15352_p2 }
  0x84   : > { %p15348_p1 = pneg %p15347_p0 }
  0x86   : > { %p15355_p7 = pnand %p15354_p4, %p15348_p1 }
  0x88   : > { %15358 = shalt.err (!%p15355_p7)
}
  0x89   : > { %15006 = dma.hbm_to_vmem [thread:$0]  (!%p16136_p5), %s16013_s27, 1024, %s1035_s22, [#allocation20], %s19019_s10, %s19019_s10, %s18991_s16  }
  0x8a   : > { %s15370_s23 = scalar_lea.vmem %s1059_s7, 1024  ;;  %p15378_p11 = scmp.lt.s32.totalorder %s1059_s7, %s1059_s7 }
  0x8b   : > { %p15371_p8 = scmp.ne.s32.totalorder %s1059_s7, %s15370_s23  ;;  %p15379_p12 = scmp.lt.s32.totalorder %s15370_s23, %s15370_s23 }
  0x8d   : > { %p15373_p9 = pnand %p15371_p8, %p16146_p6  ;;  %p15380_p13 = por %p15379_p12, %p15378_p11 }
  0x8f   : > { %p15374_p10 = pneg %p15373_p9 }
  0x91   : > { %p15381_p0 = pnand %p15380_p13, %p15374_p10 }
  0x93   : > { %15384 = shalt.err (!%p15381_p0)
}
  0x94   : > { %15012 = dma.hbm_to_vmem [thread:$0]  (!%p16136_p5), %s16023_s24, 1024, %s1059_s7, [#allocation23], %s19019_s10, %s19019_s10, %s18991_s16  }
  0x95   : > { %s15901_s3 = smov [#allocation25]   ;;  %s15902_s18 = smov [#allocation28]  }
  0x96   : > { %s1090_s11 = sshll.u32 %s15901_s3, 4  ;;  %s1122_s22 = sshll.u32 %s15902_s18, 4  ;;  %s1091_s11 = int_to_ptr.vmem [resolvable:$true] %s1090_s11  ;;  %s1123_s22 = int_to_ptr.vmem [resolvable:$true] %s1122_s22 }
  0x97   : > { %s15396_s2 = scalar_lea.vmem %s1091_s11, 1024  ;;  %p15404_p4 = scmp.lt.s32.totalorder %s1091_s11, %s1091_s11 }
  0x98   : > { %p15397_p1 = scmp.ne.s32.totalorder %s1091_s11, %s15396_s2  ;;  %p15405_p7 = scmp.lt.s32.totalorder %s15396_s2, %s15396_s2 }
  0x9a   : > { %p15399_p2 = pnand %p15397_p1, %p16146_p6  ;;  %p15406_p8 = por %p15405_p7, %p15404_p4 }
  0x9c   : > { %p15400_p3 = pneg %p15399_p2 }
  0x9e   : > { %p15407_p9 = pnand %p15406_p8, %p15400_p3 }
  0xa0   : > { %15410 = shalt.err (!%p15407_p9)
}
  0xa1   : > { %15018 = dma.hbm_to_vmem [thread:$0]  (!%p16136_p5), %s16043_s19, 1024, %s1091_s11, [#allocation26], %s19019_s10, %s19019_s10, %s18991_s16  }
  0xa2   : > { %s15422_s7 = scalar_lea.vmem %s1123_s22, 1024  ;;  %p15430_p13 = scmp.lt.s32.totalorder %s1123_s22, %s1123_s22 }
  0xa3   : > { %p15423_p10 = scmp.ne.s32.totalorder %s1123_s22, %s15422_s7  ;;  %p15431_p0 = scmp.lt.s32.totalorder %s15422_s7, %s15422_s7 }
  0xa5   : > { %p15425_p11 = pnand %p15423_p10, %p16146_p6  ;;  %p15432_p1 = por %p15431_p0, %p15430_p13 }
  0xa7   : > { %p15426_p12 = pneg %p15425_p11 }
  0xa9   : > { %p15433_p2 = pnand %p15432_p1, %p15426_p12 }
  0xab   : > { %15436 = shalt.err (!%p15433_p2)
}
  0xac   : > { %s19020_s5 = sld [smem:[#allocation67_spill]]  ;;  %s15903_s23 = smov [#allocation31]  }
  0xad   : > { %s1149_s3 = sshll.u32 %s15903_s23, 4  ;;  %s15904_s11 = smov [#allocation34]   ;;  %s1150_s3 = int_to_ptr.vmem [resolvable:$true] %s1149_s3 }
  0xae   : > { %s1177_s18 = sshll.u32 %s15904_s11, 4  ;;  %s15448_s2 = scalar_lea.vmem %s1150_s3, 16  ;;  %s1178_s18 = int_to_ptr.vmem [resolvable:$true] %s1177_s18 }
  0xaf   : > { %p15449_p3 = scmp.ne.s32.totalorder %s1150_s3, %s15448_s2  ;;  %s15455_s7 = scalar_lea.vmem %s1150_s3, 32 }
  0xb0   : > { %p15456_p8 = scmp.lt.s32.totalorder %s1150_s3, %s1150_s3  ;;  %p15457_p9 = scmp.lt.s32.totalorder %s15455_s7, %s15448_s2 }
  0xb1   : > { %p15451_p4 = pnand %p15449_p3, %p16146_p6 }
  0xb2   : > { %15024 = dma.hbm_to_vmem [thread:$0]  (!%p16136_p5), %s19020_s5, 1024, %s1123_s22, [#allocation29], %s19019_s10, %s19019_s10, %s18991_s16  }
  0xb3   : > { %p15452_p7 = pneg %p15451_p4  ;;  %p15458_p10 = por %p15457_p9, %p15456_p8 }
  0xb5   : > { %p15459_p11 = pnand %p15458_p10, %p15452_p7 }
  0xb7   : > { %15462 = shalt.err (!%p15459_p11)
}
  0xb8   : > { %15030 = dma.hbm_to_vmem [thread:$0]  (!%p16136_p5), %s16073_s9, 16, %s1150_s3, [#allocation32]  }
  0xb9   : > { %s15474_s22 = scalar_lea.vmem %s1178_s18, 16  ;;  %s15481_s23 = scalar_lea.vmem %s1178_s18, 32 }
  0xba   : > { %p15475_p12 = scmp.ne.s32.totalorder %s1178_s18, %s15474_s22  ;;  %p15482_p1 = scmp.lt.s32.totalorder %s1178_s18, %s1178_s18 }
  0xbb   : > { %p15483_p2 = scmp.lt.s32.totalorder %s15481_s23, %s15474_s22 }
  0xbc   : > { %p15477_p13 = pnand %p15475_p12, %p16146_p6 }
  0xbd   : > { %p15484_p3 = por %p15483_p2, %p15482_p1 }
  0xbe   : > { %p15478_p0 = pneg %p15477_p13 }
  0xc0   : > { %p15485_p4 = pnand %p15484_p3, %p15478_p0 }
  0xc2   : > { %15488 = shalt.err (!%p15485_p4)
}
  0xc3   : > { %s19021_s4 = sld [smem:[#allocation72_spill]]  ;;  %s15905_s11 = smov [#allocation5]  }
  0xc4   : > { %s908_s2 = sshll.u32 %s15905_s11, 4  ;;  %s15906_s3 = smov [#allocation9]   ;;  %s909_s2 = int_to_ptr.vmem [resolvable:$true] %s908_s2 }
  0xc5   : > { %s940_s7 = sshll.u32 %s15906_s3, 4  ;;  %s15500_s16 = scalar_lea.vmem %s909_s2, 512  ;;  %s941_s7 = int_to_ptr.vmem [resolvable:$true] %s940_s7 }
  0xc6   : > { %p15501_p7 = scmp.ne.s32.totalorder %s909_s2, %s15500_s16  ;;  %p15508_p10 = scmp.lt.s32.totalorder %s909_s2, %s909_s2 }
  0xc7   : > { %p15509_p11 = scmp.lt.s32.totalorder %s15500_s16, %s15500_s16 }
  0xc8   : > { %p15503_p8 = pnand %p15501_p7, %p16146_p6 }
  0xc9   : > { %15036 = dma.hbm_to_vmem [thread:$0]  (!%p16136_p5), %s19021_s4, 16, %s1178_s18, [#allocation35]  }
  0xca   : > { %p15504_p9 = pneg %p15503_p8  ;;  %p15510_p12 = por %p15509_p11, %p15508_p10 }
  0xcc   : > { %p15511_p13 = pnand %p15510_p12, %p15504_p9 }
  0xce   : > { %15514 = shalt.err (!%p15511_p13)
}
  0xcf   : > { %s19022_s22 = smov 8   ;;  %s15526_s18 = scalar_lea.vmem %s941_s7, 512 }
  0xd0   : > { %14979 = dma.hbm_to_vmem [thread:$0]  (!%p16136_p5), %s15943_s13, 512, %s909_s2, [#allocation6], %s19019_s10, %s19019_s10, %s19022_s22  }
  0xd1   : > { %p15527_p0 = scmp.ne.s32.totalorder %s941_s7, %s15526_s18  ;;  %p15534_p3 = scmp.lt.s32.totalorder %s941_s7, %s941_s7 }
  0xd2   : > { %p15535_p4 = scmp.lt.s32.totalorder %s15526_s18, %s15526_s18 }
  0xd3   : > { %p15529_p1 = pnand %p15527_p0, %p16146_p6 }
  0xd4   : > { %p15536_p7 = por %p15535_p4, %p15534_p3 }
  0xd5   : > { %p15530_p2 = pneg %p15529_p1 }
  0xd7   : > { %p15537_p8 = pnand %p15536_p7, %p15530_p2 }
  0xd9   : > { %15540 = shalt.err (!%p15537_p8)
}
  0xda   : > { %14985 = dma.hbm_to_vmem [thread:$0]  (!%p16136_p5), %s15963_s29, 512, %s941_s7, [#allocation8], %s19019_s10, %s19019_s10, %s19022_s22  }
  0xdb   : > { %s15907_s16 = smov [#allocation12]   ;;  %s15908_s11 = smov [#allocation15]  }
  0xdc   : > { %s964_s23 = sshll.u32 %s15907_s16, 4  ;;  %s994_s2 = sshll.u32 %s15908_s11, 4  ;;  %s965_s23 = int_to_ptr.vmem [resolvable:$true] %s964_s23  ;;  %s995_s2 = int_to_ptr.vmem [resolvable:$true] %s994_s2 }
  0xdd   : > { %s15552_s3 = scalar_lea.vmem %s965_s23, 512  ;;  %p15560_p12 = scmp.lt.s32.totalorder %s965_s23, %s965_s23 }
  0xde   : > { %p15553_p9 = scmp.ne.s32.totalorder %s965_s23, %s15552_s3  ;;  %p15561_p13 = scmp.lt.s32.totalorder %s15552_s3, %s15552_s3 }
  0xe0   : > { %p15555_p10 = pnand %p15553_p9, %p16146_p6  ;;  %p15562_p0 = por %p15561_p13, %p15560_p12 }
  0xe2   : > { %p15556_p11 = pneg %p15555_p10 }
  0xe4   : > { %p15563_p1 = pnand %p15562_p0, %p15556_p11 }
  0xe6   : > { %15566 = shalt.err (!%p15563_p1)
}
  0xe7   : > { %14991 = dma.hbm_to_vmem [thread:$0]  (!%p16136_p5), %s15973_s8, 512, %s965_s23, [#allocation11], %s19019_s10, %s19019_s10, %s19022_s22  }
  0xe8   : > { %s15578_s7 = scalar_lea.vmem %s995_s2, 1024  ;;  %p15586_p7 = scmp.lt.s32.totalorder %s995_s2, %s995_s2 }
  0xe9   : > { %p15579_p2 = scmp.ne.s32.totalorder %s995_s2, %s15578_s7  ;;  %p15587_p8 = scmp.lt.s32.totalorder %s15578_s7, %s15578_s7 }
  0xeb   : > { %p15581_p3 = pnand %p15579_p2, %p16146_p6  ;;  %p15588_p9 = por %p15587_p8, %p15586_p7 }
  0xed   : > { %p15582_p4 = pneg %p15581_p3 }
  0xef   : > { %p15589_p10 = pnand %p15588_p9, %p15582_p4 }
  0xf1   : > { %15592 = shalt.err (!%p15589_p10)
}
  0xf2   : > { %14997 = dma.hbm_to_vmem [thread:$0]  (!%p16136_p5), %s15993_s30, 1024, %s995_s2, [#allocation14], %s19019_s10, %s19019_s10, %s19022_s22  }
  0xf3   : > { %s15909_s18 = smov [#allocation18]   ;;  %s15910_s23 = smov [#allocation21]  }
  0xf4   : > { %s1024_s16 = sshll.u32 %s15909_s18, 4  ;;  %s1048_s11 = sshll.u32 %s15910_s23, 4  ;;  %s1025_s16 = int_to_ptr.vmem [resolvable:$true] %s1024_s16  ;;  %s1049_s11 = int_to_ptr.vmem [resolvable:$true] %s1048_s11 }
  0xf5   : > { %s15604_s3 = scalar_lea.vmem %s1025_s16, 16  ;;  %s15611_s7 = scalar_lea.vmem %s1025_s16, 32 }
  0xf6   : > { %p15605_p11 = scmp.ne.s32.totalorder %s1025_s16, %s15604_s3  ;;  %p15612_p0 = scmp.lt.s32.totalorder %s1025_s16, %s1025_s16 }
  0xf7   : > { %p15613_p1 = scmp.lt.s32.totalorder %s15611_s7, %s15604_s3 }
  0xf8   : > { %p15607_p12 = pnand %p15605_p11, %p16146_p6 }
  0xf9   : > { %p15614_p2 = por %p15613_p1, %p15612_p0 }
  0xfa   : > { %p15608_p13 = pneg %p15607_p12 }
  0xfc   : > { %p15615_p3 = pnand %p15614_p2, %p15608_p13 }
  0xfe   : > { %15618 = shalt.err (!%p15615_p3)
}
  0xff   : > { %s19023_s4 = sld [smem:[#allocation59_spill]]  ;;  %s15630_s2 = scalar_lea.vmem %s1049_s11, 16 }
 0x100   : > { %p15631_p4 = scmp.ne.s32.totalorder %s1049_s11, %s15630_s2  ;;  %s15637_s18 = scalar_lea.vmem %s1049_s11, 32 }
 0x101   : > { %p15638_p9 = scmp.lt.s32.totalorder %s1049_s11, %s1049_s11  ;;  %p15639_p10 = scmp.lt.s32.totalorder %s15637_s18, %s15630_s2 }
 0x102   : > { %p15633_p7 = pnand %p15631_p4, %p16146_p6 }
 0x103   : > { %p15640_p11 = por %p15639_p10, %p15638_p9 }
 0x104   : > { %p15634_p8 = pneg %p15633_p7 }
 0x105   : > { %15003 = dma.hbm_to_vmem [thread:$0]  (!%p16136_p5), %s19023_s4, 16, %s1025_s16, [#allocation17]  }
 0x106   : > { %p15641_p12 = pnand %p15640_p11, %p15634_p8 }
 0x108   : > { %15644 = shalt.err (!%p15641_p12)
}
 0x109   : > { %s19024_s23 = sld [smem:[#allocation60_spill]]  ;;  %s15911_s3 = smov [#allocation24]  }
 0x10a   : > { %s1074_s7 = sshll.u32 %s15911_s3, 4  ;;  %s15912_s4 = smov [#allocation27]   ;;  %s1075_s7 = int_to_ptr.vmem [resolvable:$true] %s1074_s7 }
 0x10b   : > { %s1106_s16 = sshll.u32 %s15912_s4, 4  ;;  %s15656_s5 = scalar_lea.vmem %s1075_s7, 1024  ;;  %s1107_s16 = int_to_ptr.vmem [resolvable:$true] %s1106_s16 }
 0x10c   : > { %p15657_p13 = scmp.ne.s32.totalorder %s1075_s7, %s15656_s5  ;;  %p15664_p2 = scmp.lt.s32.totalorder %s1075_s7, %s1075_s7 }
 0x10d   : > { %p15665_p3 = scmp.lt.s32.totalorder %s15656_s5, %s15656_s5 }
 0x10e   : > { %p15659_p0 = pnand %p15657_p13, %p16146_p6 }
 0x10f   : > { %15009 = dma.hbm_to_vmem [thread:$0]  (!%p16136_p5), %s19024_s23, 16, %s1049_s11, [#allocation20]  }
 0x110   : > { %p15660_p1 = pneg %p15659_p0  ;;  %p15666_p4 = por %p15665_p3, %p15664_p2 }
 0x112   : > { %p15667_p7 = pnand %p15666_p4, %p15660_p1 }
 0x114   : > { %15670 = shalt.err (!%p15667_p7)
}
 0x115   : > { %s19025_s11 = sld [smem:[#allocation62_spill]]  ;;  %s15682_s2 = scalar_lea.vmem %s1107_s16, 1024 }
 0x116   : > { %p15683_p8 = scmp.ne.s32.totalorder %s1107_s16, %s15682_s2  ;;  %p15690_p11 = scmp.lt.s32.totalorder %s1107_s16, %s1107_s16 }
 0x117   : > { %p15691_p12 = scmp.lt.s32.totalorder %s15682_s2, %s15682_s2 }
 0x118   : > { %p15685_p9 = pnand %p15683_p8, %p16146_p6 }
 0x119   : > { %p15692_p13 = por %p15691_p12, %p15690_p11 }
 0x11a   : > { %p15686_p10 = pneg %p15685_p9 }
 0x11b   : > { %15015 = dma.hbm_to_vmem [thread:$0]  (!%p16136_p5), %s19025_s11, 1024, %s1075_s7, [#allocation23], %s19019_s10, %s19019_s10, %s19022_s22  }
 0x11c   : > { %p15693_p0 = pnand %p15692_p13, %p15686_p10 }
 0x11e   : > { %15696 = shalt.err (!%p15693_p0)
}
 0x11f   : > { %s19026_s5 = sld [smem:[#allocation65_spill]]  ;;  %s15913_s18 = smov [#allocation30]  }
 0x120   : > { %s1135_s23 = sshll.u32 %s15913_s18, 4  ;;  %s15914_s3 = smov [#allocation33]   ;;  %s1136_s23 = int_to_ptr.vmem [resolvable:$true] %s1135_s23 }
 0x121   : > { %s1163_s7 = sshll.u32 %s15914_s3, 4  ;;  %s15708_s4 = scalar_lea.vmem %s1136_s23, 256  ;;  %s1164_s7 = int_to_ptr.vmem [resolvable:$true] %s1163_s7 }
 0x122   : > { %p15709_p1 = scmp.ne.s32.totalorder %s1136_s23, %s15708_s4  ;;  %p15716_p4 = scmp.lt.s32.totalorder %s1136_s23, %s1136_s23 }
 0x123   : > { %p15717_p7 = scmp.lt.s32.totalorder %s15708_s4, %s15708_s4 }
 0x124   : > { %p15711_p2 = pnand %p15709_p1, %p16146_p6 }
 0x125   : > { %15021 = dma.hbm_to_vmem [thread:$0]  (!%p16136_p5), %s19026_s5, 1024, %s1107_s16, [#allocation26], %s19019_s10, %s19019_s10, %s19022_s22  }
 0x126   : > { %p15712_p3 = pneg %p15711_p2  ;;  %p15718_p8 = por %p15717_p7, %p15716_p4 }
 0x128   : > { %p15719_p9 = pnand %p15718_p8, %p15712_p3 }
 0x12a   : > { %15722 = shalt.err (!%p15719_p9)
}
 0x12b   : > { %s19027_s16 = sld [smem:[#allocation68_spill]]  ;;  %s15734_s11 = scalar_lea.vmem %s1164_s7, 16 }
 0x12c   : > { %p15735_p10 = scmp.ne.s32.totalorder %s1164_s7, %s15734_s11  ;;  %s15741_s2 = scalar_lea.vmem %s1164_s7, 32 }
 0x12d   : > { %p15742_p13 = scmp.lt.s32.totalorder %s1164_s7, %s1164_s7  ;;  %p15743_p0 = scmp.lt.s32.totalorder %s15741_s2, %s15734_s11 }
 0x12e   : > { %p15737_p11 = pnand %p15735_p10, %p16146_p6 }
 0x12f   : > { %p15744_p1 = por %p15743_p0, %p15742_p13 }
 0x130   : > { %p15738_p12 = pneg %p15737_p11 }
 0x131   : > { %15027 = dma.hbm_to_vmem [thread:$0]  (!%p16136_p5), %s19027_s16, 256, %s1136_s23, [#allocation29], %s19019_s10, %s19019_s10, %s19022_s22  }
 0x132   : > { %p15745_p2 = pnand %p15744_p1, %p15738_p12 }
 0x134   : > { %15748 = shalt.err (!%p15745_p2)
}
 0x135   : > { %s19028_s5 = sld [smem:[#allocation70_spill]]  ;;  %s15915_s18 = smov [#allocation36]  }
 0x136   : > { %s1188_s3 = sshll.u32 %s15915_s18, 4  ;;  %s15916_s10 = smov [#allocation37]   ;;  %s1189_s3 = int_to_ptr.vmem [resolvable:$true] %s1188_s3 }
 0x137   : > { %s1199_s22 = sshll.u32 %s15916_s10, 4  ;;  %s15760_s23 = scalar_lea.vmem %s1189_s3, 128  ;;  %s1200_s22 = int_to_ptr.vmem [resolvable:$true] %s1199_s22 }
 0x138   : > { %p15761_p3 = scmp.ne.s32.totalorder %s1189_s3, %s15760_s23  ;;  %p15768_p8 = scmp.lt.s32.totalorder %s1189_s3, %s1189_s3 }
 0x139   : > { %p15769_p9 = scmp.lt.s32.totalorder %s15760_s23, %s15760_s23 }
 0x13a   : > { %p15763_p4 = pnand %p15761_p3, %p16146_p6 }
 0x13b   : > { %15033 = dma.hbm_to_vmem [thread:$0]  (!%p16136_p5), %s19028_s5, 16, %s1164_s7, [#allocation32]  }
 0x13c   : > { %p15764_p7 = pneg %p15763_p4  ;;  %p15770_p10 = por %p15769_p9, %p15768_p8 }
 0x13e   : > { %p15771_p11 = pnand %p15770_p10, %p15764_p7 }
 0x140   : > { %15774 = shalt.err (!%p15771_p11)
}
 0x141   : > { %15039 = dma.hbm_to_vmem [thread:$0]  (!%p16136_p5), %s16098_s25, 128, %s1189_s3, [#allocation35]  }
 0x142   : > { %s15786_s7 = scalar_lea.vmem %s1200_s22, 16  ;;  %s15793_s4 = scalar_lea.vmem %s1200_s22, 32 }
 0x143   : > { %p15787_p12 = scmp.ne.s32.totalorder %s1200_s22, %s15786_s7  ;;  %p15794_p1 = scmp.lt.s32.totalorder %s1200_s22, %s1200_s22 }
 0x144   : > { %p15795_p2 = scmp.lt.s32.totalorder %s15793_s4, %s15786_s7 }
 0x145   : > { %p15789_p13 = pnand %p15787_p12, %p16146_p6 }
 0x146   : > { %p15796_p3 = por %p15795_p2, %p15794_p1 }
 0x147   : > { %p15790_p0 = pneg %p15789_p13 }
 0x149   : > { %p15797_p4 = pnand %p15796_p3, %p15790_p0 }
 0x14b   : > { %15800 = shalt.err (!%p15797_p4)
}
 0x14c   : > { %15042 = dma.hbm_to_vmem [thread:$0]  (!%p16136_p5), %s16103_s17, 16, %s1200_s22, [#allocation38]  }
 0x14d   : > { %p19029_p7 = scmp.ne.s32.totalorder %s19015_s1, 0 }
 0x14e   : > { %p19030_p8 = scmp.eq.s32.totalorder (!%p19029_p7), %s16121_s0, 0 }
 0x14f   : > { %1220 = sbr.rel (%p19029_p7) target bundleno = 2870 (0xb36), region = 160 }
 0x154   : > { %15806 = dma.done.wait (%p19030_p8), [#allocation6], 512   ;;  %p19031_p9 = pmov %p19030_p8 }
 0x155   : > { %p19032_p6 = pmov %p19030_p8 }
 0x156   : > { %15808 = vsyncadd (%p19031_p9), [#allocation6], 4294966784 }
 0x157   : > { %15810 = dma.done.wait (%p19032_p6), [#allocation8], 1024   ;;  %p19033_p10 = pmov %p19032_p6 }
 0x158   : > { %p19034_p11 = pmov %p19032_p6 }
 0x159   : > { %15812 = vsyncadd (%p19033_p10), [#allocation8], 4294966272 }
 0x15a   : > { %15814 = dma.done.wait (%p19034_p11), [#allocation11], 528   ;;  %p19035_p5 = pmov %p19032_p6 }
 0x15c   : > { %15816 = vsyncadd (%p19035_p5), [#allocation11], 4294966768  ;;  %p19036_p12 = pmov %p19035_p5 }
 0x15d   : > { %p19037_p13 = pmov %p19035_p5 }
 0x15e   : > { %15818 = dma.done.wait (%p19036_p12), [#allocation14], 1040  }
 0x15f   : > { %15820 = vsyncadd (%p19037_p13), [#allocation14], 4294966256  ;;  %p19038_p0 = pmov %p19035_p5 }
 0x161   : > { %15822 = dma.done.wait (%p19038_p0), [#allocation17], 1040   ;;  %p19039_p1 = pmov %p19038_p0 }
 0x162   : > { %p19040_p2 = pmov %p19038_p0 }
 0x163   : > { %15824 = vsyncadd (%p19039_p1), [#allocation17], 4294966256 }
 0x164   : > { %15826 = dma.done.wait (%p19040_p2), [#allocation20], 1040   ;;  %p19041_p3 = pmov %p19038_p0 }
 0x165   : > { %p19042_p4 = pmov %p19038_p0 }
 0x166   : > { %15828 = vsyncadd (%p19041_p3), [#allocation20], 4294966256 }
 0x167   : > { %15830 = dma.done.wait (%p19042_p4), [#allocation23], 2048   ;;  %p19043_p7 = pmov %p19038_p0 }
 0x168   : > { %p19044_p8 = pmov %p19038_p0 }
 0x169   : > { %15832 = vsyncadd (%p19043_p7), [#allocation23], 4294965248 }
 0x16a   : > { %15834 = dma.done.wait (%p19044_p8), [#allocation26], 2048   ;;  %p19045_p9 = pmov %p19038_p0 }
 0x16b   : > { %p19046_p6 = pmov %p19038_p0 }
 0x16c   : > { %15836 = vsyncadd (%p19045_p9), [#allocation26], 4294965248 }
 0x16d   : > { %15838 = dma.done.wait (%p19046_p6), [#allocation29], 1280   ;;  %p19047_p10 = pmov %p19038_p0 }
 0x16e   : > { %p19048_p11 = pmov %p19038_p0 }
 0x16f   : > { %15840 = vsyncadd (%p19047_p10), [#allocation29], 4294966016 }
 0x170   : > { %15842 = dma.done.wait (%p19048_p11), [#allocation32], 32   ;;  %p19049_p5 = pmov %p19038_p0 }
 0x171   : > { %p19050_p12 = pmov %p19038_p0 }
 0x172   : > { %15844 = vsyncadd (%p19049_p5), [#allocation32], 4294967264 }
 0x173   : > { %15846 = dma.done.wait (%p19050_p12), [#allocation35], 144   ;;  %p19051_p13 = pmov %p19038_p0 }
 0x175   : > { %15848 = vsyncadd (%p19051_p13), [#allocation35], 4294967152 }
 0x176   : > { %15850 = dma.done.wait (%p19038_p0), [#allocation38], 16   ;;  %p19052_p1 = pmov %p19038_p0 }
 0x177   : > { %s19053_s1 = sld [smem:[#allocation51_spill]]  ;;  %p1399_p2 = scmp.lt.s32.totalorder %s16121_s0, 1  ;;  %vm1424_vm0 = vcmask 130048   ;;  %vm2225_vm1 = vcmask 64512   ;;  %vm2236_vm2 = vcmask 130112   ;;  %vm2247_vm3 = vcmask 195712  }
 0x178   : > { %15852 = vsyncadd (%p19052_p1), [#allocation38], 4294967280  ;;  %s19054_s15 = sld [smem:[#allocation52_spill]]  ;;  %s15919_s11 = smov 16   ;;  %vm2256_vm4 = vcmask 261312   ;;  %vm2300_vm5 = vcmask 261120  }
 0x179   : > { %s19067_s0 = smov (!%p1399_p2, %s16121_s0), 1  ;;  %s15920_s2 = smov 24   ;;  %vm4501_vm6 = vcmask 523264   ;;  %vm9377_vm7 = vcmask 261248   ;;  %vm9392_vm8 = vcmask 392448   ;;  %vm9407_vm9 = vcmask 523648  }
 0x17a   : > { %s16364_s26 = sshll.u32 %s19067_s0, 4  ;;  %s15918_s0 = smov 8  }
 0x17b   : > { %s19055_s5 = sld [smem:[#allocation56_spill]]  ;;  %s15921_s4 = smov 96  }
 0x17c   : > { %s19056_s18 = sld [smem:[#allocation54_spill]] }
 0x17d   : > { %s16368_s16 = scalar_lea.vmem %s19053_s1, %s16364_s26  ;;  %s19057_s3 = sld [smem:[#allocation53_spill]] }
 0x17e   : > { %v1415_v0 = vld [vmem:[%s16368_s16 + $0x8] sm:$0xff]  ;;  %v1414_v1 = vld [vmem:[%s16368_s16] sm:$0xff]  ;;  %v1418_v7 = vld [vmem:[%s19054_s15 + $0x10] sm:$0xff]  ;;  %s19058_s10 = sld [smem:[#allocation58_spill]]  ;;  %s15922_s1 = smov 112  }
 0x17f   : > { %v1416_v2 = vld [vmem:[%s19054_s15] sm:$0xff]  ;;  %v16373_v3 = vand.u32 4294901760, %v1415_v0  ;;  %v16375_v4 = vand.u32 4294901760, %v1414_v1  ;;  %v1417_v6 = vld [vmem:[%s19054_s15 + $0x8] sm:$0xff]  ;;  %v1419_v8 = vld [vmem:[%s19054_s15 + $0x18] sm:$0xff]  ;;  %v1432_v11 = vsel %vm1424_vm0, %v1418_v7, 0 }
 0x180   : > { %v1426_v5 = vsel %vm1424_vm0, %v1416_v2, 0  ;;  %v1429_v10 = vsel %vm1424_vm0, %v1417_v6, 0  ;;  %v1435_v12 = vsel %vm1424_vm0, %v1419_v8, 0  ;;  %v1420_v13 = vld [vmem:[%s19054_s15 + $0x20] sm:$0xff]  ;;  %v1421_v14 = vld [vmem:[%s19054_s15 + $0x28] sm:$0xff]  ;;  %v16395_v18 = vand.u32 4294901760, %v1432_v11 }
 0x181   : > { %v16381_v9 = vand.u32 4294901760, %v1426_v5  ;;  %13346 = vmatprep.subr.mxu0 %v16373_v3  ;;  %v1626_v15 = vsub.f32 %v1415_v0, %v16373_v3  ;;  %v16390_v16 = vand.u32 4294901760, %v1429_v10  ;;  %v16393_v17 = vsub.f32 %v1414_v1, %v16375_v4  ;;  %v1422_v39 = vld [vmem:[%s19054_s15 + $0x30] sm:$0xff]  ;;  %v1423_v40 = vld [vmem:[%s19054_s15 + $0x38] sm:$0xff]  ;;  %s19059_s22 = sld [smem:[#allocation57_spill]] }
 0x182   : > { %13347 = vmatpush3.msra.mxu0 %v16373_v3  ;;  %v16402_v20 = vand.u32 4294901760, %v1435_v12  ;;  %v1438_v21 = vsel %vm1424_vm0, %v1420_v13, 0  ;;  %v1441_v22 = vsel %vm1424_vm0, %v1421_v14, 0  ;;  %v16416_v26 = vsub.f32 %v1432_v11, %v16395_v18  ;;  %s19060_s23 = sld [smem:[#allocation63_spill]] }
 0x183   : > { %v16399_v19 = vsub.f32 %v1426_v5, %v16381_v9  ;;  %13366 = vmatprep.mubr.f32.mxu1 %v16381_v9  ;;  %13348 = vmatprep.subr.mxu0 %v16375_v4  ;;  %v16407_v23 = vand.u32 4294901760, %v1626_v15  ;;  %v16410_v24 = vsub.f32 %v1429_v10, %v16390_v16  ;;  %v16413_v25 = vand.u32 4294901760, %v16393_v17  ;;  %s19061_s7 = sld [smem:[#allocation61_spill]] }
 0x184   : > { %13349 = vmatpush3.msra.mxu0 %v16375_v4  ;;  %v16421_v28 = vsub.f32 %v1435_v12, %v16402_v20  ;;  %v16423_v29 = vand.u32 4294901760, %v1438_v21  ;;  %v16425_v30 = vand.u32 4294901760, %v1441_v22  ;;  %v1538_v34 = vand.u32 4294901760, %v16416_v26 }
 0x185   : > { %v1518_v27 = vand.u32 4294901760, %v16399_v19  ;;  %v1628_v31 = vsub.f32 %v1626_v15, %v16407_v23  ;;  %v1528_v32 = vand.u32 4294901760, %v16410_v24  ;;  %v1635_v33 = vsub.f32 %v16393_v17, %v16413_v25  ;;  %13378 = vmatprep.subr.mxu0 %v1626_v15 }
 0x186   : > { %v1548_v36 = vand.u32 4294901760, %v16421_v28  ;;  %v16437_v37 = vsub.f32 %v1438_v21, %v16423_v29  ;;  %v16440_v38 = vsub.f32 %v1441_v22, %v16425_v30  ;;  %v1539_v44 = vsub.f32 %v16416_v26, %v1538_v34 }
 0x187   : > { %v1519_v35 = vsub.f32 %v16399_v19, %v1518_v27  ;;  %v1629_v41 = vand.u32 4294901760, %v1628_v31  ;;  %v1529_v42 = vsub.f32 %v16410_v24, %v1528_v32  ;;  %v1636_v43 = vand.u32 4294901760, %v1635_v33 }
 0x188   : > { %v1549_v46 = vsub.f32 %v16421_v28, %v1548_v36  ;;  %v1558_v47 = vand.u32 4294901760, %v16437_v37  ;;  %v1568_v48 = vand.u32 4294901760, %v16440_v38  ;;  %v1444_v50 = vsel %vm1424_vm0, %v1422_v39, 0 }
 0x189   : > { %v1520_v45 = vand.u32 4294901760, %v1519_v35  ;;  %13362 = vmatprep.subr.mxu1 %v1629_v41  ;;  %v1530_v49 = vand.u32 4294901760, %v1529_v42  ;;  %v1447_v51 = vsel %vm1424_vm0, %v1423_v40, 0  ;;  %v1540_v52 = vand.u32 4294901760, %v1539_v44 }
 0x18a   : > { %13363 = vmatpush3.msra.mxu1 %v1629_v41  ;;  %v1559_v53 = vsub.f32 %v16437_v37, %v1558_v47  ;;  %v16458_v54 = vand.u32 4294901760, %v1444_v50  ;;  %v1550_v55 = vand.u32 4294901760, %v1549_v46  ;;  %v1569_v56 = vsub.f32 %v16440_v38, %v1568_v48 }
 0x18b   : > { %13350 = vmatprep.mubr.f32.mxu0 %v1520_v45  ;;  %13364 = vmatprep.subr.mxu1 %v1636_v43  ;;  %v16463_v57 = vand.u32 4294901760, %v1447_v51 }
 0x18c   : > { %13351 = vmatmul.mubr.f32.vlgmr.msra.gmra.mxu0 %v1530_v49  ;;  %13365 = vmatpush3.msra.mxu1 %v1636_v43  ;;  %v1560_v58 = vand.u32 4294901760, %v1559_v53  ;;  %v1577_v59 = vsub.f32 %v1444_v50, %v16458_v54  ;;  %v1570_v62 = vand.u32 4294901760, %v1569_v56 }
 0x18d   : > { %13379 = vmatpush3.msra.mxu0 %v1626_v15  ;;  %13367 = vmatmul.mubr.f32.vlgmr.msra.gmra.mxu1 %v16390_v16  ;;  %v1587_v60 = vsub.f32 %v1447_v51, %v16463_v57 }
 0x18e   : > { %13394 = vmatprep.subr.mxu1 %v16373_v3  ;;  %13353 = vmatprep.mubr.f32.mxu0 %v1540_v52  ;;  %v1578_v61 = vand.u32 4294901760, %v1577_v59 }
 0x18f   : > { %13395 = vmatpush3.msra.mxu1 %v16373_v3  ;;  %13369 = vmatprep.mubr.f32.mxu1 %v16395_v18  ;;  %v1588_v63 = vand.u32 4294901760, %v1587_v60 }
 0x190   : > { %13354 = vmatmul.mubr.f32.gmra.mxu0 %v1550_v55  ;;  %13380 = vmatprep.subr.mxu0 %v16393_v17  ;;  %v1579_v0 = vsub.f32 %v1577_v59, %v1578_v61 }
 0x191   : > { %13356 = vmatprep.mubr.f32.mxu0 %v1560_v58  ;;  %13370 = vmatmul.mubr.f32.gmra.mxu1 %v16402_v20  ;;  %v1589_v1 = vsub.f32 %v1587_v60, %v1588_v63 }
 0x192   : > { %13381 = vmatpush3.msra.mxu0 %v16393_v17  ;;  %13372 = vmatprep.mubr.f32.mxu1 %v16423_v29  ;;  %v1580_v2 = vand.u32 4294901760, %v1579_v0 }
 0x193   : > { %13396 = vmatprep.subr.mxu1 %v16375_v4  ;;  %v1590_v5 = vand.u32 4294901760, %v1589_v1  ;;  %13410 = vmatprep.subr.mxu0 %v16407_v23 }
 0x194   : > { %13357 = vmatmul.mubr.f32.gmra.mxu0 %v1570_v62  ;;  %13397 = vmatpush3.msra.mxu1 %v16375_v4 }
 0x195   : > { %13359 = vmatprep.mubr.f32.mxu0 %v1580_v2  ;;  %13373 = vmatmul.mubr.f32.gmra.mxu1 %v16425_v30  ;;  %v2292_v2 = vld [vmem:[#allocation5 + $0x18] sm:$0xff] }
 0x196   : > { %13426 = vmatprep.subr.mxu1 %v16373_v3  ;;  %13375 = vmatprep.mubr.f32.mxu1 %v16458_v54 }
 0x198   : > { %13360 = vmatmul.mubr.f32.gmra.mxu0 %v1590_v5 }
 0x199   : > { %13382 = vmatprep.mubr.f32.mxu0 %v16399_v19  ;;  %13376 = vmatmul.mubr.f32.gmra.mxu1 %v16463_v57 }
 0x19a   : > { %13398 = vmatprep.mubr.f32.mxu1 %v1518_v27 }
 0x19c   : > { %13383 = vmatmul.mubr.f32.vlgmr.msra.gmra.mxu0 %v16410_v24 }
 0x19d   : > { %13411 = vmatpush3.msra.mxu0 %v16407_v23  ;;  %13385 = vmatprep.mubr.f32.mxu0 %v16416_v26 }
 0x19e   : > { %13399 = vmatmul.mubr.f32.vlgmr.msra.gmra.mxu1 %v1528_v32  ;;  %13412 = vmatprep.subr.mxu0 %v16413_v25 }
 0x19f   : > { %13427 = vmatpush3.msra.mxu1 %v16373_v3  ;;  %13401 = vmatprep.mubr.f32.mxu1 %v1538_v34 }
 0x1a0   : > { %13386 = vmatmul.mubr.f32.gmra.mxu0 %v16421_v28  ;;  %13428 = vmatprep.subr.mxu1 %v16375_v4 }
 0x1a1   : > { %13388 = vmatprep.mubr.f32.mxu0 %v16437_v37  ;;  %13413 = vmatpush3.msra.mxu0 %v16413_v25 }
 0x1a2   : > { %13402 = vmatmul.mubr.f32.gmra.mxu1 %v1548_v36 }
 0x1a3   : > { %13404 = vmatprep.mubr.f32.mxu1 %v1558_v47  ;;  %13429 = vmatpush3.msra.mxu1 %v16375_v4 }
 0x1a4   : > { %13389 = vmatmul.mubr.f32.gmra.mxu0 %v16440_v38 }
 0x1a5   : > { %13391 = vmatprep.mubr.f32.mxu0 %v1577_v59 }
 0x1a6   : > { %13405 = vmatmul.mubr.f32.gmra.mxu1 %v1568_v48 }
 0x1a7   : > { %13407 = vmatprep.mubr.f32.mxu1 %v1578_v61 }
 0x1a8   : > { %13392 = vmatmul.mubr.f32.gmra.mxu0 %v1587_v60 }
 0x1a9   : > { %13414 = vmatprep.mubr.f32.mxu0 %v16381_v9 }
 0x1aa   : > { %13408 = vmatmul.mubr.f32.gmra.mxu1 %v1588_v63 }
 0x1ab   : > { %13430 = vmatprep.mubr.f32.mxu1 %v16381_v9 }
 0x1ac   : > { %13415 = vmatmul.mubr.f32.vlgmr.msra.gmra.mxu0 %v16390_v16 }
 0x1ad   : > { %13417 = vmatprep.mubr.f32.mxu0 %v16395_v18 }
 0x1ae   : > { %13431 = vmatmul.mubr.f32.vlgmr.msra.gmra.mxu1 %v16390_v16 }
 0x1af   : > { %13433 = vmatprep.mubr.f32.mxu1 %v16395_v18 }
 0x1b0   : > { %13418 = vmatmul.mubr.f32.gmra.mxu0 %v16402_v20 }
 0x1b1   : > { %13420 = vmatprep.mubr.f32.mxu0 %v16423_v29 }
 0x1b2   : > { %13434 = vmatmul.mubr.f32.gmra.mxu1 %v16402_v20 }
 0x1b3   : > { %13436 = vmatprep.mubr.f32.mxu1 %v16423_v29 }
 0x1b4   : > { %13421 = vmatmul.mubr.f32.gmra.mxu0 %v16425_v30 }
 0x1b5   : > { %13423 = vmatprep.mubr.f32.mxu0 %v16458_v54 }
 0x1b6   : > { %13437 = vmatmul.mubr.f32.gmra.mxu1 %v16425_v30 }
 0x1b7   : > { %13439 = vmatprep.mubr.f32.mxu1 %v16458_v54 }
 0x1b8   : > { %13424 = vmatmul.mubr.f32.gmra.mxu0 %v16463_v57 }
 0x1ba   : > { %13440 = vmatmul.mubr.f32.gmra.mxu1 %v16463_v57 }
 0x24c   : > { %v13352_v3 = vpop.f32.mrf.mxu0 }
 0x24d   : > { %v13368_v6 = vpop.f32.mrf.mxu1 }
 0x24e   : > { %v1522_v4 = vpop.f32.mrf.mxu0  ;;  %v1680_v33 = vadd.f32 %v13368_v6, %v13352_v3  ;;  %v16522_v6 = vand.u32 4294901760, %v2292_v2 }
 0x24f   : > { %v1673_v8 = vpop.f32.mrf.mxu1 }
 0x250   : > { %v13355_v7 = vpop.f32.mrf.mxu0  ;;  %v1674_v35 = vadd.f32 %v1673_v8, %v1522_v4  ;;  %13442 = vmatprep.subr.mxu0 %v16522_v6 }
 0x251   : > { %v13371_v10 = vpop.f32.mrf.mxu1  ;;  %13443 = vmatpush3.msra.mxu0 %v16522_v6 }
 0x252   : > { %v1542_v9 = vpop.f32.mrf.mxu0  ;;  %v1692_v34 = vadd.f32 %v13371_v10, %v13355_v7  ;;  %v2291_v10 = vld [vmem:[#allocation5 + $0x10] sm:$0xff] }
 0x253   : > { %v1685_v12 = vpop.f32.mrf.mxu1 }
 0x254   : > { %v13358_v11 = vpop.f32.mrf.mxu0  ;;  %v1686_v38 = vadd.f32 %v1685_v12, %v1542_v9 }
 0x255   : > { %v13374_v14 = vpop.f32.mrf.mxu1 }
 0x256   : > { %v1562_v13 = vpop.f32.mrf.mxu0  ;;  %v1704_v44 = vadd.f32 %v13374_v14, %v13358_v11 }
 0x257   : > { %v1697_v16 = vpop.f32.mrf.mxu1 }
 0x258   : > { %v13361_v15 = vpop.f32.mrf.mxu0  ;;  %v1698_v46 = vadd.f32 %v1697_v16, %v1562_v13 }
 0x259   : > { %v13377_v18 = vpop.f32.mrf.mxu1 }
 0x25a   : > { %v1582_v17 = vpop.f32.mrf.mxu0  ;;  %v1716_v49 = vadd.f32 %v13377_v18, %v13361_v15 }
 0x25b   : > { %v1709_v19 = vpop.f32.mrf.mxu1 }
 0x25c   : > { %v13384_v20 = vpop.f32.mrf.mxu0  ;;  %v1710_v53 = vadd.f32 %v1709_v19, %v1582_v17  ;;  %v16528_v19 = vsub.f32 %v2292_v2, %v16522_v6 }
 0x25d   : > { %v1799_v39 = vadd.f32 %v13384_v20, %v1680_v33  ;;  %v16531_v20 = vand.u32 4294901760, %v2291_v10 }
 0x25e   : > { %v1791_v21 = vpop.f32.mrf.mxu0  ;;  %v13400_v22 = vpop.f32.mrf.mxu1 }
 0x25f   : > { %v1792_v41 = vadd.f32 %v1791_v21, %v1674_v35  ;;  %v1924_v50 = vadd.f32 %v13400_v22, %v1799_v39  ;;  %v2290_v21 = vld [vmem:[#allocation5 + $0x8] sm:$0xff]  ;;  %13444 = vmatprep.subr.mxu0 %v16531_v20  ;;  %v15917_v35 = vmov 0.0  }
 0x260   : > { %v13387_v23 = vpop.f32.mrf.mxu0  ;;  %v1915_v24 = vpop.f32.mrf.mxu1  ;;  %2259 = vst.msk [vmem:[#allocation3] sm:$0xff] %vm2225_vm1, %v15917_v35  ;;  %2260 = vst.msk [vmem:[#allocation3 + $0x8] sm:$0xff] %vm2225_vm1, %v15917_v35  ;;  %13445 = vmatpush3.msra.mxu0 %v16531_v20 }
 0x261   : > { %v1813_v40 = vadd.f32 %v13387_v23, %v1692_v34  ;;  %v1916_v54 = vadd.f32 %v1915_v24, %v1792_v41 }
 0x262   : > { %v1805_v25 = vpop.f32.mrf.mxu0  ;;  %v13403_v26 = vpop.f32.mrf.mxu1 }
 0x263   : > { %v1806_v45 = vadd.f32 %v1805_v25, %v1686_v38  ;;  %v1940_v51 = vadd.f32 %v13403_v26, %v1813_v40 }
 0x264   : > { %v13390_v27 = vpop.f32.mrf.mxu0  ;;  %v1931_v28 = vpop.f32.mrf.mxu1 }
 0x265   : > { %v1827_v52 = vadd.f32 %v13390_v27, %v1704_v44  ;;  %v1932_v58 = vadd.f32 %v1931_v28, %v1806_v45  ;;  %v16536_v28 = vand.u32 4294901760, %v16528_v19 }
 0x266   : > { %v1819_v29 = vpop.f32.mrf.mxu0  ;;  %v13406_v30 = vpop.f32.mrf.mxu1 }
 0x267   : > { %v1820_v55 = vadd.f32 %v1819_v29, %v1698_v46  ;;  %v1956_v5 = vadd.f32 %v13406_v30, %v1827_v52  ;;  %v16539_v29 = vsub.f32 %v2291_v10, %v16531_v20  ;;  %v16541_v30 = vand.u32 4294901760, %v2290_v21  ;;  %v2289_v46 = vld [vmem:[#allocation5] sm:$0xff] }
 0x268   : > { %v13393_v31 = vpop.f32.mrf.mxu0  ;;  %v1947_v32 = vpop.f32.mrf.mxu1  ;;  %v2424_v39 = vsub.f32 %v16528_v19, %v16536_v28 }
 0x269   : > { %v1841_v59 = vadd.f32 %v13393_v31, %v1716_v49  ;;  %v1948_v7 = vadd.f32 %v1947_v32, %v1820_v55  ;;  %v16554_v40 = vand.u32 4294901760, %v16539_v29  ;;  %v16557_v41 = vsub.f32 %v2290_v21, %v16541_v30  ;;  %13446 = vmatprep.subr.mxu0 %v16541_v30 }
 0x26a   : > { %v1833_v36 = vpop.f32.mrf.mxu0  ;;  %v13409_v37 = vpop.f32.mrf.mxu1  ;;  %v2425_v49 = vand.u32 4294901760, %v2424_v39  ;;  %13447 = vmatpush3.msra.mxu0 %v16541_v30 }
 0x26b   : > { %v1834_v62 = vadd.f32 %v1833_v36, %v1710_v53  ;;  %v1972_v11 = vadd.f32 %v13409_v37, %v1841_v59 }
 0x26c   : > { %v1963_v42 = vpop.f32.mrf.mxu1  ;;  %v13416_v43 = vpop.f32.mrf.mxu0  ;;  %13453 = vmatprep.subr.mxu1 %v2425_v49 }
 0x26d   : > { %v2055_v60 = vadd.f32 %v13416_v43, %v1924_v50  ;;  %v1964_v15 = vadd.f32 %v1963_v42, %v1834_v62  ;;  %v2431_v50 = vsub.f32 %v16539_v29, %v16554_v40  ;;  %13454 = vmatpush3.msra.mxu1 %v2425_v49 }
 0x26e   : > { %v2048_v47 = vpop.f32.mrf.mxu0  ;;  %v13432_v48 = vpop.f32.mrf.mxu1 }
 0x26f   : > { %v2049_v63 = vadd.f32 %v2048_v47, %v1916_v54  ;;  %v2170_v12 = vadd.f32 %v13432_v48, %v2055_v60 }
 0x270   : > { %v13419_v56 = vpop.f32.mrf.mxu0  ;;  %v2163_v57 = vpop.f32.mrf.mxu1 }
 0x271   : > { %v2067_v61 = vadd.f32 %v13419_v56, %v1940_v51  ;;  %v2164_v16 = vadd.f32 %v2163_v57, %v2049_v63  ;;  %v16564_v51 = vand.u32 4294901760, %v16557_v41  ;;  %v2432_v56 = vand.u32 4294901760, %v2431_v50 }
 0x272   : > { %v2060_v0 = vpop.f32.mrf.mxu0  ;;  %v13435_v1 = vpop.f32.mrf.mxu1 }
 0x273   : > { %v2061_v3 = vadd.f32 %v2060_v0, %v1932_v58  ;;  %v16520_v4 = vadd.f32 %v13435_v1, %v2067_v61  ;;  %v2438_v57 = vsub.f32 %v16557_v41, %v16564_v51  ;;  %v16569_v58 = vand.u32 4294901760, %v2289_v46  ;;  %13455 = vmatprep.subr.mxu1 %v2432_v56 }
 0x274   : > { %v13422_v8 = vpop.f32.mrf.mxu0  ;;  %v2175_v9 = vpop.f32.mrf.mxu1  ;;  %13456 = vmatpush3.msra.mxu1 %v2432_v56 }
 0x275   : > { %v2079_v13 = vadd.f32 %v13422_v8, %v1956_v5  ;;  %v16524_v14 = vadd.f32 %v2175_v9, %v2061_v3  ;;  %v2210_v22 = vadd.f32 %v16520_v4, %v2170_v12  ;;  %v2218_v23 = vsub.f32 %v2170_v12, %v16520_v4  ;;  %13448 = vmatprep.subr.mxu0 %v16569_v58 }
 0x276   : > { %v2072_v17 = vpop.f32.mrf.mxu0  ;;  %v13438_v18 = vpop.f32.mrf.mxu1  ;;  %v2439_v61 = vand.u32 4294901760, %v2438_v57  ;;  %v16575_v62 = vsub.f32 %v2289_v46, %v16569_v58  ;;  %13449 = vmatpush3.msra.mxu0 %v16569_v58 }
 0x277   : > { %v2073_v24 = vadd.f32 %v2072_v17, %v1948_v7  ;;  %v2194_v25 = vadd.f32 %v13438_v18, %v2079_v13  ;;  %v2209_v31 = vadd.f32 %v16524_v14, %v2164_v16  ;;  %v2217_v36 = vsub.f32 %v2164_v16, %v16524_v14  ;;  %13464 = vmatprep.subr.mxu0 %v16528_v19 }
 0x278   : > { %v13425_v26 = vpop.f32.mrf.mxu0  ;;  %v2187_v27 = vpop.f32.mrf.mxu1  ;;  %v16581_v0 = vand.u32 4294901760, %v16575_v62  ;;  %13457 = vmatprep.subr.mxu1 %v2439_v61 }
 0x279   : > { %v2091_v32 = vadd.f32 %v13425_v26, %v1972_v11  ;;  %v2188_v33 = vadd.f32 %v2187_v27, %v2073_v24  ;;  %v2216_v34 = vsub.f32 %v2170_v12, %v2194_v25  ;;  %v2212_v42 = vadd.f32 %v2210_v22, %v2194_v25  ;;  %13458 = vmatpush3.msra.mxu1 %v2439_v61  ;;  %v2838_v24 = vld [vmem:[#allocation7 + $0x18] sm:$0xff]  ;;  %v3388_v61 = vld [vmem:[#allocation9] sm:$0xff] }
 0x27a   : > { %v2084_v37 = vpop.f32.mrf.mxu0  ;;  %v13441_v38 = vpop.f32.mrf.mxu1  ;;  %v2220_v45 = vadd.f32 %v2218_v23, %v2194_v25  ;;  %v2445_v1 = vsub.f32 %v16575_v62, %v16581_v0 }
 0x27b   : > { %v2085_v43 = vadd.f32 %v2084_v37, %v1964_v15  ;;  %v2206_v44 = vadd.f32 %v13441_v38, %v2091_v32  ;;  %2232 = vrot.lane.b32.xlu0 %v2216_v34, %s15918_s0  ;;  %v2211_v47 = vadd.f32 %v2209_v31, %v2188_v33  ;;  %v2215_v55 = vsub.f32 %v2164_v16, %v2188_v33 }
 0x27c   : > { %v2199_v48 = vpop.f32.mrf.mxu1  ;;  %v2219_v59 = vadd.f32 %v2217_v36, %v2188_v33  ;;  %v2446_v5 = vand.u32 4294901760, %v2445_v1  ;;  %v16619_v32 = vand.u32 4294901760, %v2838_v24  ;;  %v2837_v33 = vld [vmem:[#allocation7 + $0x10] sm:$0xff]  ;;  %v2836_v36 = vld [vmem:[#allocation7 + $0x8] sm:$0xff]  ;;  %v16745_v1 = vand.u32 4294901760, %v3388_v61 }
 0x27d   : > { %v2214_v52 = vadd.f32 %v2212_v42, %v2206_v44  ;;  %v2200_v53 = vadd.f32 %v2199_v48, %v2085_v43  ;;  %v2222_v54 = vsub.f32 %v2220_v45, %v2206_v44  ;;  %v2224_v7 = vsub.f32 %v2206_v44, %v16520_v4  ;;  %v2835_v43 = vld [vmem:[#allocation7] sm:$0xff] }
 0x27e   : > { %13459 = vmatprep.subr.mxu1 %v2446_v5  ;;  %v16633_v38 = vand.u32 4294901760, %v2837_v33  ;;  %v16639_v42 = vsub.f32 %v2838_v24, %v16619_v32  ;;  %v16644_v45 = vand.u32 4294901760, %v2836_v36  ;;  %v16654_v48 = vand.u32 4294901760, %v2835_v43 }
 0x27f   : > { %v2213_v60 = vadd.f32 %v2211_v47, %v2200_v53  ;;  %2243 = vrot.lane.b32.xlu1 %v2222_v54, %s15919_s11  ;;  %2230 = vrot.lane.b32.xlu0 %v2215_v55, %s15918_s0  ;;  %2227 = vst.msk [vmem:[#allocation2 + $0x8] sm:$0xff] %vm2225_vm1, %v2214_v52  ;;  %v2221_v63 = vsub.f32 %v2219_v59, %v2200_v53  ;;  %v2274_v8 = vsub.f32 0.0, %v2224_v7 }
 0x280   : > { %v2223_v2 = vsub.f32 %v2200_v53, %v16524_v14  ;;  %13460 = vmatpush3.msra.mxu1 %v2446_v5  ;;  %v16652_v47 = vsub.f32 %v2837_v33, %v16633_v38  ;;  %v16658_v49 = vand.u32 4294901760, %v16639_v42  ;;  %v16663_v50 = vsub.f32 %v2836_v36, %v16644_v45  ;;  %v3935_v36 = vld [vmem:[#allocation12 + $0x10] sm:$0xff] }
 0x281   : > { %2226 = vst.msk [vmem:[#allocation2] sm:$0xff] %vm2225_vm1, %v2213_v60  ;;  %13475 = vmatprep.subr.mxu1 %v16522_v6  ;;  %v16673_v53 = vsub.f32 %v2835_v43, %v16654_v48 }
 0x282   : > { %v2273_v3 = vsub.f32 0.0, %v2223_v2  ;;  %v16670_v52 = vand.u32 4294901760, %v16652_v47  ;;  %v2963_v54 = vsub.f32 %v16639_v42, %v16658_v49 }
 0x283   : > { %2250 = vrot.lane.b32.xlu0 %v2215_v55, %s15920_s2  ;;  %2241 = vrot.lane.b32.xlu1 %v2221_v63, %s15919_s11  ;;  %v16691_v55 = vand.u32 4294901760, %v16673_v53 }
 0x287   : > { %2263 = vrot.lane.b32.xlu0 %v2223_v2, %s15918_s0  ;;  %2252 = vrot.lane.b32.xlu1 %v2216_v34, %s15920_s2 }
 0x28b   : > { %2277 = vrot.lane.b32.xlu0 %v2273_v3, %s15920_s2  ;;  %2265 = vrot.lane.b32.xlu1 %v2224_v7, %s15918_s0  ;;  %s19062_s0 = sld [smem:[#allocation66_spill]] }
 0x28f   : > { %2279 = vrot.lane.b32.xlu1 %v2274_v8, %s15920_s2  ;;  %v16766_v8 = vsub.f32 %v3388_v61, %v16745_v1  ;;  %s19063_s2 = sld [smem:[#allocation64_spill]] }
 0x2ed   : > { %v2233_v9 = vpop.permute.xlu0 %2232 }
 0x2ee   : > { %2238 = vst.msk [vmem:[#allocation2 + $0x8] sm:$0xff] %vm2236_vm2, %v2233_v9 }
 0x2f1   : > { %v2244_v10 = vpop.permute.xlu1 %2243  ;;  %v2231_v11 = vpop.permute.xlu0 %2230 }
 0x2f2   : > { %2249 = vst.msk [vmem:[#allocation2 + $0x8] sm:$0xff] %vm2247_vm3, %v2244_v10 }
 0x2f3   : > { %2237 = vst.msk [vmem:[#allocation2] sm:$0xff] %vm2236_vm2, %v2231_v11 }
 0x2f5   : > { %v2251_v4 = vpop.permute.xlu0 %2250  ;;  %v2242_v12 = vpop.permute.xlu1 %2241 }
 0x2f6   : > { %2248 = vst.msk [vmem:[#allocation2] sm:$0xff] %vm2247_vm3, %v2242_v12 }
 0x2f7   : > { %2257 = vst.msk [vmem:[#allocation2] sm:$0xff] %vm2256_vm4, %v2251_v4 }
 0x2f9   : > { %v2264_v13 = vpop.permute.xlu0 %2263  ;;  %v2253_v14 = vpop.permute.xlu1 %2252 }
 0x2fa   : > { %2269 = vst.msk [vmem:[#allocation3] sm:$0xff] %vm2236_vm2, %v2264_v13  ;;  %v16786_v13 = vand.u32 4294901760, %v16766_v8 }
 0x2fb   : > { %2258 = vst.msk [vmem:[#allocation2 + $0x8] sm:$0xff] %vm2256_vm4, %v2253_v14 }
 0x2fc   : > { %2271 = vst.msk [vmem:[#allocation3] sm:$0xff] %vm2247_vm3, %v15917_v35 }
 0x2fd   : > { %v2278_v15 = vpop.permute.xlu0 %2277  ;;  %v2266_v16 = vpop.permute.xlu1 %2265 }
 0x2fe   : > { %2283 = vst.msk [vmem:[#allocation3] sm:$0xff] %vm2256_vm4, %v2278_v15  ;;  %v2285_v17 = vld [vmem:[#allocation2] sm:$0xff] }
 0x2ff   : > { %2270 = vst.msk [vmem:[#allocation3 + $0x8] sm:$0xff] %vm2236_vm2, %v2266_v16  ;;  %v2302_v18 = vsel %vm2300_vm5, %v2285_v17, 0 }
 0x300   : > { %2272 = vst.msk [vmem:[#allocation3 + $0x8] sm:$0xff] %vm2247_vm3, %v15917_v35  ;;  %v16606_v21 = vand.u32 4294901760, %v2302_v18 }
 0x301   : > { %v2280_v22 = vpop.permute.xlu1 %2279 }
 0x302   : > { %v2286_v23 = vld [vmem:[#allocation2 + $0x8] sm:$0xff]  ;;  %2284 = vst.msk [vmem:[#allocation3 + $0x8] sm:$0xff] %vm2256_vm4, %v2280_v22  ;;  %13461 = vmatprep.mubr.f32.mxu1 %v16606_v21  ;;  %v16612_v26 = vsub.f32 %v2302_v18, %v16606_v21  ;;  %v3543_v22 = vsub.f32 %v16766_v8, %v16786_v13 }
 0x303   : > { %v2305_v25 = vsel %vm2300_vm5, %v2286_v23, 0 }
 0x304   : > { %v16614_v27 = vand.u32 4294901760, %v2305_v25  ;;  %v16617_v31 = vand.u32 4294901760, %v16612_v26 }
 0x305   : > { %v2287_v63 = vld [vmem:[#allocation3] sm:$0xff] }
 0x306   : > { %13462 = vmatmul.mubr.f32.vlgmr.msra.gmra.mxu1 %v16614_v27  ;;  %v16623_v34 = vsub.f32 %v2305_v25, %v16614_v27  ;;  %v2379_v35 = vsub.f32 %v16612_v26, %v16617_v31  ;;  %v3400_v3 = vsel %vm2300_vm5, %v2287_v63, 0 }
 0x307   : > { %13476 = vmatpush3.msra.mxu1 %v16522_v6  ;;  %13483 = vmatprep.mubr.f32.mxu1 %v16617_v31  ;;  %v16774_v10 = vand.u32 4294901760, %v3400_v3 }
 0x308   : > { %13477 = vmatprep.subr.mxu1 %v16531_v20  ;;  %v16631_v37 = vand.u32 4294901760, %v16623_v34  ;;  %v16636_v39 = vand.u32 4294901760, %v2379_v35 }
 0x309   : > { %13478 = vmatpush3.msra.mxu1 %v16531_v20  ;;  %v2288_v4 = vld [vmem:[#allocation3 + $0x8] sm:$0xff]  ;;  %v16796_v17 = vsub.f32 %v3400_v3, %v16774_v10 }
 0x30a   : > { %13479 = vmatprep.subr.mxu1 %v16541_v30  ;;  %v2389_v44 = vsub.f32 %v16623_v34, %v16631_v37  ;;  %13450 = vmatprep.mubr.f32.mxu0 %v16636_v39  ;;  %v3403_v16 = vsel %vm2300_vm5, %v2288_v4, 0 }
 0x30b   : > { %13480 = vmatpush3.msra.mxu1 %v16541_v30  ;;  %v16805_v23 = vand.u32 4294901760, %v3403_v16  ;;  %v16809_v25 = vand.u32 4294901760, %v16796_v17 }
 0x30c   : > { %13481 = vmatprep.subr.mxu1 %v16569_v58  ;;  %v16649_v46 = vand.u32 4294901760, %v2389_v44 }
 0x30d   : > { %13482 = vmatpush3.msra.mxu1 %v16569_v58 }
 0x30e   : > { %13484 = vmatmul.mubr.f32.vlgmr.msra.gmra.mxu1 %v16631_v37  ;;  %13497 = vmatprep.subr.mxu1 %v16522_v6 }
 0x30f   : > { %13451 = vmatmul.mubr.f32.vlgmr.msra.gmra.mxu0 %v16649_v46  ;;  %13498 = vmatpush3.msra.mxu1 %v16522_v6  ;;  %v16682_v6 = vand.u32 4294901760, %v16663_v50 }
 0x310   : > { %13465 = vmatpush3.msra.mxu0 %v16528_v19  ;;  %13505 = vmatprep.mubr.f32.mxu1 %v16606_v21  ;;  %v2970_v19 = vsub.f32 %v16652_v47, %v16670_v52 }
 0x311   : > { %13466 = vmatprep.subr.mxu0 %v16539_v29  ;;  %13472 = vmatprep.mubr.f32.mxu0 %v16612_v26 }
 0x312   : > { %13499 = vmatprep.subr.mxu1 %v16531_v20  ;;  %13467 = vmatpush3.msra.mxu0 %v16539_v29  ;;  %v2964_v29 = vand.u32 4294901760, %v2963_v54 }
 0x313   : > { %13500 = vmatpush3.msra.mxu1 %v16531_v20  ;;  %13468 = vmatprep.subr.mxu0 %v16557_v41  ;;  %v2977_v20 = vsub.f32 %v16663_v50, %v16682_v6 }
 0x314   : > { %13501 = vmatprep.subr.mxu1 %v16541_v30  ;;  %13469 = vmatpush3.msra.mxu0 %v16557_v41  ;;  %v2971_v41 = vand.u32 4294901760, %v2970_v19 }
 0x315   : > { %13502 = vmatpush3.msra.mxu1 %v16541_v30  ;;  %13470 = vmatprep.subr.mxu0 %v16575_v62  ;;  %v2984_v30 = vsub.f32 %v16673_v53, %v16691_v55  ;;  %v2978_v56 = vand.u32 4294901760, %v2977_v20 }
 0x316   : > { %13503 = vmatprep.subr.mxu1 %v16569_v58  ;;  %13471 = vmatpush3.msra.mxu0 %v16575_v62 }
 0x317   : > { %13504 = vmatpush3.msra.mxu1 %v16569_v58  ;;  %13473 = vmatmul.mubr.f32.vlgmr.msra.gmra.mxu0 %v16623_v34  ;;  %v2985_v57 = vand.u32 4294901760, %v2984_v30  ;;  %v3389_v58 = vld [vmem:[#allocation9 + $0x8] sm:$0xff] }
 0x318   : > { %13486 = vmatprep.subr.mxu0 %v16536_v28  ;;  %13506 = vmatmul.mubr.f32.vlgmr.msra.gmra.mxu1 %v16614_v27  ;;  %v16736_v62 = vand.u32 4294901760, %v3389_v58 }
 0x319   : > { %13519 = vmatprep.subr.mxu1 %v2964_v29  ;;  %13487 = vmatpush3.msra.mxu0 %v16536_v28  ;;  %v3391_v28 = vld [vmem:[#allocation9 + $0x18] sm:$0xff] }
 0x31a   : > { %13494 = vmatprep.mubr.f32.mxu0 %v16606_v21  ;;  %13520 = vmatpush3.msra.mxu1 %v2964_v29  ;;  %v16755_v5 = vsub.f32 %v3389_v58, %v16736_v62  ;;  %v4491_v58 = vld [vmem:[%s19055_s5 + $0x28] sm:$0xff] }
 0x31b   : > { %13527 = vmatprep.mubr.f32.mxu1 %v16606_v21  ;;  %13488 = vmatprep.subr.mxu0 %v16554_v40  ;;  %v16994_v61 = vand.u32 4294901760, %v4491_v58 }
 0x31c   : > { %13521 = vmatprep.subr.mxu1 %v2971_v41  ;;  %13489 = vmatpush3.msra.mxu0 %v16554_v40  ;;  %v16719_v40 = vand.u32 4294901760, %v3391_v28  ;;  %v16777_v11 = vand.u32 4294901760, %v16755_v5 }
 0x31d   : > { %13522 = vmatpush3.msra.mxu1 %v2971_v41  ;;  %13490 = vmatprep.subr.mxu0 %v16564_v51 }
 0x31e   : > { %13523 = vmatprep.subr.mxu1 %v2978_v56  ;;  %13491 = vmatpush3.msra.mxu0 %v16564_v51  ;;  %v3390_v51 = vld [vmem:[#allocation9 + $0x10] sm:$0xff]  ;;  %v16732_v60 = vsub.f32 %v3391_v28, %v16719_v40  ;;  %v3536_v15 = vsub.f32 %v16755_v5, %v16777_v11  ;;  %v4492_v28 = vld [vmem:[%s19055_s5 + $0x30] sm:$0xff] }
 0x31f   : > { %13524 = vmatpush3.msra.mxu1 %v2978_v56  ;;  %13492 = vmatprep.subr.mxu0 %v16581_v0  ;;  %v16727_v59 = vand.u32 4294901760, %v3390_v51  ;;  %v4493_v56 = vld [vmem:[%s19055_s5 + $0x38] sm:$0xff] }
 0x320   : > { %13525 = vmatprep.subr.mxu1 %v2985_v57  ;;  %13493 = vmatpush3.msra.mxu0 %v16581_v0  ;;  %v16750_v2 = vand.u32 4294901760, %v16732_v60  ;;  %v3537_v24 = vand.u32 4294901760, %v3536_v15 }
 0x321   : > { %13526 = vmatpush3.msra.mxu1 %v2985_v57  ;;  %13495 = vmatmul.mubr.f32.vlgmr.msra.gmra.mxu0 %v16614_v27  ;;  %v16743_v0 = vsub.f32 %v3390_v51, %v16727_v59  ;;  %v16977_v57 = vand.u32 4294901760, %v4493_v56  ;;  %v16983_v51 = vand.u32 4294901760, %v4492_v28 }
 0x322   : > { %13508 = vmatprep.subr.mxu0 %v16619_v32  ;;  %13528 = vmatmul.mubr.f32.vlgmr.msra.gmra.mxu1 %v16614_v27  ;;  %v3522_v9 = vsub.f32 %v16732_v60, %v16750_v2 }
 0x323   : > { %13541 = vmatprep.subr.mxu1 %v16619_v32  ;;  %13509 = vmatpush3.msra.mxu0 %v16619_v32  ;;  %v16763_v7 = vand.u32 4294901760, %v16743_v0 }
 0x324   : > { %13516 = vmatprep.mubr.f32.mxu0 %v16636_v39  ;;  %13542 = vmatpush3.msra.mxu1 %v16619_v32  ;;  %v3523_v14 = vand.u32 4294901760, %v3522_v9 }
 0x325   : > { %13549 = vmatprep.mubr.f32.mxu1 %v16617_v31  ;;  %13510 = vmatprep.subr.mxu0 %v16633_v38  ;;  %v3529_v12 = vsub.f32 %v16743_v0, %v16763_v7  ;;  %v16816_v31 = vsub.f32 %v3403_v16, %v16805_v23  ;;  %v4487_v16 = vld [vmem:[%s19055_s5 + $0x8] sm:$0xff] }
 0x326   : > { %13543 = vmatprep.subr.mxu1 %v16633_v38  ;;  %13511 = vmatpush3.msra.mxu0 %v16633_v38 }
 0x327   : > { %13544 = vmatpush3.msra.mxu1 %v16633_v38  ;;  %13512 = vmatprep.subr.mxu0 %v16644_v45  ;;  %v3530_v18 = vand.u32 4294901760, %v3529_v12  ;;  %v16825_v33 = vand.u32 4294901760, %v16816_v31 }
 0x328   : > { %13545 = vmatprep.subr.mxu1 %v16644_v45  ;;  %13513 = vmatpush3.msra.mxu0 %v16644_v45 }
 0x329   : > { %13546 = vmatpush3.msra.mxu1 %v16644_v45  ;;  %13514 = vmatprep.subr.mxu0 %v16654_v48 }
 0x32a   : > { %13547 = vmatprep.subr.mxu1 %v16654_v48  ;;  %13515 = vmatpush3.msra.mxu0 %v16654_v48 }
 0x32b   : > { %13548 = vmatpush3.msra.mxu1 %v16654_v48  ;;  %13517 = vmatmul.mubr.f32.vlgmr.msra.gmra.mxu0 %v16649_v46 }
 0x32c   : > { %13530 = vmatprep.subr.mxu0 %v16639_v42  ;;  %13550 = vmatmul.mubr.f32.vlgmr.msra.gmra.mxu1 %v16631_v37  ;;  %v3934_v37 = vld [vmem:[#allocation12 + $0x8] sm:$0xff] }
 0x32d   : > { %13563 = vmatprep.subr.mxu1 %v16619_v32  ;;  %13531 = vmatpush3.msra.mxu0 %v16639_v42  ;;  %v3933_v42 = vld [vmem:[#allocation12] sm:$0xff]  ;;  %v16852_v43 = vand.u32 4294901760, %v3934_v37 }
 0x32e   : > { %13538 = vmatprep.mubr.f32.mxu0 %v16612_v26  ;;  %13564 = vmatpush3.msra.mxu1 %v16619_v32  ;;  %v3544_v26 = vand.u32 4294901760, %v3543_v22  ;;  %v3936_v32 = vld [vmem:[#allocation12 + $0x18] sm:$0xff]  ;;  %v16863_v46 = vand.u32 4294901760, %v3933_v42  ;;  %v17040_v22 = vand.u32 4294901760, %v4487_v16 }
 0x32f   : > { %13571 = vmatprep.mubr.f32.mxu1 %v16606_v21  ;;  %13532 = vmatprep.subr.mxu0 %v16652_v47  ;;  %v16833_v35 = vand.u32 4294901760, %v3936_v32 }
 0x330   : > { %13565 = vmatprep.subr.mxu1 %v16633_v38  ;;  %13533 = vmatpush3.msra.mxu0 %v16652_v47 }
 0x331   : > { %13566 = vmatpush3.msra.mxu1 %v16633_v38  ;;  %13534 = vmatprep.subr.mxu0 %v16663_v50  ;;  %v16843_v38 = vand.u32 4294901760, %v3935_v36  ;;  %v16848_v39 = vsub.f32 %v3936_v32, %v16833_v35 }
 0x332   : > { %13567 = vmatprep.subr.mxu1 %v16644_v45  ;;  %13535 = vmatpush3.msra.mxu0 %v16663_v50  ;;  %v16883_v50 = vsub.f32 %v3933_v42, %v16863_v46 }
 0x333   : > { %13568 = vmatpush3.msra.mxu1 %v16644_v45  ;;  %13536 = vmatprep.subr.mxu0 %v16673_v53  ;;  %v16861_v45 = vsub.f32 %v3935_v36, %v16843_v38  ;;  %v16868_v47 = vand.u32 4294901760, %v16848_v39 }
 0x334   : > { %13569 = vmatprep.subr.mxu1 %v16654_v48  ;;  %13537 = vmatpush3.msra.mxu0 %v16673_v53 }
 0x335   : > { %13570 = vmatpush3.msra.mxu1 %v16654_v48  ;;  %13539 = vmatmul.mubr.f32.vlgmr.msra.gmra.mxu0 %v16623_v34  ;;  %v16873_v48 = vsub.f32 %v3934_v37, %v16852_v43 }
 0x336   : > { %13552 = vmatprep.subr.mxu0 %v16658_v49  ;;  %13572 = vmatmul.mubr.f32.vlgmr.msra.gmra.mxu1 %v16614_v27 }
 0x337   : > { %13585 = vmatprep.subr.mxu1 %v3523_v14  ;;  %13553 = vmatpush3.msra.mxu0 %v16658_v49  ;;  %v16880_v49 = vand.u32 4294901760, %v16861_v45  ;;  %v16892_v53 = vand.u32 4294901760, %v16873_v48 }
 0x338   : > { %13560 = vmatprep.mubr.f32.mxu0 %v16606_v21  ;;  %13586 = vmatpush3.msra.mxu1 %v3523_v14  ;;  %v3477_v21 = vsub.f32 %v16796_v17, %v16809_v25 }
 0x339   : > { %13593 = vmatprep.mubr.f32.mxu1 %v16774_v10  ;;  %13554 = vmatprep.subr.mxu0 %v16670_v52  ;;  %v4068_v54 = vsub.f32 %v16861_v45, %v16880_v49 }
 0x33a   : > { %13587 = vmatprep.subr.mxu1 %v3530_v18  ;;  %13555 = vmatpush3.msra.mxu0 %v16670_v52  ;;  %v16829_v34 = vand.u32 4294901760, %v3477_v21  ;;  %v4061_v52 = vsub.f32 %v16848_v39, %v16868_v47 }
 0x33b   : > { %13588 = vmatpush3.msra.mxu1 %v3530_v18  ;;  %13556 = vmatprep.subr.mxu0 %v16682_v6  ;;  %v4069_v29 = vand.u32 4294901760, %v4068_v54 }
 0x33c   : > { %13589 = vmatprep.subr.mxu1 %v3537_v24  ;;  %13557 = vmatpush3.msra.mxu0 %v16682_v6  ;;  %v16901_v6 = vand.u32 4294901760, %v16883_v50  ;;  %v4062_v19 = vand.u32 4294901760, %v4061_v52 }
 0x33d   : > { %13590 = vmatpush3.msra.mxu1 %v3537_v24  ;;  %13558 = vmatprep.subr.mxu0 %v16691_v55 }
 0x33e   : > { %13591 = vmatprep.subr.mxu1 %v3544_v26  ;;  %13559 = vmatpush3.msra.mxu0 %v16691_v55  ;;  %v4075_v55 = vsub.f32 %v16873_v48, %v16892_v53  ;;  %v4082_v20 = vsub.f32 %v16883_v50, %v16901_v6 }
 0x33f   : > { %13592 = vmatpush3.msra.mxu1 %v3544_v26  ;;  %13561 = vmatmul.mubr.f32.vlgmr.msra.gmra.mxu0 %v16614_v27  ;;  %v3487_v27 = vsub.f32 %v16816_v31, %v16825_v33 }
 0x340   : > { %13574 = vmatprep.subr.mxu0 %v16719_v40  ;;  %13594 = vmatmul.mubr.f32.vlgmr.msra.gmra.mxu1 %v16805_v23  ;;  %v4076_v41 = vand.u32 4294901760, %v4075_v55  ;;  %v4083_v30 = vand.u32 4294901760, %v4082_v20  ;;  %v12476_v20 = vld [vmem:[%s19056_s18] ss:$0 sm:$0xff]  ;;  %s15923_s18 = smov 32  }
 0x341   : > { %13607 = vmatprep.subr.mxu1 %v16719_v40  ;;  %13575 = vmatpush3.msra.mxu0 %v16719_v40  ;;  %v16856_v44 = vand.u32 4294901760, %v3487_v27 }
 0x342   : > { %13582 = vmatprep.mubr.f32.mxu0 %v16829_v34  ;;  %13608 = vmatpush3.msra.mxu1 %v16719_v40 }
 0x343   : > { %13615 = vmatprep.mubr.f32.mxu1 %v16809_v25  ;;  %13576 = vmatprep.subr.mxu0 %v16727_v59 }
 0x344   : > { %13609 = vmatprep.subr.mxu1 %v16727_v59  ;;  %13577 = vmatpush3.msra.mxu0 %v16727_v59 }
 0x345   : > { %13610 = vmatpush3.msra.mxu1 %v16727_v59  ;;  %13578 = vmatprep.subr.mxu0 %v16736_v62 }
 0x346   : > { %13611 = vmatprep.subr.mxu1 %v16736_v62  ;;  %13579 = vmatpush3.msra.mxu0 %v16736_v62 }
 0x347   : > { %13612 = vmatpush3.msra.mxu1 %v16736_v62  ;;  %13580 = vmatprep.subr.mxu0 %v16745_v1 }
 0x348   : > { %13613 = vmatprep.subr.mxu1 %v16745_v1  ;;  %13581 = vmatpush3.msra.mxu0 %v16745_v1 }
 0x349   : > { %13614 = vmatpush3.msra.mxu1 %v16745_v1  ;;  %13583 = vmatmul.mubr.f32.vlgmr.msra.gmra.mxu0 %v16856_v44 }
 0x34a   : > { %13596 = vmatprep.subr.mxu0 %v16732_v60  ;;  %13616 = vmatmul.mubr.f32.vlgmr.msra.gmra.mxu1 %v16825_v33 }
 0x34b   : > { %13629 = vmatprep.subr.mxu1 %v16719_v40  ;;  %13597 = vmatpush3.msra.mxu0 %v16732_v60  ;;  %v16992_v60 = vsub.f32 %v4492_v28, %v16983_v51 }
 0x34c   : > { %13604 = vmatprep.mubr.f32.mxu0 %v16796_v17  ;;  %13630 = vmatpush3.msra.mxu1 %v16719_v40  ;;  %v16981_v40 = vsub.f32 %v4493_v56, %v16977_v57 }
 0x34d   : > { %13637 = vmatprep.mubr.f32.mxu1 %v16774_v10  ;;  %13598 = vmatprep.subr.mxu0 %v16743_v0 }
 0x34e   : > { %13631 = vmatprep.subr.mxu1 %v16727_v59  ;;  %13599 = vmatpush3.msra.mxu0 %v16743_v0  ;;  %v17002_v0 = vand.u32 4294901760, %v16992_v60 }
 0x34f   : > { %13632 = vmatpush3.msra.mxu1 %v16727_v59  ;;  %13600 = vmatprep.subr.mxu0 %v16755_v5  ;;  %v16989_v59 = vand.u32 4294901760, %v16981_v40 }
 0x350   : > { %13633 = vmatprep.subr.mxu1 %v16736_v62  ;;  %13601 = vmatpush3.msra.mxu0 %v16755_v5  ;;  %v4489_v5 = vld [vmem:[%s19055_s5 + $0x18] sm:$0xff] }
 0x351   : > { %13634 = vmatpush3.msra.mxu1 %v16736_v62  ;;  %13602 = vmatprep.subr.mxu0 %v16766_v8  ;;  %v4490_v62 = vld [vmem:[%s19055_s5 + $0x20] sm:$0xff]  ;;  %v4621_v63 = vsub.f32 %v16981_v40, %v16989_v59 }
 0x352   : > { %13635 = vmatprep.subr.mxu1 %v16745_v1  ;;  %13603 = vmatpush3.msra.mxu0 %v16766_v8 }
 0x353   : > { %13636 = vmatpush3.msra.mxu1 %v16745_v1  ;;  %13605 = vmatmul.mubr.f32.vlgmr.msra.gmra.mxu0 %v16816_v31  ;;  %v17005_v1 = vsub.f32 %v4491_v58, %v16994_v61  ;;  %v4622_v3 = vand.u32 4294901760, %v4621_v63 }
 0x354   : > { %13618 = vmatprep.subr.mxu0 %v16750_v2  ;;  %13638 = vmatmul.mubr.f32.vlgmr.msra.gmra.mxu1 %v16805_v23 }
 0x355   : > { %13651 = vmatprep.subr.mxu1 %v4062_v19  ;;  %13619 = vmatpush3.msra.mxu0 %v16750_v2  ;;  %v17007_v2 = vand.u32 4294901760, %v4490_v62  ;;  %v17015_v8 = vand.u32 4294901760, %v17005_v1 }
 0x356   : > { %13626 = vmatprep.mubr.f32.mxu0 %v16774_v10  ;;  %13652 = vmatpush3.msra.mxu1 %v4062_v19 }
 0x357   : > { %13659 = vmatprep.mubr.f32.mxu1 %v16774_v10  ;;  %13620 = vmatprep.subr.mxu0 %v16763_v7  ;;  %v17019_v9 = vsub.f32 %v4490_v62, %v17007_v2  ;;  %v4635_v12 = vsub.f32 %v17005_v1, %v17015_v8 }
 0x358   : > { %13653 = vmatprep.subr.mxu1 %v4069_v29  ;;  %13621 = vmatpush3.msra.mxu0 %v16763_v7  ;;  %v4628_v7 = vsub.f32 %v16992_v60, %v17002_v0 }
 0x359   : > { %13654 = vmatpush3.msra.mxu1 %v4069_v29  ;;  %13622 = vmatprep.subr.mxu0 %v16777_v11  ;;  %v17030_v14 = vand.u32 4294901760, %v17019_v9 }
 0x35a   : > { %13655 = vmatprep.subr.mxu1 %v4076_v41  ;;  %13623 = vmatpush3.msra.mxu0 %v16777_v11  ;;  %v4488_v11 = vld [vmem:[%s19055_s5 + $0x10] sm:$0xff]  ;;  %v4629_v4 = vand.u32 4294901760, %v4628_v7 }
 0x35b   : > { %13656 = vmatpush3.msra.mxu1 %v4076_v41  ;;  %13624 = vmatprep.subr.mxu0 %v16786_v13 }
 0x35c   : > { %13657 = vmatprep.subr.mxu1 %v4083_v30  ;;  %13625 = vmatpush3.msra.mxu0 %v16786_v13  ;;  %v17027_v13 = vand.u32 4294901760, %v4488_v11 }
 0x35d   : > { %13658 = vmatpush3.msra.mxu1 %v4083_v30  ;;  %13627 = vmatmul.mubr.f32.vlgmr.msra.gmra.mxu0 %v16805_v23 }
 0x35e   : > { %13640 = vmatprep.subr.mxu0 %v16833_v35  ;;  %13660 = vmatmul.mubr.f32.vlgmr.msra.gmra.mxu1 %v16805_v23  ;;  %v17038_v18 = vsub.f32 %v4488_v11, %v17027_v13 }
 0x35f   : > { %13673 = vmatprep.subr.mxu1 %v16833_v35  ;;  %13641 = vmatpush3.msra.mxu0 %v16833_v35 }
 0x360   : > { %13648 = vmatprep.mubr.f32.mxu0 %v16829_v34  ;;  %13674 = vmatpush3.msra.mxu1 %v16833_v35  ;;  %v17051_v26 = vand.u32 4294901760, %v17038_v18 }
 0x361   : > { %13681 = vmatprep.mubr.f32.mxu1 %v16809_v25  ;;  %13642 = vmatprep.subr.mxu0 %v16843_v38  ;;  %v4486_v25 = vld [vmem:[%s19055_s5] sm:$0xff] }
 0x362   : > { %13675 = vmatprep.subr.mxu1 %v16843_v38  ;;  %13643 = vmatpush3.msra.mxu0 %v16843_v38  ;;  %v17056_v21 = vand.u32 4294901760, %v4486_v25  ;;  %v4656_v34 = vsub.f32 %v17038_v18, %v17051_v26 }
 0x363   : > { %13676 = vmatpush3.msra.mxu1 %v16843_v38  ;;  %13644 = vmatprep.subr.mxu0 %v16852_v43 }
 0x364   : > { %13677 = vmatprep.subr.mxu1 %v16852_v43  ;;  %13645 = vmatpush3.msra.mxu0 %v16852_v43  ;;  %v17068_v36 = vsub.f32 %v4486_v25, %v17056_v21  ;;  %v4657_v37 = vand.u32 4294901760, %v4656_v34 }
 0x365   : > { %13678 = vmatpush3.msra.mxu1 %v16852_v43  ;;  %13646 = vmatprep.subr.mxu0 %v16863_v46 }
 0x366   : > { %13679 = vmatprep.subr.mxu1 %v16863_v46  ;;  %13647 = vmatpush3.msra.mxu0 %v16863_v46 }
 0x367   : > { %13680 = vmatpush3.msra.mxu1 %v16863_v46  ;;  %13649 = vmatmul.mubr.f32.vlgmr.msra.gmra.mxu0 %v16856_v44 }
 0x368   : > { %13662 = vmatprep.subr.mxu0 %v16848_v39  ;;  %13682 = vmatmul.mubr.f32.vlgmr.msra.gmra.mxu1 %v16825_v33 }
 0x369   : > { %13695 = vmatprep.subr.mxu1 %v16833_v35  ;;  %13663 = vmatpush3.msra.mxu0 %v16848_v39  ;;  %v17075_v39 = vand.u32 4294901760, %v17068_v36 }
 0x36a   : > { %13670 = vmatprep.mubr.f32.mxu0 %v16796_v17  ;;  %13696 = vmatpush3.msra.mxu1 %v16833_v35  ;;  %v4636_v17 = vand.u32 4294901760, %v4635_v12 }
 0x36b   : > { %13703 = vmatprep.mubr.f32.mxu1 %v16774_v10  ;;  %13664 = vmatprep.subr.mxu0 %v16861_v45 }
 0x36c   : > { %13697 = vmatprep.subr.mxu1 %v16843_v38  ;;  %13665 = vmatpush3.msra.mxu0 %v16861_v45 }
 0x36d   : > { %13698 = vmatpush3.msra.mxu1 %v16843_v38  ;;  %13666 = vmatprep.subr.mxu0 %v16873_v48 }
 0x36e   : > { %13699 = vmatprep.subr.mxu1 %v16852_v43  ;;  %13667 = vmatpush3.msra.mxu0 %v16873_v48 }
 0x36f   : > { %13700 = vmatpush3.msra.mxu1 %v16852_v43  ;;  %13668 = vmatprep.subr.mxu0 %v16883_v50  ;;  %v4670_v43 = vsub.f32 %v17068_v36, %v17075_v39 }
 0x370   : > { %13701 = vmatprep.subr.mxu1 %v16863_v46  ;;  %13669 = vmatpush3.msra.mxu0 %v16883_v50 }
 0x371   : > { %13702 = vmatpush3.msra.mxu1 %v16863_v46  ;;  %13671 = vmatmul.mubr.f32.vlgmr.msra.gmra.mxu0 %v16816_v31  ;;  %v17054_v31 = vsub.f32 %v4487_v16, %v17040_v22  ;;  %v4671_v44 = vand.u32 4294901760, %v4670_v43 }
 0x372   : > { %13684 = vmatprep.subr.mxu0 %v16868_v47  ;;  %13704 = vmatmul.mubr.f32.vlgmr.msra.gmra.mxu1 %v16805_v23 }
 0x373   : > { %13685 = vmatpush3.msra.mxu0 %v16868_v47  ;;  %13692 = vmatprep.mubr.f32.mxu0 %v16774_v10  ;;  %v17021_v10 = vand.u32 4294901760, %v4489_v5  ;;  %v17065_v35 = vand.u32 4294901760, %v17054_v31 }
 0x374   : > { %13686 = vmatprep.subr.mxu0 %v16880_v49  ;;  %13725 = vmatprep.subr.mxu1 %v4622_v3 }
 0x375   : > { %13687 = vmatpush3.msra.mxu0 %v16880_v49  ;;  %13726 = vmatpush3.msra.mxu1 %v4622_v3  ;;  %v17033_v15 = vsub.f32 %v4489_v5, %v17021_v10  ;;  %v4663_v38 = vsub.f32 %v17054_v31, %v17065_v35 }
 0x376   : > { %13688 = vmatprep.subr.mxu0 %v16892_v53  ;;  %13727 = vmatprep.subr.mxu1 %v4629_v4 }
 0x377   : > { %13689 = vmatpush3.msra.mxu0 %v16892_v53  ;;  %13728 = vmatpush3.msra.mxu1 %v4629_v4  ;;  %v17046_v24 = vand.u32 4294901760, %v17033_v15  ;;  %v4664_v42 = vand.u32 4294901760, %v4663_v38 }
 0x378   : > { %13690 = vmatprep.subr.mxu0 %v16901_v6  ;;  %13729 = vmatprep.subr.mxu1 %v4636_v17 }
 0x379   : > { %13691 = vmatpush3.msra.mxu0 %v16901_v6  ;;  %13730 = vmatpush3.msra.mxu1 %v4636_v17  ;;  %v4649_v33 = vsub.f32 %v17033_v15, %v17046_v24 }
 0x37a   : > { %13693 = vmatmul.mubr.f32.vlgmr.msra.gmra.mxu0 %v16805_v23  ;;  %13706 = vmatprep.subr.mxu0 %v16977_v57  ;;  %v4642_v23 = vsub.f32 %v17019_v9, %v17030_v14 }
 0x37b   : > { %13707 = vmatpush3.msra.mxu0 %v16977_v57  ;;  %v4650_v27 = vand.u32 4294901760, %v4649_v33 }
 0x37c   : > { %13708 = vmatprep.subr.mxu0 %v16983_v51  ;;  %v4643_v32 = vand.u32 4294901760, %v4642_v23 }
 0x37d   : > { %13709 = vmatpush3.msra.mxu0 %v16983_v51 }
 0x37e   : > { %13710 = vmatprep.subr.mxu0 %v16994_v61  ;;  %13731 = vmatprep.subr.mxu1 %v4643_v32 }
 0x37f   : > { %13711 = vmatpush3.msra.mxu0 %v16994_v61  ;;  %13732 = vmatpush3.msra.mxu1 %v4643_v32 }
 0x380   : > { %13712 = vmatprep.subr.mxu0 %v17007_v2  ;;  %13733 = vmatprep.subr.mxu1 %v4650_v27 }
 0x381   : > { %13713 = vmatpush3.msra.mxu0 %v17007_v2  ;;  %13734 = vmatpush3.msra.mxu1 %v4650_v27 }
 0x382   : > { %13714 = vmatprep.subr.mxu0 %v17021_v10  ;;  %13735 = vmatprep.subr.mxu1 %v4657_v37 }
 0x383   : > { %13715 = vmatpush3.msra.mxu0 %v17021_v10  ;;  %13736 = vmatpush3.msra.mxu1 %v4657_v37 }
 0x384   : > { %13716 = vmatprep.subr.mxu0 %v17027_v13  ;;  %13737 = vmatprep.subr.mxu1 %v4664_v42 }
 0x385   : > { %13717 = vmatpush3.msra.mxu0 %v17027_v13  ;;  %13738 = vmatpush3.msra.mxu1 %v4664_v42 }
 0x386   : > { %13718 = vmatprep.subr.mxu0 %v17040_v22  ;;  %13739 = vmatprep.subr.mxu1 %v4671_v44 }
 0x387   : > { %13719 = vmatpush3.msra.mxu0 %v17040_v22  ;;  %13740 = vmatpush3.msra.mxu1 %v4671_v44  ;;  %v12475_v44 = vld [vmem:[%s19057_s3] ss:$0 sm:$0xff]  ;;  %s15924_s3 = smov 48  }
 0x388   : > { %13720 = vmatprep.subr.mxu0 %v17056_v21  ;;  %13763 = vmatprep.subr.mxu1 %v16977_v57 }
 0x389   : > { %13721 = vmatpush3.msra.mxu0 %v17056_v21 }
 0x38a   : > { %13744 = vmatprep.subr.mxu0 %v16981_v40 }
 0x3c6   : > { %v13463_v46 = vpop.f32.mrf.mxu1 }
 0x3c8   : > { %v2483_v49 = vpop.f32.mrf.mxu1 }
 0x3ce   : > { %v13485_v50 = vpop.f32.mrf.mxu1 }
 0x3cf   : > { %v13452_v45 = vpop.f32.mrf.mxu0 }
 0x3d0   : > { %v2653_v54 = vpop.f32.mrf.mxu1 }
 0x3d1   : > { %v2382_v47 = vpop.f32.mrf.mxu0 }
 0x3d7   : > { %v13474_v48 = vpop.f32.mrf.mxu0 }
 0x3d8   : > { %v13507_v6 = vpop.f32.mrf.mxu1 }
 0x3d9   : > { %v2569_v52 = vpop.f32.mrf.mxu0 }
 0x3da   : > { %v2825_v29 = vpop.f32.mrf.mxu1 }
 0x3e1   : > { %v13496_v53 = vpop.f32.mrf.mxu0 }
 0x3e2   : > { %v13529_v41 = vpop.f32.mrf.mxu1 }
 0x3e3   : > { %v2744_v19 = vpop.f32.mrf.mxu0 }
 0x3e4   : > { %v3022_v62 = vpop.f32.mrf.mxu1 }
 0x3eb   : > { %v13518_v55 = vpop.f32.mrf.mxu0 }
 0x3ec   : > { %v2932_v56 = vadd.f32 %v13518_v55, %v12476_v20  ;;  %v13551_v5 = vpop.f32.mrf.mxu1  ;;  %v2393_v55 = vadd.f32 %v13452_v45, %v12475_v44 }
 0x3ed   : > { %v2921_v30 = vpop.f32.mrf.mxu0 }
 0x3ee   : > { %v2922_v58 = vadd.f32 %v12476_v20, %v2921_v30  ;;  %v3029_v63 = vadd.f32 %v13529_v41, %v2932_v56  ;;  %v3192_v12 = vpop.f32.mrf.mxu1  ;;  %v2383_v41 = vadd.f32 %v12475_v44, %v2382_v47 }
 0x3f0   : > { %v3023_v11 = vadd.f32 %v3022_v62, %v2922_v58 }
 0x3f5   : > { %v13540_v28 = vpop.f32.mrf.mxu0 }
 0x3f6   : > { %v3116_v7 = vadd.f32 %v13540_v28, %v3029_v63  ;;  %v13573_v17 = vpop.f32.mrf.mxu1  ;;  %v2490_v28 = vadd.f32 %v13463_v46, %v2393_v55  ;;  %v2484_v63 = vadd.f32 %v2483_v49, %v2383_v41 }
 0x3f7   : > { %v3108_v3 = vpop.f32.mrf.mxu0 }
 0x3f8   : > { %v3109_v4 = vadd.f32 %v3108_v3, %v3023_v11  ;;  %v3201_v16 = vadd.f32 %v13551_v5, %v3116_v7  ;;  %v3364_v37 = vpop.f32.mrf.mxu1  ;;  %v2577_v62 = vadd.f32 %v13474_v48, %v2490_v28  ;;  %v2570_v5 = vadd.f32 %v2569_v52, %v2484_v63 }
 0x3fa   : > { %v3193_v32 = vadd.f32 %v3192_v12, %v3109_v4  ;;  %v2662_v3 = vadd.f32 %v13485_v50, %v2577_v62  ;;  %v2654_v11 = vadd.f32 %v2653_v54, %v2570_v5 }
 0x3fc   : > { %v2751_v7 = vadd.f32 %v13496_v53, %v2662_v3  ;;  %v2745_v4 = vadd.f32 %v2744_v19, %v2654_v11  ;;  %v5094_v3 = vld [vmem:[#allocation15 + $0x30] sm:$0xff] }
 0x3fe   : > { %v2826_v45 = vadd.f32 %v2825_v29, %v2745_v4 }
 0x3ff   : > { %v13562_v23 = vpop.f32.mrf.mxu0 }
 0x400   : > { %v3290_v25 = vadd.f32 %v13562_v23, %v3201_v16  ;;  %v2832_v16 = vadd.f32 %v13507_v6, %v2751_v7  ;;  %v17089_v49 = vpop.f32.mrf.mxu1 }
 0x401   : > { %v3283_v33 = vpop.f32.mrf.mxu0 }
 0x402   : > { %v3371_v34 = vadd.f32 %v13573_v17, %v3290_v25  ;;  %v3284_v27 = vadd.f32 %v3283_v33, %v3193_v32  ;;  %v17101_v19 = vpop.f32.mrf.mxu1 }
 0x404   : > { %v12478_v38 = vmul.f32 -1.442695, %v3371_v34  ;;  %v3365_v42 = vadd.f32 %v3364_v37, %v3284_v27 }
 0x406   : > { %15163 = vpow2.f32 %v12478_v38  ;;  %v12477_v43 = vmul.f32 -1.442695, %v3365_v42 }
 0x408   : > { %15165 = vpow2.f32 %v12477_v43 }
 0x409   : > { %v17084_v12 = vpop.f32.mrf.mxu0 }
 0x40a   : > { %v17113_v34 = vpop.f32.mrf.mxu1 }
 0x40b   : > { %v17086_v25 = vpop.f32.mrf.mxu0 }
 0x40c   : > { %v17129_v43 = vpop.f32.mrf.mxu1 }
 0x413   : > { %v15164_v20 = vpop.eup %15163  ;;  %v17091_v52 = vpop.f32.mrf.mxu0 }
 0x414   : > { %v3381_v30 = vadd.f32 1.0, %v15164_v20  ;;  %v17139_v41 = vpop.f32.mrf.mxu1 }
 0x415   : > { %v15166_v56 = vpop.eup %15165  ;;  %v17103_v29 = vpop.f32.mrf.mxu0 }
 0x416   : > { %15167 = vrcp.f32 %v3381_v30  ;;  %v3380_v58 = vadd.f32 1.0, %v15166_v56  ;;  %v17151_v56 = vpop.f32.mrf.mxu1 }
 0x418   : > { %15169 = vrcp.f32 %v3380_v58  ;;  %v5095_v58 = vld [vmem:[#allocation15 + $0x38] sm:$0xff] }
 0x41d   : > { %v17115_v27 = vpop.f32.mrf.mxu0 }
 0x41e   : > { %v17157_v62 = vpop.f32.mrf.mxu1 }
 0x41f   : > { %v17131_v44 = vpop.f32.mrf.mxu0 }
 0x420   : > { %v4120_v7 = vpop.f32.mrf.mxu1 }
 0x423   : > { %v15168_v17 = vpop.eup %15167 }
 0x424   : > { %v3387_v47 = vmul.f32 %v15168_v17, %v2832_v16 }
 0x425   : > { %v15170_v23 = vpop.eup %15169 }
 0x426   : > { %v4506_v46 = vsel %vm4501_vm6, %v3387_v47, 0  ;;  %v3386_v48 = vmul.f32 %v15170_v23, %v2826_v45  ;;  %v5092_v47 = vld [vmem:[#allocation15 + $0x20] sm:$0xff] }
 0x427   : > { %v17093_v50 = vand.u32 4294901760, %v4506_v46  ;;  %v17141_v30 = vpop.f32.mrf.mxu0 }
 0x428   : > { %v4503_v53 = vsel %vm4501_vm6, %v3386_v48, 0  ;;  %v17180_v16 = vpop.f32.mrf.mxu1  ;;  %v17200_v48 = vand.u32 4294901760, %v5092_v47 }
 0x429   : > { %v17096_v54 = vand.u32 4294901760, %v4503_v53  ;;  %v17099_v6 = vsub.f32 %v4506_v46, %v17093_v50  ;;  %v4019_v28 = vpop.f32.mrf.mxu0 }
 0x42b   : > { %13741 = vmatprep.mubr.f32.mxu1 %v17096_v54  ;;  %v17107_v32 = vsub.f32 %v4503_v53, %v17096_v54  ;;  %v17110_v33 = vand.u32 4294901760, %v17099_v6  ;;  %v4290_v53 = vpop.f32.mrf.mxu1 }
 0x42c   : > { %13742 = vmatmul.mubr.f32.vlgmr.msra.gmra.mxu1 %v17093_v50 }
 0x42d   : > { %13764 = vmatpush3.msra.mxu1 %v16977_v57  ;;  %v17119_v37 = vand.u32 4294901760, %v17107_v32  ;;  %v4594_v38 = vsub.f32 %v17099_v6, %v17110_v33 }
 0x42e   : > { %13765 = vmatprep.subr.mxu1 %v16983_v51 }
 0x42f   : > { %13766 = vmatpush3.msra.mxu1 %v16983_v51  ;;  %13779 = vmatprep.mubr.f32.mxu1 %v17119_v37  ;;  %v4584_v42 = vsub.f32 %v17107_v32, %v17119_v37  ;;  %v17137_v20 = vand.u32 4294901760, %v4594_v38 }
 0x430   : > { %13767 = vmatprep.subr.mxu1 %v16994_v61 }
 0x431   : > { %13768 = vmatpush3.msra.mxu1 %v16994_v61  ;;  %v17134_v55 = vand.u32 4294901760, %v4584_v42  ;;  %v17161_v63 = vpop.f32.mrf.mxu0 }
 0x432   : > { %13769 = vmatprep.subr.mxu1 %v17007_v2 }
 0x433   : > { %13770 = vmatpush3.msra.mxu1 %v17007_v2  ;;  %13722 = vmatprep.mubr.f32.mxu0 %v17134_v55  ;;  %v4206_v11 = vpop.f32.mrf.mxu0 }
 0x434   : > { %13771 = vmatprep.subr.mxu1 %v17021_v10  ;;  %13723 = vmatmul.mubr.f32.vlgmr.msra.gmra.mxu0 %v17137_v20 }
 0x435   : > { %13745 = vmatpush3.msra.mxu0 %v16981_v40  ;;  %13772 = vmatpush3.msra.mxu1 %v17021_v10  ;;  %v17159_v40 = vld [vmem:[#allocation13] ss:$0 sm:$0xff] }
 0x436   : > { %13746 = vmatprep.subr.mxu0 %v16992_v60  ;;  %13760 = vmatprep.mubr.f32.mxu0 %v17107_v32  ;;  %v4020_v5 = vadd.f32 %v17159_v40, %v4019_v28  ;;  %v5090_v28 = vld [vmem:[#allocation15 + $0x10] sm:$0xff] }
 0x437   : > { %13773 = vmatprep.subr.mxu1 %v17027_v13  ;;  %13747 = vmatpush3.msra.mxu0 %v16992_v60  ;;  %v17170_v60 = vand.u32 4294901760, %v5095_v58 }
 0x438   : > { %13774 = vmatpush3.msra.mxu1 %v17027_v13  ;;  %13748 = vmatprep.subr.mxu0 %v17005_v1  ;;  %v4121_v4 = vadd.f32 %v4120_v7, %v4020_v5  ;;  %v17230_v7 = vand.u32 4294901760, %v5090_v28 }
 0x439   : > { %13775 = vmatprep.subr.mxu1 %v17040_v22  ;;  %13749 = vmatpush3.msra.mxu0 %v17005_v1  ;;  %v5093_v1 = vld [vmem:[#allocation15 + $0x28] sm:$0xff]  ;;  %v17187_v45 = vsub.f32 %v5095_v58, %v17170_v60  ;;  %v17214_v58 = vpop.f32.mrf.mxu1 }
 0x43a   : > { %13776 = vmatpush3.msra.mxu1 %v17040_v22  ;;  %13750 = vmatprep.subr.mxu0 %v17019_v9  ;;  %v17182_v17 = vpop.f32.mrf.mxu0  ;;  %v4207_v23 = vadd.f32 %v4206_v11, %v4121_v4  ;;  %v5088_v4 = vld [vmem:[#allocation15] sm:$0xff] }
 0x43b   : > { %13777 = vmatprep.subr.mxu1 %v17056_v21  ;;  %13751 = vmatpush3.msra.mxu0 %v17019_v9  ;;  %v17178_v9 = vand.u32 4294901760, %v5094_v3 }
 0x43c   : > { %13778 = vmatpush3.msra.mxu1 %v17056_v21  ;;  %13752 = vmatprep.subr.mxu0 %v17033_v15  ;;  %v4381_v38 = vpop.f32.mrf.mxu0 }
 0x43d   : > { %13780 = vmatmul.mubr.f32.vlgmr.msra.gmra.mxu1 %v17110_v33  ;;  %13801 = vmatprep.subr.mxu1 %v16977_v57  ;;  %v17198_v46 = vsub.f32 %v5094_v3, %v17178_v9  ;;  %v5089_v3 = vld [vmem:[#allocation15 + $0x8] sm:$0xff] }
 0x43e   : > { %13753 = vmatpush3.msra.mxu0 %v17033_v15  ;;  %13802 = vmatpush3.msra.mxu1 %v16977_v57  ;;  %v17191_v57 = vand.u32 4294901760, %v5093_v1  ;;  %v5091_v15 = vld [vmem:[#allocation15 + $0x18] sm:$0xff] }
 0x43f   : > { %13817 = vmatprep.mubr.f32.mxu1 %v17096_v54  ;;  %13754 = vmatprep.subr.mxu0 %v17038_v18  ;;  %v17212_v42 = vand.u32 4294901760, %v5091_v15  ;;  %v17221_v5 = vand.u32 4294901760, %v17198_v46 }
 0x440   : > { %13803 = vmatprep.subr.mxu1 %v16983_v51  ;;  %13755 = vmatpush3.msra.mxu0 %v17038_v18  ;;  %v4291_v18 = vadd.f32 %v4290_v53, %v4207_v23  ;;  %v4030_v23 = vadd.f32 %v17141_v30, %v17159_v40  ;;  %v17258_v30 = vand.u32 4294901760, %v5088_v4 }
 0x441   : > { %13804 = vmatpush3.msra.mxu1 %v16983_v51  ;;  %13756 = vmatprep.subr.mxu0 %v17054_v31  ;;  %v17205_v51 = vand.u32 4294901760, %v17187_v45 }
 0x442   : > { %13805 = vmatprep.subr.mxu1 %v16994_v61  ;;  %13757 = vmatpush3.msra.mxu0 %v17054_v31  ;;  %v17210_v31 = vsub.f32 %v5093_v1, %v17191_v57  ;;  %v17238_v1 = vsub.f32 %v5091_v15, %v17212_v42  ;;  %v5223_v15 = vsub.f32 %v17198_v46, %v17221_v5 }
 0x443   : > { %13806 = vmatpush3.msra.mxu1 %v16994_v61  ;;  %13758 = vmatprep.subr.mxu0 %v17068_v36  ;;  %v4382_v61 = vadd.f32 %v4381_v38, %v4291_v18  ;;  %v17256_v38 = vsub.f32 %v5090_v28, %v17230_v7  ;;  %v4127_v18 = vadd.f32 %v17157_v62, %v4030_v23 }
 0x444   : > { %13807 = vmatprep.subr.mxu1 %v17007_v2  ;;  %13759 = vmatpush3.msra.mxu0 %v17068_v36  ;;  %v17224_v36 = vsub.f32 %v5092_v47, %v17200_v48  ;;  %v17235_v11 = vand.u32 4294901760, %v17210_v31  ;;  %v4462_v47 = vpop.f32.mrf.mxu1  ;;  %v17265_v40 = vand.u32 4294901760, %v17238_v1 }
 0x445   : > { %13808 = vmatpush3.msra.mxu1 %v17007_v2  ;;  %13761 = vmatmul.mubr.f32.vlgmr.msra.gmra.mxu0 %v17099_v6  ;;  %v5216_v2 = vsub.f32 %v17187_v45, %v17205_v51  ;;  %v4214_v62 = vadd.f32 %v17161_v63, %v4127_v18  ;;  %v12479_v18 = vld [vmem:[#allocation10] ss:$0 sm:$0xff] }
 0x446   : > { %13782 = vmatprep.subr.mxu0 %v16989_v59  ;;  %13809 = vmatprep.subr.mxu1 %v17021_v10  ;;  %v17251_v53 = vand.u32 4294901760, %v17224_v36 }
 0x447   : > { %13783 = vmatpush3.msra.mxu0 %v16989_v59  ;;  %13798 = vmatprep.mubr.f32.mxu0 %v17096_v54  ;;  %v17242_v59 = vand.u32 4294901760, %v5089_v3  ;;  %v4299_v23 = vadd.f32 %v17180_v16, %v4214_v62 }
 0x448   : > { %13810 = vmatpush3.msra.mxu1 %v17021_v10  ;;  %13784 = vmatprep.subr.mxu0 %v17002_v0  ;;  %v4463_v10 = vadd.f32 %v4462_v47, %v4382_v61  ;;  %v5237_v61 = vsub.f32 %v17224_v36, %v17251_v53 }
 0x449   : > { %13811 = vmatprep.subr.mxu1 %v17027_v13  ;;  %13785 = vmatpush3.msra.mxu0 %v17002_v0  ;;  %v5217_v0 = vand.u32 4294901760, %v5216_v2  ;;  %v17279_v2 = vand.u32 4294901760, %v17256_v38 }
 0x44a   : > { %13812 = vmatpush3.msra.mxu1 %v17027_v13  ;;  %13786 = vmatprep.subr.mxu0 %v17015_v8  ;;  %v5230_v13 = vsub.f32 %v17210_v31, %v17235_v11  ;;  %v12481_v28 = vmul.f32 -1.442695, %v4463_v10 }
 0x44b   : > { %13813 = vmatprep.subr.mxu1 %v17040_v22  ;;  %13787 = vmatpush3.msra.mxu0 %v17015_v8  ;;  %v17270_v8 = vsub.f32 %v5089_v3, %v17242_v59  ;;  %v5244_v3 = vsub.f32 %v17238_v1, %v17265_v40 }
 0x44c   : > { %13814 = vmatpush3.msra.mxu1 %v17040_v22  ;;  %13788 = vmatprep.subr.mxu0 %v17030_v14  ;;  %v5224_v22 = vand.u32 4294901760, %v5223_v15  ;;  %15171 = vpow2.f32 %v12481_v28  ;;  %v4388_v15 = vadd.f32 %v17182_v17, %v4299_v23  ;;  %v3481_v28 = vadd.f32 %v12479_v18, %v17086_v25 }
 0x44d   : > { %13815 = vmatprep.subr.mxu1 %v17056_v21  ;;  %13789 = vmatpush3.msra.mxu0 %v17030_v14  ;;  %v17282_v14 = vsub.f32 %v5088_v4, %v17258_v30  ;;  %v17291_v47 = vand.u32 4294901760, %v17270_v8  ;;  %v5238_v4 = vand.u32 4294901760, %v5237_v61  ;;  %v5245_v10 = vand.u32 4294901760, %v5244_v3 }
 0x44e   : > { %13816 = vmatpush3.msra.mxu1 %v17056_v21  ;;  %13790 = vmatprep.subr.mxu0 %v17046_v24  ;;  %v5231_v21 = vand.u32 4294901760, %v5230_v13  ;;  %v4469_v17 = vadd.f32 %v17214_v58, %v4388_v15 }
 0x44f   : > { %13818 = vmatmul.mubr.f32.vlgmr.msra.gmra.mxu1 %v17093_v50  ;;  %13839 = vmatprep.subr.mxu1 %v5217_v0  ;;  %v17298_v63 = vand.u32 4294901760, %v17282_v14 }
 0x450   : > { %13791 = vmatpush3.msra.mxu0 %v17046_v24  ;;  %13840 = vmatpush3.msra.mxu1 %v5217_v0  ;;  %v5251_v24 = vsub.f32 %v17256_v38, %v17279_v2  ;;  %v12482_v13 = vmul.f32 -1.442695, %v4469_v17 }
 0x451   : > { %13855 = vmatprep.mubr.f32.mxu1 %v17096_v54  ;;  %13792 = vmatprep.subr.mxu0 %v17051_v26  ;;  %v5265_v16 = vsub.f32 %v17282_v14, %v17298_v63 }
 0x452   : > { %13841 = vmatprep.subr.mxu1 %v5224_v22  ;;  %13793 = vmatpush3.msra.mxu0 %v17051_v26  ;;  %v5258_v26 = vsub.f32 %v17270_v8, %v17291_v47  ;;  %v5252_v0 = vand.u32 4294901760, %v5251_v24  ;;  %15173 = vpow2.f32 %v12482_v13  ;;  %v5699_v24 = vld [vmem:[#allocation16 + $0x10] sm:$0xff] }
 0x453   : > { %13842 = vmatpush3.msra.mxu1 %v5224_v22  ;;  %13794 = vmatprep.subr.mxu0 %v17065_v35 }
 0x454   : > { %13843 = vmatprep.subr.mxu1 %v5231_v21  ;;  %13795 = vmatpush3.msra.mxu0 %v17065_v35  ;;  %v5259_v35 = vand.u32 4294901760, %v5258_v26 }
 0x455   : > { %13844 = vmatpush3.msra.mxu1 %v5231_v21  ;;  %13796 = vmatprep.subr.mxu0 %v17075_v39 }
 0x456   : > { %13845 = vmatprep.subr.mxu1 %v5238_v4  ;;  %13797 = vmatpush3.msra.mxu0 %v17075_v39  ;;  %v5266_v39 = vand.u32 4294901760, %v5265_v16 }
 0x457   : > { %13846 = vmatpush3.msra.mxu1 %v5238_v4  ;;  %13799 = vmatmul.mubr.f32.vlgmr.msra.gmra.mxu0 %v17093_v50 }
 0x458   : > { %13820 = vmatprep.subr.mxu0 %v17170_v60  ;;  %13847 = vmatprep.subr.mxu1 %v5245_v10 }
 0x459   : > { %13821 = vmatpush3.msra.mxu0 %v17170_v60  ;;  %13836 = vmatprep.mubr.f32.mxu0 %v17134_v55  ;;  %v15172_v55 = vpop.eup %15171 }
 0x45a   : > { %13848 = vmatpush3.msra.mxu1 %v5245_v10  ;;  %13822 = vmatprep.subr.mxu0 %v17178_v9  ;;  %v4478_v58 = vadd.f32 1.0, %v15172_v55 }
 0x45b   : > { %13849 = vmatprep.subr.mxu1 %v5252_v0  ;;  %13823 = vmatpush3.msra.mxu0 %v17178_v9 }
 0x45c   : > { %13850 = vmatpush3.msra.mxu1 %v5252_v0  ;;  %13824 = vmatprep.subr.mxu0 %v17191_v57  ;;  %15175 = vrcp.f32 %v4478_v58 }
 0x45d   : > { %13851 = vmatprep.subr.mxu1 %v5259_v35  ;;  %13825 = vmatpush3.msra.mxu0 %v17191_v57 }
 0x45e   : > { %13852 = vmatpush3.msra.mxu1 %v5259_v35  ;;  %13826 = vmatprep.subr.mxu0 %v17200_v48 }
 0x45f   : > { %13853 = vmatprep.subr.mxu1 %v5266_v39  ;;  %13827 = vmatpush3.msra.mxu0 %v17200_v48 }
 0x460   : > { %13854 = vmatpush3.msra.mxu1 %v5266_v39  ;;  %13828 = vmatprep.subr.mxu0 %v17212_v42 }
 0x461   : > { %13856 = vmatmul.mubr.f32.vlgmr.msra.gmra.mxu1 %v17093_v50  ;;  %13877 = vmatprep.subr.mxu1 %v17170_v60 }
 0x462   : > { %13829 = vmatpush3.msra.mxu0 %v17212_v42  ;;  %13878 = vmatpush3.msra.mxu1 %v17170_v60 }
 0x463   : > { %13893 = vmatprep.mubr.f32.mxu1 %v17119_v37  ;;  %13830 = vmatprep.subr.mxu0 %v17230_v7  ;;  %v3582_v37 = vadd.f32 %v17101_v19, %v3481_v28 }
 0x464   : > { %13879 = vmatprep.subr.mxu1 %v17178_v9  ;;  %13831 = vmatpush3.msra.mxu0 %v17230_v7 }
 0x465   : > { %13880 = vmatpush3.msra.mxu1 %v17178_v9  ;;  %13832 = vmatprep.subr.mxu0 %v17242_v59  ;;  %v3668_v25 = vadd.f32 %v17103_v29, %v3582_v37  ;;  %v5704_v29 = vld [vmem:[#allocation16 + $0x38] sm:$0xff] }
 0x466   : > { %13881 = vmatprep.subr.mxu1 %v17191_v57  ;;  %13833 = vmatpush3.msra.mxu0 %v17242_v59 }
 0x467   : > { %13882 = vmatpush3.msra.mxu1 %v17191_v57  ;;  %13834 = vmatprep.subr.mxu0 %v17258_v30  ;;  %v3752_v19 = vadd.f32 %v17129_v43, %v3668_v25  ;;  %v17360_v43 = vand.u32 4294901760, %v5704_v29 }
 0x468   : > { %13883 = vmatprep.subr.mxu1 %v17200_v48  ;;  %13835 = vmatpush3.msra.mxu0 %v17258_v30 }
 0x469   : > { %13884 = vmatpush3.msra.mxu1 %v17200_v48  ;;  %13837 = vmatmul.mubr.f32.vlgmr.msra.gmra.mxu0 %v17137_v20  ;;  %v15174_v20 = vpop.eup %15173  ;;  %v17375_v62 = vsub.f32 %v5704_v29, %v17360_v43 }
 0x46a   : > { %13858 = vmatprep.subr.mxu0 %v17187_v45  ;;  %13885 = vmatprep.subr.mxu1 %v17212_v42  ;;  %v15176_v22 = vpop.eup %15175 }
 0x46b   : > { %13859 = vmatpush3.msra.mxu0 %v17187_v45  ;;  %13874 = vmatprep.mubr.f32.mxu0 %v17107_v32  ;;  %v3843_v32 = vadd.f32 %v17131_v44, %v3752_v19  ;;  %v5703_v45 = vld [vmem:[#allocation16 + $0x30] sm:$0xff]  ;;  %v5702_v44 = vld [vmem:[#allocation16 + $0x28] sm:$0xff] }
 0x46c   : > { %13886 = vmatpush3.msra.mxu1 %v17212_v42  ;;  %13860 = vmatprep.subr.mxu0 %v17198_v46 }
 0x46d   : > { %13887 = vmatprep.subr.mxu1 %v17230_v7  ;;  %13861 = vmatpush3.msra.mxu0 %v17198_v46  ;;  %v4479_v46 = vadd.f32 1.0, %v15174_v20  ;;  %v3924_v61 = vadd.f32 %v17151_v56, %v3843_v32  ;;  %v5700_v56 = vld [vmem:[#allocation16 + $0x18] sm:$0xff] }
 0x46e   : > { %13888 = vmatpush3.msra.mxu1 %v17230_v7  ;;  %13862 = vmatprep.subr.mxu0 %v17210_v31  ;;  %v17403_v4 = vand.u32 4294901760, %v5700_v56 }
 0x46f   : > { %13889 = vmatprep.subr.mxu1 %v17242_v59  ;;  %13863 = vmatpush3.msra.mxu0 %v17210_v31  ;;  %v3491_v31 = vadd.f32 %v17084_v12, %v12479_v18  ;;  %15177 = vrcp.f32 %v4479_v46  ;;  %v4484_v21 = vmul.f32 %v15176_v22, %v3924_v61  ;;  %v17379_v12 = vand.u32 4294901760, %v5702_v44 }
 0x470   : > { %13890 = vmatpush3.msra.mxu1 %v17242_v59  ;;  %13864 = vmatprep.subr.mxu0 %v17224_v36 }
 0x471   : > { %13891 = vmatprep.subr.mxu1 %v17258_v30  ;;  %13865 = vmatpush3.msra.mxu0 %v17224_v36  ;;  %v17370_v36 = vand.u32 4294901760, %v5703_v45 }
 0x472   : > { %13892 = vmatpush3.msra.mxu1 %v17258_v30  ;;  %13866 = vmatprep.subr.mxu0 %v17238_v1 }
 0x473   : > { %13894 = vmatmul.mubr.f32.vlgmr.msra.gmra.mxu1 %v17110_v33  ;;  %13915 = vmatprep.subr.mxu1 %v17170_v60  ;;  %v5701_v33 = vld [vmem:[#allocation16 + $0x20] sm:$0xff] }
 0x474   : > { %13867 = vmatpush3.msra.mxu0 %v17238_v1  ;;  %13916 = vmatpush3.msra.mxu1 %v17170_v60  ;;  %v3588_v60 = vadd.f32 %v17089_v49, %v3491_v31  ;;  %v17387_v1 = vsub.f32 %v5703_v45, %v17370_v36  ;;  %v17389_v3 = vand.u32 4294901760, %v5701_v33  ;;  %v5713_v49 = vsel %vm4501_vm6, %v4484_v21, 0  ;;  %v6305_v21 = vld [vmem:[#allocation19 + $0x38] sm:$0xff] }
 0x475   : > { %13931 = vmatprep.mubr.f32.mxu1 %v17096_v54  ;;  %13868 = vmatprep.subr.mxu0 %v17256_v38  ;;  %v17419_v23 = vand.u32 4294901760, %v5713_v49 }
 0x476   : > { %13917 = vmatprep.subr.mxu1 %v17178_v9  ;;  %13869 = vmatpush3.msra.mxu0 %v17256_v38  ;;  %v3675_v38 = vadd.f32 %v17091_v52, %v3588_v60  ;;  %v17410_v52 = vand.u32 4294901760, %v17387_v1  ;;  %v6303_v60 = vld [vmem:[#allocation19 + $0x28] sm:$0xff] }
 0x477   : > { %13918 = vmatpush3.msra.mxu1 %v17178_v9  ;;  %13870 = vmatprep.subr.mxu0 %v17270_v8  ;;  %v17394_v9 = vand.u32 4294901760, %v17375_v62 }
 0x478   : > { %13919 = vmatprep.subr.mxu1 %v17191_v57  ;;  %13871 = vmatpush3.msra.mxu0 %v17270_v8  ;;  %v17401_v8 = vsub.f32 %v5702_v44, %v17379_v12  ;;  %v3760_v10 = vadd.f32 %v17113_v34, %v3675_v38  ;;  %v5838_v34 = vsub.f32 %v17387_v1, %v17410_v52 }
 0x479   : > { %13920 = vmatpush3.msra.mxu1 %v17191_v57  ;;  %13872 = vmatprep.subr.mxu0 %v17282_v14  ;;  %v17413_v57 = vsub.f32 %v5701_v33, %v17389_v3 }
 0x47a   : > { %13921 = vmatprep.subr.mxu1 %v17200_v48  ;;  %13873 = vmatpush3.msra.mxu0 %v17282_v14  ;;  %v5698_v14 = vld [vmem:[#allocation16 + $0x8] sm:$0xff]  ;;  %v17427_v26 = vand.u32 4294901760, %v17401_v8  ;;  %v3849_v0 = vadd.f32 %v17115_v27, %v3760_v10  ;;  %v6300_v10 = vld [vmem:[#allocation19 + $0x10] sm:$0xff] }
 0x47b   : > { %13922 = vmatpush3.msra.mxu1 %v17200_v48  ;;  %13875 = vmatmul.mubr.f32.vlgmr.msra.gmra.mxu0 %v17099_v6  ;;  %v5831_v48 = vsub.f32 %v17375_v62, %v17394_v9  ;;  %v17421_v6 = vand.u32 4294901760, %v5699_v24  ;;  %v17434_v15 = vand.u32 4294901760, %v5698_v14 }
 0x47c   : > { %13896 = vmatprep.subr.mxu0 %v17205_v51  ;;  %13923 = vmatprep.subr.mxu1 %v17212_v42  ;;  %v5845_v35 = vsub.f32 %v17401_v8, %v17427_v26  ;;  %v3930_v13 = vadd.f32 %v17139_v41, %v3849_v0  ;;  %v17619_v0 = vand.u32 4294901760, %v6300_v10 }
 0x47d   : > { %13897 = vmatpush3.msra.mxu0 %v17205_v51  ;;  %13912 = vmatprep.mubr.f32.mxu0 %v17096_v54  ;;  %v17430_v51 = vsub.f32 %v5700_v56, %v17403_v4  ;;  %v5697_v54 = vld [vmem:[#allocation16] sm:$0xff]  ;;  %v5832_v16 = vand.u32 4294901760, %v5831_v48  ;;  %v17450_v27 = vsub.f32 %v5699_v24, %v17421_v6  ;;  %v17464_v39 = vsub.f32 %v5698_v14, %v17434_v15  ;;  %v6304_v56 = vld [vmem:[#allocation19 + $0x30] sm:$0xff] }
 0x47e   : > { %13924 = vmatpush3.msra.mxu1 %v17212_v42  ;;  %13898 = vmatprep.subr.mxu0 %v17221_v5  ;;  %v17442_v42 = vand.u32 4294901760, %v17413_v57 }
 0x47f   : > { %13925 = vmatprep.subr.mxu1 %v17230_v7  ;;  %13899 = vmatpush3.msra.mxu0 %v17221_v5  ;;  %v17447_v5 = vsub.f32 %v5713_v49, %v17419_v23  ;;  %v17459_v17 = vand.u32 4294901760, %v17430_v51  ;;  %v17487_v37 = vand.u32 4294901760, %v17464_v39  ;;  %v6302_v49 = vld [vmem:[#allocation19 + $0x20] sm:$0xff] }
 0x480   : > { %13926 = vmatpush3.msra.mxu1 %v17230_v7  ;;  %13900 = vmatprep.subr.mxu0 %v17235_v11  ;;  %v17452_v7 = vand.u32 4294901760, %v5697_v54  ;;  %v5852_v55 = vsub.f32 %v17413_v57, %v17442_v42 }
 0x481   : > { %13927 = vmatprep.subr.mxu1 %v17242_v59  ;;  %13901 = vmatpush3.msra.mxu0 %v17235_v11  ;;  %v15178_v11 = vpop.eup %15177  ;;  %v17473_v58 = vand.u32 4294901760, %v17447_v5  ;;  %v5859_v28 = vsub.f32 %v17430_v51, %v17459_v17 }
 0x482   : > { %13928 = vmatpush3.msra.mxu1 %v17242_v59  ;;  %13902 = vmatprep.subr.mxu0 %v17251_v53  ;;  %v5839_v59 = vand.u32 4294901760, %v5838_v34  ;;  %v17479_v18 = vsub.f32 %v5697_v54, %v17452_v7  ;;  %v4485_v41 = vmul.f32 %v15178_v11, %v3930_v13  ;;  %v5853_v25 = vand.u32 4294901760, %v5852_v55  ;;  %v6299_v54 = vld [vmem:[#allocation19 + $0x8] sm:$0xff] }
 0x483   : > { %13929 = vmatprep.subr.mxu1 %v17258_v30  ;;  %13903 = vmatpush3.msra.mxu0 %v17251_v53  ;;  %v17476_v53 = vand.u32 4294901760, %v17450_v27  ;;  %v5860_v32 = vand.u32 4294901760, %v5859_v28 }
 0x484   : > { %13930 = vmatpush3.msra.mxu1 %v17258_v30  ;;  %13904 = vmatprep.subr.mxu0 %v17265_v40  ;;  %v5846_v30 = vand.u32 4294901760, %v5845_v35  ;;  %v17496_v29 = vand.u32 4294901760, %v17479_v18  ;;  %v5716_v20 = vsel %vm4501_vm6, %v4485_v41, 0 }
 0x485   : > { %13932 = vmatmul.mubr.f32.vlgmr.msra.gmra.mxu1 %v17093_v50  ;;  %13953 = vmatprep.subr.mxu1 %v5832_v16  ;;  %v5866_v19 = vsub.f32 %v17450_v27, %v17476_v53 }
 0x486   : > { %13905 = vmatpush3.msra.mxu0 %v17265_v40  ;;  %13954 = vmatpush3.msra.mxu1 %v5832_v16  ;;  %v5794_v40 = vsub.f32 %v17447_v5, %v17473_v58  ;;  %v5880_v22 = vsub.f32 %v17479_v18, %v17496_v29 }
 0x487   : > { %13969 = vmatprep.mubr.f32.mxu1 %v17419_v23  ;;  %13906 = vmatprep.subr.mxu0 %v17279_v2  ;;  %v5867_v46 = vand.u32 4294901760, %v5866_v19 }
 0x488   : > { %13955 = vmatprep.subr.mxu1 %v5839_v59  ;;  %13907 = vmatpush3.msra.mxu0 %v17279_v2  ;;  %v5873_v2 = vsub.f32 %v17464_v39, %v17487_v37  ;;  %v17505_v45 = vand.u32 4294901760, %v5794_v40 }
 0x489   : > { %13956 = vmatpush3.msra.mxu1 %v5839_v59  ;;  %13908 = vmatprep.subr.mxu0 %v17291_v47 }
 0x48a   : > { %13957 = vmatprep.subr.mxu1 %v5846_v30  ;;  %13909 = vmatpush3.msra.mxu0 %v17291_v47  ;;  %v17509_v47 = vand.u32 4294901760, %v5716_v20  ;;  %v5874_v44 = vand.u32 4294901760, %v5873_v2  ;;  %v6912_v2 = vld [vmem:[#allocation22 + $0x28] sm:$0xff] }
 0x48b   : > { %13958 = vmatpush3.msra.mxu1 %v5846_v30  ;;  %13910 = vmatprep.subr.mxu0 %v17298_v63 }
 0x48c   : > { %13959 = vmatprep.subr.mxu1 %v5853_v25  ;;  %13911 = vmatpush3.msra.mxu0 %v17298_v63  ;;  %v17517_v63 = vsub.f32 %v5716_v20, %v17509_v47  ;;  %v6913_v20 = vld [vmem:[#allocation22 + $0x30] sm:$0xff] }
 0x48d   : > { %13960 = vmatpush3.msra.mxu1 %v5853_v25  ;;  %13913 = vmatmul.mubr.f32.vlgmr.msra.gmra.mxu0 %v17093_v50  ;;  %v5881_v50 = vand.u32 4294901760, %v5880_v22  ;;  %v17786_v22 = vand.u32 4294901760, %v6912_v2 }
 0x48e   : > { %13934 = vmatprep.subr.mxu0 %v17360_v43  ;;  %13961 = vmatprep.subr.mxu1 %v5860_v32  ;;  %v17524_v31 = vand.u32 4294901760, %v17517_v63 }
 0x48f   : > { %13935 = vmatpush3.msra.mxu0 %v17360_v43  ;;  %13950 = vmatprep.mubr.f32.mxu0 %v17505_v45 }
 0x490   : > { %13962 = vmatpush3.msra.mxu1 %v5860_v32  ;;  %13936 = vmatprep.subr.mxu0 %v17370_v36  ;;  %v5804_v61 = vsub.f32 %v17517_v63, %v17524_v31  ;;  %v17774_v32 = vand.u32 4294901760, %v6913_v20 }
 0x491   : > { %13963 = vmatprep.subr.mxu1 %v5867_v46  ;;  %13937 = vmatpush3.msra.mxu0 %v17370_v36 }
 0x492   : > { %13964 = vmatpush3.msra.mxu1 %v5867_v46  ;;  %13938 = vmatprep.subr.mxu0 %v17379_v12  ;;  %v17543_v33 = vand.u32 4294901760, %v5804_v61  ;;  %v17784_v46 = vsub.f32 %v6913_v20, %v17774_v32 }
 0x493   : > { %13965 = vmatprep.subr.mxu1 %v5874_v44  ;;  %13939 = vmatpush3.msra.mxu0 %v17379_v12 }
 0x494   : > { %13966 = vmatpush3.msra.mxu1 %v5874_v44  ;;  %13940 = vmatprep.subr.mxu0 %v17389_v3  ;;  %v6911_v44 = vld [vmem:[#allocation22 + $0x20] sm:$0xff] }
 0x495   : > { %13967 = vmatprep.subr.mxu1 %v5881_v50  ;;  %13941 = vmatpush3.msra.mxu0 %v17389_v3  ;;  %v17800_v61 = vand.u32 4294901760, %v6911_v44 }
 0x496   : > { %13968 = vmatpush3.msra.mxu1 %v5881_v50  ;;  %13942 = vmatprep.subr.mxu0 %v17403_v4 }
 0x497   : > { %13970 = vmatmul.mubr.f32.vlgmr.msra.gmra.mxu1 %v17509_v47  ;;  %13991 = vmatprep.subr.mxu1 %v17360_v43 }
 0x498   : > { %13943 = vmatpush3.msra.mxu0 %v17403_v4  ;;  %13992 = vmatpush3.msra.mxu1 %v17360_v43 }
 0x499   : > { %14007 = vmatprep.mubr.f32.mxu1 %v17473_v58  ;;  %13944 = vmatprep.subr.mxu0 %v17421_v6 }
 0x49a   : > { %13993 = vmatprep.subr.mxu1 %v17370_v36  ;;  %13945 = vmatpush3.msra.mxu0 %v17421_v6 }
 0x49b   : > { %13994 = vmatpush3.msra.mxu1 %v17370_v36  ;;  %13946 = vmatprep.subr.mxu0 %v17434_v15 }
 0x49c   : > { %13995 = vmatprep.subr.mxu1 %v17379_v12  ;;  %13947 = vmatpush3.msra.mxu0 %v17434_v15 }
 0x49d   : > { %13996 = vmatpush3.msra.mxu1 %v17379_v12  ;;  %13948 = vmatprep.subr.mxu0 %v17452_v7 }
 0x49e   : > { %13997 = vmatprep.subr.mxu1 %v17389_v3  ;;  %13949 = vmatpush3.msra.mxu0 %v17452_v7 }
 0x49f   : > { %13998 = vmatpush3.msra.mxu1 %v17389_v3  ;;  %13951 = vmatmul.mubr.f32.vlgmr.msra.gmra.mxu0 %v17543_v33 }
 0x4a0   : > { %13972 = vmatprep.subr.mxu0 %v17375_v62  ;;  %13999 = vmatprep.subr.mxu1 %v17403_v4 }
 0x4a1   : > { %13973 = vmatpush3.msra.mxu0 %v17375_v62  ;;  %13988 = vmatprep.mubr.f32.mxu0 %v17447_v5  ;;  %v17565_v62 = vand.u32 4294901760, %v6305_v21 }
 0x4a2   : > { %14000 = vmatpush3.msra.mxu1 %v17403_v4  ;;  %13974 = vmatprep.subr.mxu0 %v17387_v1 }
 0x4a3   : > { %14001 = vmatprep.subr.mxu1 %v17421_v6  ;;  %13975 = vmatpush3.msra.mxu0 %v17387_v1  ;;  %v17573_v1 = vand.u32 4294901760, %v6304_v56  ;;  %v17578_v38 = vsub.f32 %v6305_v21, %v17565_v62 }
 0x4a4   : > { %14002 = vmatpush3.msra.mxu1 %v17421_v6  ;;  %13976 = vmatprep.subr.mxu0 %v17401_v8 }
 0x4a5   : > { %14003 = vmatprep.subr.mxu1 %v17434_v15  ;;  %13977 = vmatpush3.msra.mxu0 %v17401_v8  ;;  %v17582_v8 = vand.u32 4294901760, %v6303_v60  ;;  %v17589_v24 = vsub.f32 %v6304_v56, %v17573_v1  ;;  %v17596_v14 = vand.u32 4294901760, %v17578_v38 }
 0x4a6   : > { %14004 = vmatpush3.msra.mxu1 %v17434_v15  ;;  %13978 = vmatprep.subr.mxu0 %v17413_v57 }
 0x4a7   : > { %14005 = vmatprep.subr.mxu1 %v17452_v7  ;;  %13979 = vmatpush3.msra.mxu0 %v17413_v57  ;;  %v17591_v57 = vand.u32 4294901760, %v6302_v49 }
 0x4a8   : > { %14006 = vmatpush3.msra.mxu1 %v17452_v7  ;;  %13980 = vmatprep.subr.mxu0 %v17430_v51 }
 0x4a9   : > { %14008 = vmatmul.mubr.f32.vlgmr.msra.gmra.mxu1 %v17524_v31  ;;  %14029 = vmatprep.subr.mxu1 %v17360_v43 }
 0x4aa   : > { %13981 = vmatpush3.msra.mxu0 %v17430_v51  ;;  %14030 = vmatpush3.msra.mxu1 %v17360_v43  ;;  %v6301_v43 = vld [vmem:[#allocation19 + $0x18] sm:$0xff]  ;;  %v17613_v51 = vsub.f32 %v6302_v49, %v17591_v57 }
 0x4ab   : > { %14045 = vmatprep.mubr.f32.mxu1 %v17419_v23  ;;  %13982 = vmatprep.subr.mxu0 %v17450_v27  ;;  %v17603_v48 = vand.u32 4294901760, %v6301_v43 }
 0x4ac   : > { %14031 = vmatprep.subr.mxu1 %v17370_v36  ;;  %13983 = vmatpush3.msra.mxu0 %v17450_v27  ;;  %v6298_v27 = vld [vmem:[#allocation19] sm:$0xff]  ;;  %v17638_v35 = vand.u32 4294901760, %v17613_v51 }
 0x4ad   : > { %14032 = vmatpush3.msra.mxu1 %v17370_v36  ;;  %13984 = vmatprep.subr.mxu0 %v17464_v39  ;;  %v17601_v36 = vsub.f32 %v6303_v60, %v17582_v8  ;;  %v17627_v16 = vsub.f32 %v6301_v43, %v17603_v48  ;;  %v17810_v60 = vsub.f32 %v6911_v44, %v17800_v61 }
 0x4ae   : > { %14033 = vmatprep.subr.mxu1 %v17379_v12  ;;  %13985 = vmatpush3.msra.mxu0 %v17464_v39  ;;  %v17643_v39 = vsub.f32 %v6300_v10, %v17619_v0  ;;  %v6447_v59 = vsub.f32 %v17613_v51, %v17638_v35 }
 0x4af   : > { %14034 = vmatpush3.msra.mxu1 %v17379_v12  ;;  %13986 = vmatprep.subr.mxu0 %v17479_v18  ;;  %v17610_v12 = vand.u32 4294901760, %v17589_v24  ;;  %v17624_v34 = vand.u32 4294901760, %v17601_v36  ;;  %v17652_v13 = vand.u32 4294901760, %v17627_v16  ;;  %v17819_v43 = vand.u32 4294901760, %v17810_v60 }
 0x4b0   : > { %14035 = vmatprep.subr.mxu1 %v17389_v3  ;;  %13987 = vmatpush3.msra.mxu0 %v17479_v18  ;;  %v17665_v55 = vand.u32 4294901760, %v17643_v39  ;;  %v6448_v30 = vand.u32 4294901760, %v6447_v59 }
 0x4b1   : > { %14036 = vmatpush3.msra.mxu1 %v17389_v3  ;;  %13989 = vmatmul.mubr.f32.vlgmr.msra.gmra.mxu0 %v17517_v63  ;;  %v6426_v3 = vsub.f32 %v17578_v38, %v17596_v14 }
 0x4b2   : > { %14010 = vmatprep.subr.mxu0 %v17394_v9  ;;  %14037 = vmatprep.subr.mxu1 %v17403_v4 }
 0x4b3   : > { %14011 = vmatpush3.msra.mxu0 %v17394_v9  ;;  %14026 = vmatprep.mubr.f32.mxu0 %v17419_v23  ;;  %v17631_v9 = vand.u32 4294901760, %v6299_v54  ;;  %v6427_v11 = vand.u32 4294901760, %v6426_v3 }
 0x4b4   : > { %14038 = vmatpush3.msra.mxu1 %v17403_v4  ;;  %14012 = vmatprep.subr.mxu0 %v17410_v52  ;;  %v6433_v4 = vsub.f32 %v17589_v24, %v17610_v12 }
 0x4b5   : > { %14039 = vmatprep.subr.mxu1 %v17421_v6  ;;  %14013 = vmatpush3.msra.mxu0 %v17410_v52  ;;  %v17645_v52 = vand.u32 4294901760, %v6298_v27 }
 0x4b6   : > { %14040 = vmatpush3.msra.mxu1 %v17421_v6  ;;  %14014 = vmatprep.subr.mxu0 %v17427_v26  ;;  %v6440_v6 = vsub.f32 %v17601_v36, %v17624_v34 }
 0x4b7   : > { %14041 = vmatprep.subr.mxu1 %v17434_v15  ;;  %14015 = vmatpush3.msra.mxu0 %v17427_v26  ;;  %v17657_v26 = vsub.f32 %v6299_v54, %v17631_v9  ;;  %v17668_v18 = vsub.f32 %v6298_v27, %v17645_v52  ;;  %v6907_v54 = vld [vmem:[#allocation22] sm:$0xff] }
 0x4b8   : > { %14042 = vmatpush3.msra.mxu1 %v17434_v15  ;;  %14016 = vmatprep.subr.mxu0 %v17442_v42  ;;  %v6434_v15 = vand.u32 4294901760, %v6433_v4 }
 0x4b9   : > { %14043 = vmatprep.subr.mxu1 %v17452_v7  ;;  %14017 = vmatpush3.msra.mxu0 %v17442_v42  ;;  %v6441_v42 = vand.u32 4294901760, %v6440_v6  ;;  %v17676_v41 = vand.u32 4294901760, %v17657_v26  ;;  %v17683_v28 = vand.u32 4294901760, %v17668_v18 }
 0x4ba   : > { %14044 = vmatpush3.msra.mxu1 %v17452_v7  ;;  %14018 = vmatprep.subr.mxu0 %v17459_v17  ;;  %v6454_v7 = vsub.f32 %v17627_v16, %v17652_v13 }
 0x4bb   : > { %14046 = vmatmul.mubr.f32.vlgmr.msra.gmra.mxu1 %v17509_v47  ;;  %14067 = vmatprep.subr.mxu1 %v6427_v11  ;;  %v6475_v19 = vsub.f32 %v17668_v18, %v17683_v28 }
 0x4bc   : > { %14019 = vmatpush3.msra.mxu0 %v17459_v17  ;;  %14068 = vmatpush3.msra.mxu1 %v6427_v11  ;;  %v6461_v17 = vsub.f32 %v17643_v39, %v17665_v55  ;;  %v6455_v25 = vand.u32 4294901760, %v6454_v7 }
 0x4bd   : > { %14083 = vmatprep.mubr.f32.mxu1 %v17419_v23  ;;  %14020 = vmatprep.subr.mxu0 %v17476_v53 }
 0x4be   : > { %14069 = vmatprep.subr.mxu1 %v6434_v15  ;;  %14021 = vmatpush3.msra.mxu0 %v17476_v53  ;;  %v6468_v53 = vsub.f32 %v17657_v26, %v17676_v41  ;;  %v6462_v40 = vand.u32 4294901760, %v6461_v17 }
 0x4bf   : > { %14070 = vmatpush3.msra.mxu1 %v6434_v15  ;;  %14022 = vmatprep.subr.mxu0 %v17487_v37 }
 0x4c0   : > { %14071 = vmatprep.subr.mxu1 %v6441_v42  ;;  %14023 = vmatpush3.msra.mxu0 %v17487_v37  ;;  %v6469_v37 = vand.u32 4294901760, %v6468_v53 }
 0x4c1   : > { %14072 = vmatpush3.msra.mxu1 %v6441_v42  ;;  %14024 = vmatprep.subr.mxu0 %v17496_v29 }
 0x4c2   : > { %14073 = vmatprep.subr.mxu1 %v6448_v30  ;;  %14025 = vmatpush3.msra.mxu0 %v17496_v29  ;;  %v6476_v29 = vand.u32 4294901760, %v6475_v19  ;;  %v12484_v19 = vld [vmem:[%s19058_s10] ss:$0 sm:$0xff]  ;;  %s19065_s10 = sld [smem:[#allocation71_spill]] }
 0x4c3   : > { %14074 = vmatpush3.msra.mxu1 %v6448_v30  ;;  %14027 = vmatmul.mubr.f32.vlgmr.msra.gmra.mxu0 %v17509_v47 }
 0x4c4   : > { %14048 = vmatprep.subr.mxu0 %v17565_v62  ;;  %14075 = vmatprep.subr.mxu1 %v6455_v25 }
 0x4c5   : > { %14049 = vmatpush3.msra.mxu0 %v17565_v62  ;;  %14064 = vmatprep.mubr.f32.mxu0 %v17505_v45 }
 0x4c6   : > { %14076 = vmatpush3.msra.mxu1 %v6455_v25  ;;  %14050 = vmatprep.subr.mxu0 %v17573_v1 }
 0x4c7   : > { %14077 = vmatprep.subr.mxu1 %v6462_v40  ;;  %14051 = vmatpush3.msra.mxu0 %v17573_v1 }
 0x4c8   : > { %14078 = vmatpush3.msra.mxu1 %v6462_v40  ;;  %14052 = vmatprep.subr.mxu0 %v17582_v8 }
 0x4c9   : > { %14079 = vmatprep.subr.mxu1 %v6469_v37  ;;  %14053 = vmatpush3.msra.mxu0 %v17582_v8 }
 0x4ca   : > { %14080 = vmatpush3.msra.mxu1 %v6469_v37  ;;  %14054 = vmatprep.subr.mxu0 %v17591_v57 }
 0x4cb   : > { %14081 = vmatprep.subr.mxu1 %v6476_v29  ;;  %14055 = vmatpush3.msra.mxu0 %v17591_v57 }
 0x4cc   : > { %14082 = vmatpush3.msra.mxu1 %v6476_v29  ;;  %14056 = vmatprep.subr.mxu0 %v17603_v48 }
 0x4cd   : > { %14084 = vmatmul.mubr.f32.vlgmr.msra.gmra.mxu1 %v17509_v47  ;;  %14105 = vmatprep.subr.mxu1 %v17565_v62 }
 0x4ce   : > { %14057 = vmatpush3.msra.mxu0 %v17603_v48  ;;  %14106 = vmatpush3.msra.mxu1 %v17565_v62 }
 0x4cf   : > { %14121 = vmatprep.mubr.f32.mxu1 %v17473_v58  ;;  %14058 = vmatprep.subr.mxu0 %v17619_v0 }
 0x4d0   : > { %14107 = vmatprep.subr.mxu1 %v17573_v1  ;;  %14059 = vmatpush3.msra.mxu0 %v17619_v0 }
 0x4d1   : > { %14108 = vmatpush3.msra.mxu1 %v17573_v1  ;;  %14060 = vmatprep.subr.mxu0 %v17631_v9 }
 0x4d2   : > { %14109 = vmatprep.subr.mxu1 %v17582_v8  ;;  %14061 = vmatpush3.msra.mxu0 %v17631_v9 }
 0x4d3   : > { %14110 = vmatpush3.msra.mxu1 %v17582_v8  ;;  %14062 = vmatprep.subr.mxu0 %v17645_v52 }
 0x4d4   : > { %14111 = vmatprep.subr.mxu1 %v17591_v57  ;;  %14063 = vmatpush3.msra.mxu0 %v17645_v52 }
 0x4d5   : > { %14112 = vmatpush3.msra.mxu1 %v17591_v57  ;;  %14065 = vmatmul.mubr.f32.vlgmr.msra.gmra.mxu0 %v17543_v33  ;;  %v6910_v33 = vld [vmem:[#allocation22 + $0x18] sm:$0xff] }
 0x4d6   : > { %14086 = vmatprep.subr.mxu0 %v17578_v38  ;;  %14113 = vmatprep.subr.mxu1 %v17603_v48 }
 0x4d7   : > { %14087 = vmatpush3.msra.mxu0 %v17578_v38  ;;  %14102 = vmatprep.mubr.f32.mxu0 %v17447_v5  ;;  %v6914_v5 = vld [vmem:[#allocation22 + $0x38] sm:$0xff]  ;;  %v6909_v38 = vld [vmem:[#allocation22 + $0x10] sm:$0xff] }
 0x4d8   : > { %14114 = vmatpush3.msra.mxu1 %v17603_v48  ;;  %14088 = vmatprep.subr.mxu0 %v17589_v24  ;;  %v17765_v58 = vand.u32 4294901760, %v6914_v5 }
 0x4d9   : > { %14115 = vmatprep.subr.mxu1 %v17619_v0  ;;  %14089 = vmatpush3.msra.mxu0 %v17589_v24 }
 0x4da   : > { %14116 = vmatpush3.msra.mxu1 %v17619_v0  ;;  %14090 = vmatprep.subr.mxu0 %v17601_v36 }
 0x4db   : > { %14117 = vmatprep.subr.mxu1 %v17631_v9  ;;  %14091 = vmatpush3.msra.mxu0 %v17601_v36 }
 0x4dc   : > { %14118 = vmatpush3.msra.mxu1 %v17631_v9  ;;  %14092 = vmatprep.subr.mxu0 %v17613_v51 }
 0x4dd   : > { %14119 = vmatprep.subr.mxu1 %v17645_v52  ;;  %14093 = vmatpush3.msra.mxu0 %v17613_v51 }
 0x4de   : > { %14120 = vmatpush3.msra.mxu1 %v17645_v52  ;;  %14094 = vmatprep.subr.mxu0 %v17627_v16 }
 0x4df   : > { %14122 = vmatmul.mubr.f32.vlgmr.msra.gmra.mxu1 %v17524_v31  ;;  %14143 = vmatprep.subr.mxu1 %v17565_v62  ;;  %v17798_v31 = vsub.f32 %v6912_v2, %v17786_v22 }
 0x4e0   : > { %14095 = vmatpush3.msra.mxu0 %v17627_v16  ;;  %14144 = vmatpush3.msra.mxu1 %v17565_v62 }
 0x4e1   : > { %14159 = vmatprep.mubr.f32.mxu1 %v17419_v23  ;;  %14096 = vmatprep.subr.mxu0 %v17643_v39  ;;  %v17807_v56 = vand.u32 4294901760, %v17798_v31 }
 0x4e2   : > { %14145 = vmatprep.subr.mxu1 %v17573_v1  ;;  %14097 = vmatpush3.msra.mxu0 %v17643_v39 }
 0x4e3   : > { %14146 = vmatpush3.msra.mxu1 %v17573_v1  ;;  %14098 = vmatprep.subr.mxu0 %v17657_v26  ;;  %v17813_v1 = vand.u32 4294901760, %v6910_v33 }
 0x4e4   : > { %14147 = vmatprep.subr.mxu1 %v17582_v8  ;;  %14099 = vmatpush3.msra.mxu0 %v17657_v26 }
 0x4e5   : > { %14148 = vmatpush3.msra.mxu1 %v17582_v8  ;;  %14100 = vmatprep.subr.mxu0 %v17668_v18  ;;  %v7055_v8 = vsub.f32 %v17798_v31, %v17807_v56  ;;  %v17823_v24 = vsub.f32 %v6910_v33, %v17813_v1 }
 0x4e6   : > { %14149 = vmatprep.subr.mxu1 %v17591_v57  ;;  %14101 = vmatpush3.msra.mxu0 %v17668_v18 }
 0x4e7   : > { %14150 = vmatpush3.msra.mxu1 %v17591_v57  ;;  %14103 = vmatmul.mubr.f32.vlgmr.msra.gmra.mxu0 %v17517_v63  ;;  %v17795_v63 = vand.u32 4294901760, %v17784_v46  ;;  %v17825_v57 = vand.u32 4294901760, %v6909_v38  ;;  %v7056_v36 = vand.u32 4294901760, %v7055_v8  ;;  %v17832_v10 = vand.u32 4294901760, %v17823_v24 }
 0x4e8   : > { %14124 = vmatprep.subr.mxu0 %v17596_v14  ;;  %14151 = vmatprep.subr.mxu1 %v17603_v48 }
 0x4e9   : > { %14125 = vmatpush3.msra.mxu0 %v17596_v14  ;;  %14140 = vmatprep.mubr.f32.mxu0 %v17419_v23  ;;  %v17772_v23 = vsub.f32 %v6914_v5, %v17765_v58  ;;  %v7048_v62 = vsub.f32 %v17784_v46, %v17795_v63  ;;  %v6908_v14 = vld [vmem:[#allocation22 + $0x8] sm:$0xff] }
 0x4ea   : > { %14152 = vmatpush3.msra.mxu1 %v17603_v48  ;;  %14126 = vmatprep.subr.mxu0 %v17610_v12  ;;  %v7062_v48 = vsub.f32 %v17810_v60, %v17819_v43  ;;  %v17837_v51 = vand.u32 4294901760, %v6908_v14 }
 0x4eb   : > { %14153 = vmatprep.subr.mxu1 %v17619_v0  ;;  %14127 = vmatpush3.msra.mxu0 %v17610_v12  ;;  %v17781_v45 = vand.u32 4294901760, %v17772_v23  ;;  %v7049_v49 = vand.u32 4294901760, %v7048_v62  ;;  %v17835_v12 = vsub.f32 %v6909_v38, %v17825_v57 }
 0x4ec   : > { %14154 = vmatpush3.msra.mxu1 %v17619_v0  ;;  %14128 = vmatprep.subr.mxu0 %v17624_v34  ;;  %v7063_v3 = vand.u32 4294901760, %v7062_v48  ;;  %v17840_v0 = vand.u32 4294901760, %v6907_v54  ;;  %v17849_v16 = vsub.f32 %v6908_v14, %v17837_v51  ;;  %v13743_v59 = vpop.f32.mrf.mxu1 }
 0x4ed   : > { %14155 = vmatprep.subr.mxu1 %v17631_v9  ;;  %14129 = vmatpush3.msra.mxu0 %v17624_v34  ;;  %v7041_v50 = vsub.f32 %v17772_v23, %v17781_v45  ;;  %v17846_v34 = vand.u32 4294901760, %v17835_v12 }
 0x4ee   : > { %14156 = vmatpush3.msra.mxu1 %v17631_v9  ;;  %14130 = vmatprep.subr.mxu0 %v17638_v35  ;;  %v17853_v27 = vsub.f32 %v6907_v54, %v17840_v0  ;;  %v4708_v42 = vpop.f32.mrf.mxu1 }
 0x4ef   : > { %14157 = vmatprep.subr.mxu1 %v17645_v52  ;;  %14131 = vmatpush3.msra.mxu0 %v17638_v35  ;;  %v7042_v21 = vand.u32 4294901760, %v7041_v50  ;;  %v7076_v4 = vsub.f32 %v17835_v12, %v17846_v34  ;;  %v17859_v35 = vand.u32 4294901760, %v17849_v16 }
 0x4f0   : > { %14158 = vmatpush3.msra.mxu1 %v17645_v52  ;;  %14132 = vmatprep.subr.mxu0 %v17652_v13  ;;  %v17863_v11 = vand.u32 4294901760, %v17853_v27 }
 0x4f1   : > { %14160 = vmatmul.mubr.f32.vlgmr.msra.gmra.mxu1 %v17509_v47  ;;  %14133 = vmatpush3.msra.mxu0 %v17652_v13  ;;  %v7077_v39 = vand.u32 4294901760, %v7076_v4  ;;  %v7083_v52 = vsub.f32 %v17849_v16, %v17859_v35 }
 0x4f2   : > { %14134 = vmatprep.subr.mxu0 %v17665_v55  ;;  %14181 = vmatprep.subr.mxu1 %v7042_v21  ;;  %v7090_v6 = vsub.f32 %v17853_v27, %v17863_v11 }
 0x4f3   : > { %14135 = vmatpush3.msra.mxu0 %v17665_v55  ;;  %14182 = vmatpush3.msra.mxu1 %v7042_v21  ;;  %v7084_v13 = vand.u32 4294901760, %v7083_v52 }
 0x4f4   : > { %14136 = vmatprep.subr.mxu0 %v17676_v41  ;;  %14183 = vmatprep.subr.mxu1 %v7049_v49  ;;  %v7091_v26 = vand.u32 4294901760, %v7090_v6  ;;  %v13724_v15 = vpop.f32.mrf.mxu0 }
 0x4f5   : > { %14137 = vmatpush3.msra.mxu0 %v17676_v41  ;;  %14184 = vmatpush3.msra.mxu1 %v7049_v49 }
 0x4f6   : > { %14138 = vmatprep.subr.mxu0 %v17683_v28  ;;  %14185 = vmatprep.subr.mxu1 %v7056_v36  ;;  %v4587_v55 = vpop.f32.mrf.mxu0 }
 0x4f7   : > { %14139 = vmatpush3.msra.mxu0 %v17683_v28  ;;  %14186 = vmatpush3.msra.mxu1 %v7056_v36 }
 0x4f8   : > { %14141 = vmatmul.mubr.f32.vlgmr.msra.gmra.mxu0 %v17509_v47  ;;  %14162 = vmatprep.subr.mxu0 %v17765_v58  ;;  %v7069_v47 = vsub.f32 %v17823_v24, %v17832_v10 }
 0x4f9   : > { %14163 = vmatpush3.msra.mxu0 %v17765_v58  ;;  %14187 = vmatprep.subr.mxu1 %v7063_v3 }
 0x4fa   : > { %14164 = vmatprep.subr.mxu0 %v17774_v32  ;;  %14188 = vmatpush3.msra.mxu1 %v7063_v3  ;;  %v7070_v9 = vand.u32 4294901760, %v7069_v47 }
 0x4fb   : > { %14165 = vmatpush3.msra.mxu0 %v17774_v32 }
 0x4fc   : > { %14166 = vmatprep.subr.mxu0 %v17786_v22  ;;  %14189 = vmatprep.subr.mxu1 %v7070_v9 }
 0x4fd   : > { %14167 = vmatpush3.msra.mxu0 %v17786_v22  ;;  %14190 = vmatpush3.msra.mxu1 %v7070_v9  ;;  %v13781_v7 = vpop.f32.mrf.mxu1 }
 0x4fe   : > { %14168 = vmatprep.subr.mxu0 %v17800_v61  ;;  %14191 = vmatprep.subr.mxu1 %v7077_v39 }
 0x4ff   : > { %14169 = vmatpush3.msra.mxu0 %v17800_v61  ;;  %14192 = vmatpush3.msra.mxu1 %v7077_v39  ;;  %v4890_v17 = vpop.f32.mrf.mxu1 }
 0x500   : > { %14170 = vmatprep.subr.mxu0 %v17813_v1  ;;  %14193 = vmatprep.subr.mxu1 %v7084_v13 }
 0x501   : > { %14171 = vmatpush3.msra.mxu0 %v17813_v1  ;;  %14194 = vmatpush3.msra.mxu1 %v7084_v13 }
 0x502   : > { %14172 = vmatprep.subr.mxu0 %v17825_v57  ;;  %14195 = vmatprep.subr.mxu1 %v7091_v26 }
 0x503   : > { %14173 = vmatpush3.msra.mxu0 %v17825_v57  ;;  %14196 = vmatpush3.msra.mxu1 %v7091_v26  ;;  %v12483_v26 = vld [vmem:[%s19059_s22] ss:$0 sm:$0xff]  ;;  %s1413_s22 = scalar_lea.vmem %s16113_s20, %s16364_s26 }
 0x504   : > { %14174 = vmatprep.subr.mxu0 %v17837_v51  ;;  %14219 = vmatprep.subr.mxu1 %v17765_v58 }
 0x505   : > { %14175 = vmatpush3.msra.mxu0 %v17837_v51  ;;  %v13762_v18 = vpop.f32.mrf.mxu0 }
 0x506   : > { %14176 = vmatprep.subr.mxu0 %v17840_v0 }
 0x507   : > { %14177 = vmatpush3.msra.mxu0 %v17840_v0  ;;  %v4802_v41 = vpop.f32.mrf.mxu0 }
 0x508   : > { %14200 = vmatprep.subr.mxu0 %v17772_v23 }
 0x50f   : > { %v13819_v28 = vpop.f32.mrf.mxu1 }
 0x511   : > { %v5078_v40 = vpop.f32.mrf.mxu1 }
 0x517   : > { %v13800_v30 = vpop.f32.mrf.mxu0 }
 0x519   : > { %v4993_v25 = vpop.f32.mrf.mxu0 }
 0x521   : > { %v13857_v37 = vpop.f32.mrf.mxu1 }
 0x523   : > { %v5303_v44 = vpop.f32.mrf.mxu1 }
 0x529   : > { %v13838_v53 = vpop.f32.mrf.mxu0 }
 0x52a   : > { %v5193_v5 = vadd.f32 %v13838_v53, %v12484_v19  ;;  %v4598_v53 = vadd.f32 %v13724_v15, %v12483_v26 }
 0x52b   : > { %v5182_v29 = vpop.f32.mrf.mxu0 }
 0x52c   : > { %v5183_v2 = vadd.f32 %v12484_v19, %v5182_v29  ;;  %v5310_v50 = vadd.f32 %v13857_v37, %v5193_v5  ;;  %v4588_v37 = vadd.f32 %v12483_v26, %v4587_v55 }
 0x52e   : > { %v5304_v38 = vadd.f32 %v5303_v44, %v5183_v2 }
 0x533   : > { %v13895_v33 = vpop.f32.mrf.mxu1 }
 0x535   : > { %v5485_v8 = vpop.f32.mrf.mxu1 }
 0x53b   : > { %v13876_v20 = vpop.f32.mrf.mxu0 }
 0x53c   : > { %v5405_v62 = vadd.f32 %v13876_v20, %v5310_v50  ;;  %v4715_v20 = vadd.f32 %v13743_v59, %v4598_v53  ;;  %v4709_v50 = vadd.f32 %v4708_v42, %v4588_v37 }
 0x53d   : > { %v5397_v21 = vpop.f32.mrf.mxu0 }
 0x53e   : > { %v5398_v49 = vadd.f32 %v5397_v21, %v5304_v38  ;;  %v5494_v14 = vadd.f32 %v13895_v33, %v5405_v62  ;;  %v4810_v44 = vadd.f32 %v13762_v18, %v4715_v20  ;;  %v4803_v33 = vadd.f32 %v4802_v41, %v4709_v50 }
 0x540   : > { %v5486_v3 = vadd.f32 %v5485_v8, %v5398_v49  ;;  %v4899_v21 = vadd.f32 %v13781_v7, %v4810_v44  ;;  %v4891_v38 = vadd.f32 %v4890_v17, %v4803_v33 }
 0x542   : > { %v5000_v62 = vadd.f32 %v13800_v30, %v4899_v21  ;;  %v4994_v49 = vadd.f32 %v4993_v25, %v4891_v38 }
 0x544   : > { %v5085_v8 = vadd.f32 %v13819_v28, %v5000_v62 }
 0x545   : > { %v13933_v36 = vpop.f32.mrf.mxu1 }
 0x547   : > { %v5673_v39 = vpop.f32.mrf.mxu1 }
 0x54d   : > { %v13914_v48 = vpop.f32.mrf.mxu0 }
 0x54e   : > { %v5595_v54 = vadd.f32 %v13914_v48, %v5494_v14 }
 0x54f   : > { %v5588_v47 = vpop.f32.mrf.mxu0 }
 0x550   : > { %v5680_v9 = vadd.f32 %v13933_v36, %v5595_v54  ;;  %v5589_v4 = vadd.f32 %v5588_v47, %v5486_v3  ;;  %v5079_v36 = vadd.f32 %v5078_v40, %v4994_v49  ;;  %v7515_v47 = vld [vmem:[#allocation24 + $0x38] sm:$0xff] }
 0x552   : > { %v12486_v52 = vmul.f32 -1.442695, %v5680_v9  ;;  %v5674_v6 = vadd.f32 %v5673_v39, %v5589_v4  ;;  %v7512_v4 = vld [vmem:[#allocation24 + $0x20] sm:$0xff] }
 0x554   : > { %15179 = vpow2.f32 %v12486_v52  ;;  %v12485_v13 = vmul.f32 -1.442695, %v5674_v6  ;;  %v17963_v52 = vand.u32 4294901760, %v7512_v4  ;;  %v7510_v6 = vld [vmem:[#allocation24 + $0x10] sm:$0xff] }
 0x555   : > { %v17991_v26 = vand.u32 4294901760, %v7510_v6 }
 0x556   : > { %15181 = vpow2.f32 %v12485_v13  ;;  %v17985_v13 = vsub.f32 %v7512_v4, %v17963_v52 }
 0x557   : > { %v18021_v44 = vpop.f32.mrf.mxu1 }
 0x559   : > { %v18050_v49 = vpop.f32.mrf.mxu1 }
 0x55f   : > { %v17993_v53 = vpop.f32.mrf.mxu0 }
 0x561   : > { %v15180_v19 = vpop.eup %15179 }
 0x562   : > { %v5690_v29 = vadd.f32 1.0, %v15180_v19 }
 0x563   : > { %v15182_v5 = vpop.eup %15181 }
 0x564   : > { %15183 = vrcp.f32 %v5690_v29  ;;  %v5689_v2 = vadd.f32 1.0, %v15182_v5  ;;  %v18012_v5 = vand.u32 4294901760, %v17985_v13 }
 0x566   : > { %15185 = vrcp.f32 %v5689_v2  ;;  %v18017_v2 = vsub.f32 %v7510_v6, %v17991_v26  ;;  %v7657_v62 = vsub.f32 %v17985_v13, %v18012_v5  ;;  %v12488_v6 = vld [vmem:[#allocation21] ss:$0 sm:$0xff] }
 0x568   : > { %v18045_v38 = vand.u32 4294901760, %v18017_v2 }
 0x571   : > { %v15184_v14 = vpop.eup %15183 }
 0x572   : > { %v5696_v48 = vmul.f32 %v15184_v14, %v5085_v8 }
 0x573   : > { %v15186_v15 = vpop.eup %15185 }
 0x574   : > { %v6926_v55 = vsel %vm4501_vm6, %v5696_v48, 0  ;;  %v5695_v54 = vmul.f32 %v15186_v15, %v5079_v36  ;;  %v18060_v36 = vpop.f32.mrf.mxu1  ;;  %v7671_v15 = vsub.f32 %v18017_v2, %v18045_v38 }
 0x575   : > { %v17885_v3 = vand.u32 4294901760, %v6926_v55 }
 0x576   : > { %v6923_v59 = vsel %vm4501_vm6, %v5695_v54, 0 }
 0x577   : > { %v17888_v18 = vand.u32 4294901760, %v6923_v59  ;;  %v17891_v42 = vsub.f32 %v6926_v55, %v17885_v3 }
 0x579   : > { %14197 = vmatprep.mubr.f32.mxu1 %v17888_v18  ;;  %v17895_v7 = vsub.f32 %v6923_v59, %v17888_v18  ;;  %v17898_v41 = vand.u32 4294901760, %v17891_v42 }
 0x57a   : > { %14198 = vmatmul.mubr.f32.vlgmr.msra.gmra.mxu1 %v17885_v3 }
 0x57b   : > { %14220 = vmatpush3.msra.mxu1 %v17765_v58  ;;  %v17903_v30 = vand.u32 4294901760, %v17895_v7  ;;  %v7014_v17 = vsub.f32 %v17891_v42, %v17898_v41 }
 0x57c   : > { %14221 = vmatprep.subr.mxu1 %v17774_v32 }
 0x57d   : > { %14222 = vmatpush3.msra.mxu1 %v17774_v32  ;;  %14235 = vmatprep.mubr.f32.mxu1 %v17903_v30  ;;  %v7004_v28 = vsub.f32 %v17895_v7, %v17903_v30  ;;  %v17917_v40 = vand.u32 4294901760, %v7014_v17  ;;  %v18077_v17 = vpop.f32.mrf.mxu1 }
 0x57e   : > { %14223 = vmatprep.subr.mxu1 %v17786_v22 }
 0x57f   : > { %14224 = vmatpush3.msra.mxu1 %v17786_v22  ;;  %v17914_v25 = vand.u32 4294901760, %v7004_v28  ;;  %v7672_v28 = vand.u32 4294901760, %v7671_v15 }
 0x580   : > { %14225 = vmatprep.subr.mxu1 %v17800_v61 }
 0x581   : > { %14226 = vmatpush3.msra.mxu1 %v17800_v61  ;;  %14178 = vmatprep.mubr.f32.mxu0 %v17914_v25 }
 0x582   : > { %14227 = vmatprep.subr.mxu1 %v17813_v1  ;;  %14179 = vmatmul.mubr.f32.vlgmr.msra.gmra.mxu0 %v17917_v40 }
 0x583   : > { %14201 = vmatpush3.msra.mxu0 %v17772_v23  ;;  %14228 = vmatpush3.msra.mxu1 %v17813_v1  ;;  %v17937_v23 = vand.u32 4294901760, %v7515_v47 }
 0x584   : > { %14202 = vmatprep.subr.mxu0 %v17784_v46  ;;  %14216 = vmatprep.mubr.f32.mxu0 %v17895_v7 }
 0x585   : > { %14229 = vmatprep.subr.mxu1 %v17825_v57  ;;  %14203 = vmatpush3.msra.mxu0 %v17784_v46  ;;  %v7514_v46 = vld [vmem:[#allocation24 + $0x30] sm:$0xff] }
 0x586   : > { %14230 = vmatpush3.msra.mxu1 %v17825_v57  ;;  %14204 = vmatprep.subr.mxu0 %v17798_v31  ;;  %v17945_v9 = vand.u32 4294901760, %v7514_v46 }
 0x587   : > { %14231 = vmatprep.subr.mxu1 %v17837_v51  ;;  %14205 = vmatpush3.msra.mxu0 %v17798_v31  ;;  %v7513_v31 = vld [vmem:[#allocation24 + $0x28] sm:$0xff] }
 0x588   : > { %14232 = vmatpush3.msra.mxu1 %v17837_v51  ;;  %14206 = vmatprep.subr.mxu0 %v17810_v60  ;;  %v17954_v39 = vand.u32 4294901760, %v7513_v31 }
 0x589   : > { %14233 = vmatprep.subr.mxu1 %v17840_v0  ;;  %14207 = vmatpush3.msra.mxu0 %v17810_v60  ;;  %v17950_v60 = vsub.f32 %v7515_v47, %v17937_v23 }
 0x58a   : > { %14234 = vmatpush3.msra.mxu1 %v17840_v0  ;;  %14208 = vmatprep.subr.mxu0 %v17823_v24 }
 0x58b   : > { %14236 = vmatmul.mubr.f32.vlgmr.msra.gmra.mxu1 %v17898_v41  ;;  %14257 = vmatprep.subr.mxu1 %v17765_v58 }
 0x58c   : > { %14209 = vmatpush3.msra.mxu0 %v17823_v24  ;;  %14258 = vmatpush3.msra.mxu1 %v17765_v58  ;;  %v7511_v58 = vld [vmem:[#allocation24 + $0x18] sm:$0xff]  ;;  %v17961_v24 = vsub.f32 %v7514_v46, %v17945_v9 }
 0x58d   : > { %14273 = vmatprep.mubr.f32.mxu1 %v17888_v18  ;;  %14210 = vmatprep.subr.mxu0 %v17835_v12 }
 0x58e   : > { %14259 = vmatprep.subr.mxu1 %v17774_v32  ;;  %14211 = vmatpush3.msra.mxu0 %v17835_v12  ;;  %v17968_v12 = vand.u32 4294901760, %v17950_v60 }
 0x58f   : > { %14260 = vmatpush3.msra.mxu1 %v17774_v32  ;;  %14212 = vmatprep.subr.mxu0 %v17849_v16  ;;  %v17973_v32 = vsub.f32 %v7513_v31, %v17954_v39 }
 0x590   : > { %14261 = vmatprep.subr.mxu1 %v17786_v22  ;;  %14213 = vmatpush3.msra.mxu0 %v17849_v16  ;;  %v17975_v16 = vand.u32 4294901760, %v7511_v58 }
 0x591   : > { %14262 = vmatpush3.msra.mxu1 %v17786_v22  ;;  %14214 = vmatprep.subr.mxu0 %v17853_v27  ;;  %v17982_v22 = vand.u32 4294901760, %v17961_v24  ;;  %v17998_v19 = vand.u32 4294901760, %v17973_v32 }
 0x592   : > { %14263 = vmatprep.subr.mxu1 %v17800_v61  ;;  %14215 = vmatpush3.msra.mxu0 %v17853_v27  ;;  %v7509_v27 = vld [vmem:[#allocation24 + $0x8] sm:$0xff]  ;;  %v18001_v37 = vsub.f32 %v7511_v58, %v17975_v16 }
 0x593   : > { %14264 = vmatpush3.msra.mxu1 %v17800_v61  ;;  %14217 = vmatmul.mubr.f32.vlgmr.msra.gmra.mxu0 %v17891_v42  ;;  %v7636_v61 = vsub.f32 %v17950_v60, %v17968_v12  ;;  %v18005_v29 = vand.u32 4294901760, %v7509_v27  ;;  %v7650_v50 = vsub.f32 %v17973_v32, %v17998_v19 }
 0x594   : > { %14238 = vmatprep.subr.mxu0 %v17781_v45  ;;  %14265 = vmatprep.subr.mxu1 %v17813_v1  ;;  %v18030_v33 = vand.u32 4294901760, %v18001_v37 }
 0x595   : > { %14239 = vmatpush3.msra.mxu0 %v17781_v45  ;;  %14254 = vmatprep.mubr.f32.mxu0 %v17888_v18  ;;  %v7508_v45 = vld [vmem:[#allocation24] sm:$0xff]  ;;  %v7637_v20 = vand.u32 4294901760, %v7636_v61 }
 0x596   : > { %14266 = vmatpush3.msra.mxu1 %v17813_v1  ;;  %14240 = vmatprep.subr.mxu0 %v17795_v63  ;;  %v7643_v1 = vsub.f32 %v17961_v24, %v17982_v22  ;;  %v7664_v8 = vsub.f32 %v18001_v37, %v18030_v33 }
 0x597   : > { %14267 = vmatprep.subr.mxu1 %v17825_v57  ;;  %14241 = vmatpush3.msra.mxu0 %v17795_v63  ;;  %v18019_v63 = vand.u32 4294901760, %v7508_v45 }
 0x598   : > { %14268 = vmatpush3.msra.mxu1 %v17825_v57  ;;  %14242 = vmatprep.subr.mxu0 %v17807_v56  ;;  %v18023_v57 = vpop.f32.mrf.mxu0  ;;  %v7665_v59 = vand.u32 4294901760, %v7664_v8 }
 0x599   : > { %14269 = vmatprep.subr.mxu1 %v17837_v51  ;;  %14243 = vmatpush3.msra.mxu0 %v17807_v56  ;;  %v18035_v56 = vsub.f32 %v7509_v27, %v18005_v29 }
 0x59a   : > { %14270 = vmatpush3.msra.mxu1 %v17837_v51  ;;  %14244 = vmatprep.subr.mxu0 %v17819_v43  ;;  %v18037_v21 = vpop.f32.mrf.mxu0  ;;  %v7644_v51 = vand.u32 4294901760, %v7643_v1 }
 0x59b   : > { %14271 = vmatprep.subr.mxu1 %v17840_v0  ;;  %14245 = vmatpush3.msra.mxu0 %v17819_v43  ;;  %v18048_v43 = vsub.f32 %v7508_v45, %v18019_v63  ;;  %v18058_v14 = vand.u32 4294901760, %v18035_v56 }
 0x59c   : > { %14272 = vmatpush3.msra.mxu1 %v17840_v0  ;;  %14246 = vmatprep.subr.mxu0 %v17832_v10  ;;  %v7651_v0 = vand.u32 4294901760, %v7650_v50  ;;  %v18062_v48 = vpop.f32.mrf.mxu0 }
 0x59d   : > { %14274 = vmatmul.mubr.f32.vlgmr.msra.gmra.mxu1 %v17885_v3  ;;  %14295 = vmatprep.subr.mxu1 %v7637_v20  ;;  %v18069_v55 = vand.u32 4294901760, %v18048_v43 }
 0x59e   : > { %14247 = vmatpush3.msra.mxu0 %v17832_v10  ;;  %14296 = vmatpush3.msra.mxu1 %v7637_v20  ;;  %v7658_v10 = vand.u32 4294901760, %v7657_v62  ;;  %v18071_v54 = vpop.f32.mrf.mxu0 }
 0x59f   : > { %14311 = vmatprep.mubr.f32.mxu1 %v17888_v18  ;;  %14248 = vmatprep.subr.mxu0 %v17846_v34  ;;  %v7685_v47 = vsub.f32 %v18048_v43, %v18069_v55 }
 0x5a0   : > { %14297 = vmatprep.subr.mxu1 %v7644_v51  ;;  %14249 = vmatpush3.msra.mxu0 %v17846_v34  ;;  %v7678_v34 = vsub.f32 %v18035_v56, %v18058_v14  ;;  %v18085_v46 = vpop.f32.mrf.mxu0 }
 0x5a1   : > { %14298 = vmatpush3.msra.mxu1 %v7644_v51  ;;  %14250 = vmatprep.subr.mxu0 %v17859_v35  ;;  %v7686_v4 = vand.u32 4294901760, %v7685_v47 }
 0x5a2   : > { %14299 = vmatprep.subr.mxu1 %v7651_v0  ;;  %14251 = vmatpush3.msra.mxu0 %v17859_v35  ;;  %v18083_v35 = vpop.f32.mrf.mxu1  ;;  %v7679_v31 = vand.u32 4294901760, %v7678_v34 }
 0x5a3   : > { %14300 = vmatpush3.msra.mxu1 %v7651_v0  ;;  %14252 = vmatprep.subr.mxu0 %v17863_v11 }
 0x5a4   : > { %14301 = vmatprep.subr.mxu1 %v7658_v10  ;;  %14253 = vmatpush3.msra.mxu0 %v17863_v11  ;;  %v14066_v11 = vpop.f32.mrf.mxu0  ;;  %v18092_v58 = vpop.f32.mrf.mxu1 }
 0x5a5   : > { %14302 = vmatpush3.msra.mxu1 %v7658_v10  ;;  %14255 = vmatmul.mubr.f32.vlgmr.msra.gmra.mxu0 %v17885_v3  ;;  %v6403_v61 = vadd.f32 %v14066_v11, %v12488_v6 }
 0x5a6   : > { %14276 = vmatprep.subr.mxu0 %v17937_v23  ;;  %14303 = vmatprep.subr.mxu1 %v7665_v59  ;;  %v14085_v27 = vpop.f32.mrf.mxu1 }
 0x5a7   : > { %14277 = vmatpush3.msra.mxu0 %v17937_v23  ;;  %14292 = vmatprep.mubr.f32.mxu0 %v17914_v25  ;;  %v6392_v25 = vpop.f32.mrf.mxu0  ;;  %v6520_v50 = vadd.f32 %v14085_v27, %v6403_v61 }
 0x5a8   : > { %14304 = vmatpush3.msra.mxu1 %v7665_v59  ;;  %14278 = vmatprep.subr.mxu0 %v17945_v9  ;;  %v6393_v1 = vadd.f32 %v12488_v6, %v6392_v25  ;;  %v6513_v20 = vpop.f32.mrf.mxu1 }
 0x5a9   : > { %14305 = vmatprep.subr.mxu1 %v7672_v28  ;;  %14279 = vmatpush3.msra.mxu0 %v17945_v9  ;;  %v14104_v45 = vpop.f32.mrf.mxu0 }
 0x5aa   : > { %14306 = vmatpush3.msra.mxu1 %v7672_v28  ;;  %14280 = vmatprep.subr.mxu0 %v17954_v39  ;;  %v14123_v51 = vpop.f32.mrf.mxu1  ;;  %v6615_v0 = vadd.f32 %v14104_v45, %v6520_v50  ;;  %v6514_v8 = vadd.f32 %v6513_v20, %v6393_v1  ;;  %v12487_v50 = vld [vmem:[#allocation18] ss:$0 sm:$0xff] }
 0x5ab   : > { %14307 = vmatprep.subr.mxu1 %v7679_v31  ;;  %14281 = vmatpush3.msra.mxu0 %v17954_v39  ;;  %v6607_v62 = vpop.f32.mrf.mxu0 }
 0x5ac   : > { %14308 = vmatpush3.msra.mxu1 %v7679_v31  ;;  %14282 = vmatprep.subr.mxu0 %v17963_v52  ;;  %v6608_v10 = vadd.f32 %v6607_v62, %v6514_v8  ;;  %v6704_v15 = vadd.f32 %v14123_v51, %v6615_v0  ;;  %v8118_v62 = vld [vmem:[#allocation25 + $0x8] sm:$0xff]  ;;  %v5808_v8 = vadd.f32 %v17993_v53, %v12487_v50 }
 0x5ad   : > { %14309 = vmatprep.subr.mxu1 %v7686_v4  ;;  %14283 = vmatpush3.msra.mxu0 %v17963_v52  ;;  %v18200_v53 = vand.u32 4294901760, %v8118_v62 }
 0x5ae   : > { %14310 = vmatpush3.msra.mxu1 %v7686_v4  ;;  %14284 = vmatprep.subr.mxu0 %v17975_v16 }
 0x5af   : > { %14312 = vmatmul.mubr.f32.vlgmr.msra.gmra.mxu1 %v17885_v3  ;;  %14333 = vmatprep.subr.mxu1 %v17937_v23 }
 0x5b0   : > { %14285 = vmatpush3.msra.mxu0 %v17975_v16  ;;  %14334 = vmatpush3.msra.mxu1 %v17937_v23 }
 0x5b1   : > { %14349 = vmatprep.mubr.f32.mxu1 %v17903_v30  ;;  %14286 = vmatprep.subr.mxu0 %v17991_v26  ;;  %v6695_v30 = vpop.f32.mrf.mxu1 }
 0x5b2   : > { %14335 = vmatprep.subr.mxu1 %v17945_v9  ;;  %14287 = vmatpush3.msra.mxu0 %v17991_v26  ;;  %v6696_v47 = vadd.f32 %v6695_v30, %v6608_v10 }
 0x5b3   : > { %14336 = vmatpush3.msra.mxu1 %v17945_v9  ;;  %14288 = vmatprep.subr.mxu0 %v18005_v29  ;;  %v14161_v59 = vpop.f32.mrf.mxu1 }
 0x5b4   : > { %14337 = vmatprep.subr.mxu1 %v17954_v39  ;;  %14289 = vmatpush3.msra.mxu0 %v18005_v29 }
 0x5b5   : > { %14338 = vmatpush3.msra.mxu1 %v17954_v39  ;;  %14290 = vmatprep.subr.mxu0 %v18019_v63  ;;  %v6883_v6 = vpop.f32.mrf.mxu1 }
 0x5b6   : > { %14339 = vmatprep.subr.mxu1 %v17963_v52  ;;  %14291 = vmatpush3.msra.mxu0 %v18019_v63 }
 0x5b7   : > { %14340 = vmatpush3.msra.mxu1 %v17963_v52  ;;  %14293 = vmatmul.mubr.f32.vlgmr.msra.gmra.mxu0 %v17917_v40  ;;  %v8124_v40 = vld [vmem:[#allocation25 + $0x38] sm:$0xff] }
 0x5b8   : > { %v14142_v34 = vpop.f32.mrf.mxu0  ;;  %14314 = vmatprep.subr.mxu0 %v17950_v60  ;;  %14341 = vmatprep.subr.mxu1 %v17975_v16  ;;  %v18131_v25 = vand.u32 4294901760, %v8124_v40 }
 0x5b9   : > { %v6805_v28 = vadd.f32 %v14142_v34, %v6704_v15  ;;  %14315 = vmatpush3.msra.mxu0 %v17950_v60  ;;  %14330 = vmatprep.mubr.f32.mxu0 %v17895_v7  ;;  %v8123_v7 = vld [vmem:[#allocation25 + $0x30] sm:$0xff] }
 0x5ba   : > { %v6798_v31 = vpop.f32.mrf.mxu0  ;;  %14342 = vmatpush3.msra.mxu1 %v17975_v16  ;;  %14316 = vmatprep.subr.mxu0 %v17961_v24  ;;  %v18137_v61 = vand.u32 4294901760, %v8123_v7  ;;  %v18144_v45 = vsub.f32 %v8124_v40, %v18131_v25 }
 0x5bb   : > { %v6890_v11 = vadd.f32 %v14161_v59, %v6805_v28  ;;  %v6799_v4 = vadd.f32 %v6798_v31, %v6696_v47  ;;  %14343 = vmatprep.subr.mxu1 %v17991_v26  ;;  %14317 = vmatpush3.msra.mxu0 %v17961_v24 }
 0x5bc   : > { %14344 = vmatpush3.msra.mxu1 %v17991_v26  ;;  %14318 = vmatprep.subr.mxu0 %v17973_v32  ;;  %v18162_v20 = vand.u32 4294901760, %v18144_v45 }
 0x5bd   : > { %v12490_v60 = vmul.f32 -1.442695, %v6890_v11  ;;  %v6884_v27 = vadd.f32 %v6883_v6, %v6799_v4  ;;  %14345 = vmatprep.subr.mxu1 %v18005_v29  ;;  %14319 = vmatpush3.msra.mxu0 %v17973_v32  ;;  %v8122_v32 = vld [vmem:[#allocation25 + $0x28] sm:$0xff]  ;;  %v18226_v4 = vsub.f32 %v8118_v62, %v18200_v53 }
 0x5be   : > { %14346 = vmatpush3.msra.mxu1 %v18005_v29  ;;  %14320 = vmatprep.subr.mxu0 %v17985_v13  ;;  %v18148_v1 = vand.u32 4294901760, %v8122_v32 }
 0x5bf   : > { %15187 = vpow2.f32 %v12490_v60  ;;  %v12489_v24 = vmul.f32 -1.442695, %v6884_v27  ;;  %14347 = vmatprep.subr.mxu1 %v18019_v63  ;;  %14321 = vmatpush3.msra.mxu0 %v17985_v13  ;;  %v8121_v13 = vld [vmem:[#allocation25 + $0x20] sm:$0xff] }
 0x5c0   : > { %14348 = vmatpush3.msra.mxu1 %v18019_v63  ;;  %14322 = vmatprep.subr.mxu0 %v18001_v37 }
 0x5c1   : > { %15189 = vpow2.f32 %v12489_v24  ;;  %14350 = vmatmul.mubr.f32.vlgmr.msra.gmra.mxu1 %v17898_v41  ;;  %14371 = vmatprep.subr.mxu1 %v17937_v23  ;;  %v18153_v41 = vsub.f32 %v8123_v7, %v18137_v61 }
 0x5c2   : > { %14323 = vmatpush3.msra.mxu0 %v18001_v37  ;;  %14372 = vmatpush3.msra.mxu1 %v17937_v23  ;;  %v18157_v23 = vand.u32 4294901760, %v8121_v13  ;;  %v8120_v37 = vld [vmem:[#allocation25 + $0x18] sm:$0xff] }
 0x5c3   : > { %14387 = vmatprep.mubr.f32.mxu1 %v17888_v18  ;;  %14324 = vmatprep.subr.mxu0 %v18017_v2  ;;  %v18172_v51 = vand.u32 4294901760, %v18153_v41 }
 0x5c4   : > { %14373 = vmatprep.subr.mxu1 %v17945_v9  ;;  %14325 = vmatpush3.msra.mxu0 %v18017_v2  ;;  %v18167_v2 = vsub.f32 %v8122_v32, %v18148_v1 }
 0x5c5   : > { %14374 = vmatpush3.msra.mxu1 %v17945_v9  ;;  %14326 = vmatprep.subr.mxu0 %v18035_v56  ;;  %v8119_v9 = vld [vmem:[#allocation25 + $0x10] sm:$0xff]  ;;  %v8258_v30 = vsub.f32 %v18153_v41, %v18172_v51 }
 0x5c6   : > { %14375 = vmatprep.subr.mxu1 %v17954_v39  ;;  %14327 = vmatpush3.msra.mxu0 %v18035_v56  ;;  %v18174_v56 = vand.u32 4294901760, %v8120_v37  ;;  %v18185_v0 = vand.u32 4294901760, %v8119_v9 }
 0x5c7   : > { %14376 = vmatpush3.msra.mxu1 %v17954_v39  ;;  %14328 = vmatprep.subr.mxu0 %v18048_v43  ;;  %v18179_v39 = vsub.f32 %v8121_v13, %v18157_v23 }
 0x5c8   : > { %14377 = vmatprep.subr.mxu1 %v17963_v52  ;;  %14329 = vmatpush3.msra.mxu0 %v18048_v43  ;;  %v8251_v43 = vsub.f32 %v18144_v45, %v18162_v20  ;;  %v18198_v15 = vsub.f32 %v8120_v37, %v18174_v56  ;;  %v18211_v28 = vsub.f32 %v8119_v9, %v18185_v0 }
 0x5c9   : > { %14378 = vmatpush3.msra.mxu1 %v17963_v52  ;;  %14331 = vmatmul.mubr.f32.vlgmr.msra.gmra.mxu0 %v17891_v42  ;;  %v18191_v42 = vand.u32 4294901760, %v18167_v2  ;;  %v8117_v52 = vld [vmem:[#allocation25] sm:$0xff]  ;;  %v18206_v59 = vand.u32 4294901760, %v18179_v39 }
 0x5ca   : > { %14352 = vmatprep.subr.mxu0 %v17968_v12  ;;  %14379 = vmatprep.subr.mxu1 %v17975_v16  ;;  %v8252_v34 = vand.u32 4294901760, %v8251_v43  ;;  %v18213_v47 = vand.u32 4294901760, %v8117_v52  ;;  %v18223_v11 = vand.u32 4294901760, %v18198_v15 }
 0x5cb   : > { %14353 = vmatpush3.msra.mxu0 %v17968_v12  ;;  %14368 = vmatprep.mubr.f32.mxu0 %v17888_v18  ;;  %v5798_v12 = vadd.f32 %v12487_v50, %v18023_v57  ;;  %v5925_v57 = vadd.f32 %v18021_v44, %v5808_v8 }
 0x5cc   : > { %v15188_v10 = vpop.eup %15187  ;;  %14380 = vmatpush3.msra.mxu1 %v17975_v16  ;;  %14354 = vmatprep.subr.mxu0 %v17982_v22  ;;  %v18240_v6 = vsub.f32 %v8117_v52, %v18213_v47 }
 0x5cd   : > { %v6900_v18 = vadd.f32 1.0, %v15188_v10  ;;  %14381 = vmatprep.subr.mxu1 %v17991_v26  ;;  %14355 = vmatpush3.msra.mxu0 %v17982_v22  ;;  %v8265_v22 = vsub.f32 %v18167_v2, %v18191_v42  ;;  %v6020_v44 = vadd.f32 %v18037_v21, %v5925_v57  ;;  %v5919_v40 = vadd.f32 %v18050_v49, %v5798_v12  ;;  %v8725_v57 = vld [vmem:[#allocation27 + $0x38] sm:$0xff] }
 0x5ce   : > { %v15190_v16 = vpop.eup %15189  ;;  %14382 = vmatpush3.msra.mxu1 %v17991_v26  ;;  %14356 = vmatprep.subr.mxu0 %v17998_v19  ;;  %v8259_v26 = vand.u32 4294901760, %v8258_v30 }
 0x5cf   : > { %15191 = vrcp.f32 %v6900_v18  ;;  %v6899_v31 = vadd.f32 1.0, %v15190_v16  ;;  %14383 = vmatprep.subr.mxu1 %v18005_v29  ;;  %14357 = vmatpush3.msra.mxu0 %v17998_v19  ;;  %v8272_v19 = vsub.f32 %v18179_v39, %v18206_v59  ;;  %v6013_v21 = vadd.f32 %v18062_v48, %v5919_v40  ;;  %v8720_v40 = vld [vmem:[#allocation27 + $0x10] sm:$0xff] }
 0x5d0   : > { %14384 = vmatpush3.msra.mxu1 %v18005_v29  ;;  %14358 = vmatprep.subr.mxu0 %v18012_v5  ;;  %v18237_v29 = vand.u32 4294901760, %v18211_v28  ;;  %v8266_v49 = vand.u32 4294901760, %v8265_v22  ;;  %v6109_v60 = vadd.f32 %v18060_v36, %v6020_v44  ;;  %v8722_v22 = vld [vmem:[#allocation27 + $0x20] sm:$0xff] }
 0x5d1   : > { %15193 = vrcp.f32 %v6899_v31  ;;  %14385 = vmatprep.subr.mxu1 %v18019_v63  ;;  %14359 = vmatpush3.msra.mxu0 %v18012_v5  ;;  %v8279_v5 = vsub.f32 %v18198_v15, %v18223_v11  ;;  %v8273_v27 = vand.u32 4294901760, %v8272_v19  ;;  %v6101_v24 = vadd.f32 %v18077_v17, %v6013_v21 }
 0x5d2   : > { %14386 = vmatpush3.msra.mxu1 %v18019_v63  ;;  %14360 = vmatprep.subr.mxu0 %v18030_v33  ;;  %v18248_v63 = vand.u32 4294901760, %v18226_v4  ;;  %v8286_v48 = vsub.f32 %v18211_v28, %v18237_v29  ;;  %v6210_v7 = vadd.f32 %v18071_v54, %v6109_v60  ;;  %v18369_v44 = vand.u32 4294901760, %v8722_v22  ;;  %v8718_v60 = vld [vmem:[#allocation27] sm:$0xff] }
 0x5d3   : > { %14388 = vmatmul.mubr.f32.vlgmr.msra.gmra.mxu1 %v17885_v3  ;;  %14409 = vmatprep.subr.mxu1 %v8252_v34  ;;  %v8280_v36 = vand.u32 4294901760, %v8279_v5  ;;  %v6204_v32 = vadd.f32 %v18085_v46, %v6101_v24  ;;  %v18397_v21 = vand.u32 4294901760, %v8720_v40 }
 0x5d4   : > { %14361 = vmatpush3.msra.mxu0 %v18030_v33  ;;  %14410 = vmatpush3.msra.mxu1 %v8252_v34  ;;  %v18256_v33 = vand.u32 4294901760, %v18240_v6  ;;  %v8287_v54 = vand.u32 4294901760, %v8286_v48  ;;  %v6295_v13 = vadd.f32 %v18083_v35, %v6210_v7  ;;  %v18391_v19 = vsub.f32 %v8722_v22, %v18369_v44 }
 0x5d5   : > { %14362 = vmatprep.subr.mxu0 %v18045_v38  ;;  %14411 = vmatprep.subr.mxu1 %v8259_v26  ;;  %v6289_v37 = vadd.f32 %v18092_v58, %v6204_v32  ;;  %v18421_v7 = vsub.f32 %v8720_v40, %v18397_v21 }
 0x5d6   : > { %14363 = vmatpush3.msra.mxu0 %v18045_v38  ;;  %14412 = vmatpush3.msra.mxu1 %v8259_v26  ;;  %v8293_v38 = vsub.f32 %v18226_v4, %v18248_v63  ;;  %v8300_v17 = vsub.f32 %v18240_v6, %v18256_v33 }
 0x5d7   : > { %14364 = vmatprep.subr.mxu0 %v18058_v14  ;;  %14413 = vmatprep.subr.mxu1 %v8266_v49 }
 0x5d8   : > { %14365 = vmatpush3.msra.mxu0 %v18058_v14  ;;  %14414 = vmatpush3.msra.mxu1 %v8266_v49  ;;  %v8294_v46 = vand.u32 4294901760, %v8293_v38  ;;  %v8301_v35 = vand.u32 4294901760, %v8300_v17  ;;  %v18443_v38 = vand.u32 4294901760, %v18421_v7 }
 0x5d9   : > { %14366 = vmatprep.subr.mxu0 %v18069_v55  ;;  %14415 = vmatprep.subr.mxu1 %v8273_v27 }
 0x5da   : > { %14367 = vmatpush3.msra.mxu0 %v18069_v55  ;;  %14416 = vmatpush3.msra.mxu1 %v8273_v27  ;;  %v18416_v27 = vand.u32 4294901760, %v18391_v19 }
 0x5db   : > { %14369 = vmatmul.mubr.f32.vlgmr.msra.gmra.mxu0 %v17885_v3  ;;  %14390 = vmatprep.subr.mxu0 %v18131_v25 }
 0x5dc   : > { %v15192_v14 = vpop.eup %15191  ;;  %14417 = vmatprep.subr.mxu1 %v8280_v36  ;;  %14391 = vmatpush3.msra.mxu0 %v18131_v25 }
 0x5dd   : > { %v6906_v9 = vmul.f32 %v15192_v14, %v6295_v13  ;;  %14418 = vmatpush3.msra.mxu1 %v8280_v36  ;;  %14392 = vmatprep.subr.mxu0 %v18137_v61  ;;  %v8867_v36 = vsub.f32 %v18391_v19, %v18416_v27 }
 0x5de   : > { %v15194_v55 = vpop.eup %15193  ;;  %14419 = vmatprep.subr.mxu1 %v8287_v54  ;;  %14393 = vmatpush3.msra.mxu0 %v18137_v61 }
 0x5df   : > { %v8136_v3 = vsel %vm4501_vm6, %v6906_v9, 0  ;;  %v6905_v50 = vmul.f32 %v15194_v55, %v6289_v37  ;;  %14420 = vmatpush3.msra.mxu1 %v8287_v54  ;;  %14394 = vmatprep.subr.mxu0 %v18148_v1  ;;  %v8868_v17 = vand.u32 4294901760, %v8867_v36 }
 0x5e0   : > { %14421 = vmatprep.subr.mxu1 %v8294_v46  ;;  %14395 = vmatpush3.msra.mxu0 %v18148_v1  ;;  %v18279_v62 = vand.u32 4294901760, %v8136_v3 }
 0x5e1   : > { %v8133_v58 = vsel %vm4501_vm6, %v6905_v50, 0  ;;  %14422 = vmatpush3.msra.mxu1 %v8294_v46  ;;  %14396 = vmatprep.subr.mxu0 %v18157_v23 }
 0x5e2   : > { %14423 = vmatprep.subr.mxu1 %v8301_v35  ;;  %14397 = vmatpush3.msra.mxu0 %v18157_v23  ;;  %v18284_v43 = vand.u32 4294901760, %v8133_v58  ;;  %v18287_v8 = vsub.f32 %v8136_v3, %v18279_v62 }
 0x5e3   : > { %14424 = vmatpush3.msra.mxu1 %v8301_v35  ;;  %14398 = vmatprep.subr.mxu0 %v18174_v56 }
 0x5e4   : > { %14425 = vmatprep.mubr.f32.mxu1 %v18284_v43  ;;  %14447 = vmatprep.subr.mxu1 %v18131_v25  ;;  %v18293_v52 = vsub.f32 %v8133_v58, %v18284_v43  ;;  %v18296_v10 = vand.u32 4294901760, %v18287_v8 }
 0x5e5   : > { %14399 = vmatpush3.msra.mxu0 %v18174_v56  ;;  %14426 = vmatmul.mubr.f32.vlgmr.msra.gmra.mxu1 %v18279_v62 }
 0x5e6   : > { %14448 = vmatpush3.msra.mxu1 %v18131_v25  ;;  %14400 = vmatprep.subr.mxu0 %v18185_v0  ;;  %v18303_v30 = vand.u32 4294901760, %v18293_v52  ;;  %v8224_v18 = vsub.f32 %v18287_v8, %v18296_v10 }
 0x5e7   : > { %14449 = vmatprep.subr.mxu1 %v18137_v61  ;;  %14401 = vmatpush3.msra.mxu0 %v18185_v0 }
 0x5e8   : > { %14450 = vmatpush3.msra.mxu1 %v18137_v61  ;;  %14402 = vmatprep.subr.mxu0 %v18200_v53  ;;  %v8214_v12 = vsub.f32 %v18293_v52, %v18303_v30  ;;  %v18323_v34 = vand.u32 4294901760, %v8224_v18 }
 0x5e9   : > { %14451 = vmatprep.subr.mxu1 %v18148_v1  ;;  %14463 = vmatprep.mubr.f32.mxu1 %v18303_v30 }
 0x5ea   : > { %14403 = vmatpush3.msra.mxu0 %v18200_v53  ;;  %14452 = vmatpush3.msra.mxu1 %v18148_v1  ;;  %v18317_v16 = vand.u32 4294901760, %v8214_v12 }
 0x5eb   : > { %14404 = vmatprep.subr.mxu0 %v18213_v47  ;;  %14453 = vmatprep.subr.mxu1 %v18157_v23 }
 0x5ec   : > { %14405 = vmatpush3.msra.mxu0 %v18213_v47  ;;  %14454 = vmatpush3.msra.mxu1 %v18157_v23 }
 0x5ed   : > { %14406 = vmatprep.mubr.f32.mxu0 %v18317_v16  ;;  %14428 = vmatprep.subr.mxu0 %v18144_v45 }
 0x5ee   : > { %14455 = vmatprep.subr.mxu1 %v18174_v56  ;;  %14407 = vmatmul.mubr.f32.vlgmr.msra.gmra.mxu0 %v18323_v34 }
 0x5ef   : > { %14429 = vmatpush3.msra.mxu0 %v18144_v45  ;;  %14456 = vmatpush3.msra.mxu1 %v18174_v56  ;;  %v18343_v45 = vand.u32 4294901760, %v8725_v57 }
 0x5f0   : > { %14430 = vmatprep.subr.mxu0 %v18153_v41  ;;  %14444 = vmatprep.mubr.f32.mxu0 %v18293_v52 }
 0x5f1   : > { %14457 = vmatprep.subr.mxu1 %v18185_v0  ;;  %14431 = vmatpush3.msra.mxu0 %v18153_v41  ;;  %v8724_v41 = vld [vmem:[#allocation27 + $0x30] sm:$0xff] }
 0x5f2   : > { %14458 = vmatpush3.msra.mxu1 %v18185_v0  ;;  %14432 = vmatprep.subr.mxu0 %v18167_v2  ;;  %v18351_v31 = vand.u32 4294901760, %v8724_v41 }
 0x5f3   : > { %14459 = vmatprep.subr.mxu1 %v18200_v53  ;;  %14433 = vmatpush3.msra.mxu0 %v18167_v2  ;;  %v8723_v2 = vld [vmem:[#allocation27 + $0x28] sm:$0xff] }
 0x5f4   : > { %14460 = vmatpush3.msra.mxu1 %v18200_v53  ;;  %14434 = vmatprep.subr.mxu0 %v18179_v39  ;;  %v18360_v26 = vand.u32 4294901760, %v8723_v2 }
 0x5f5   : > { %14461 = vmatprep.subr.mxu1 %v18213_v47  ;;  %14435 = vmatpush3.msra.mxu0 %v18179_v39  ;;  %v18356_v39 = vsub.f32 %v8725_v57, %v18343_v45 }
 0x5f6   : > { %14462 = vmatpush3.msra.mxu1 %v18213_v47  ;;  %14436 = vmatprep.subr.mxu0 %v18198_v15 }
 0x5f7   : > { %14464 = vmatmul.mubr.f32.vlgmr.msra.gmra.mxu1 %v18296_v10  ;;  %14485 = vmatprep.subr.mxu1 %v18131_v25 }
 0x5f8   : > { %14437 = vmatpush3.msra.mxu0 %v18198_v15  ;;  %14486 = vmatpush3.msra.mxu1 %v18131_v25  ;;  %v8721_v25 = vld [vmem:[#allocation27 + $0x18] sm:$0xff]  ;;  %v18367_v15 = vsub.f32 %v8724_v41, %v18351_v31 }
 0x5f9   : > { %14501 = vmatprep.mubr.f32.mxu1 %v18284_v43  ;;  %14438 = vmatprep.subr.mxu0 %v18211_v28 }
 0x5fa   : > { %14487 = vmatprep.subr.mxu1 %v18137_v61  ;;  %14439 = vmatpush3.msra.mxu0 %v18211_v28  ;;  %v18374_v28 = vand.u32 4294901760, %v18356_v39 }
 0x5fb   : > { %14488 = vmatpush3.msra.mxu1 %v18137_v61  ;;  %14440 = vmatprep.subr.mxu0 %v18226_v4  ;;  %v18379_v61 = vsub.f32 %v8723_v2, %v18360_v26 }
 0x5fc   : > { %14489 = vmatprep.subr.mxu1 %v18148_v1  ;;  %14441 = vmatpush3.msra.mxu0 %v18226_v4  ;;  %v18381_v4 = vand.u32 4294901760, %v8721_v25 }
 0x5fd   : > { %14490 = vmatpush3.msra.mxu1 %v18148_v1  ;;  %14442 = vmatprep.subr.mxu0 %v18240_v6  ;;  %v18388_v1 = vand.u32 4294901760, %v18367_v15  ;;  %v18402_v49 = vand.u32 4294901760, %v18379_v61 }
 0x5fe   : > { %14491 = vmatprep.subr.mxu1 %v18157_v23  ;;  %14443 = vmatpush3.msra.mxu0 %v18240_v6  ;;  %v8719_v6 = vld [vmem:[#allocation27 + $0x8] sm:$0xff]  ;;  %v18405_v5 = vsub.f32 %v8721_v25, %v18381_v4 }
 0x5ff   : > { %14492 = vmatpush3.msra.mxu1 %v18157_v23  ;;  %14445 = vmatmul.mubr.f32.vlgmr.msra.gmra.mxu0 %v18287_v8  ;;  %v8846_v23 = vsub.f32 %v18356_v39, %v18374_v28 }
 0x600   : > { %14466 = vmatprep.subr.mxu0 %v18162_v20  ;;  %14493 = vmatprep.subr.mxu1 %v18174_v56  ;;  %v18430_v24 = vand.u32 4294901760, %v18405_v5 }
 0x601   : > { %14467 = vmatpush3.msra.mxu0 %v18162_v20  ;;  %14482 = vmatprep.mubr.f32.mxu0 %v18284_v43  ;;  %v18409_v20 = vand.u32 4294901760, %v8719_v6  ;;  %v8847_v48 = vand.u32 4294901760, %v8846_v23 }
 0x602   : > { %14494 = vmatpush3.msra.mxu1 %v18174_v56  ;;  %14468 = vmatprep.subr.mxu0 %v18172_v51  ;;  %v8853_v56 = vsub.f32 %v18367_v15, %v18388_v1 }
 0x603   : > { %14495 = vmatprep.subr.mxu1 %v18185_v0  ;;  %14469 = vmatpush3.msra.mxu0 %v18172_v51  ;;  %v18423_v51 = vand.u32 4294901760, %v8718_v60 }
 0x604   : > { %14496 = vmatpush3.msra.mxu1 %v18185_v0  ;;  %14470 = vmatprep.subr.mxu0 %v18191_v42  ;;  %v8860_v0 = vsub.f32 %v18379_v61, %v18402_v49 }
 0x605   : > { %14497 = vmatprep.subr.mxu1 %v18200_v53  ;;  %14471 = vmatpush3.msra.mxu0 %v18191_v42  ;;  %v18435_v42 = vsub.f32 %v8719_v6, %v18409_v20  ;;  %v18446_v32 = vsub.f32 %v8718_v60, %v18423_v51 }
 0x606   : > { %14498 = vmatpush3.msra.mxu1 %v18200_v53  ;;  %14472 = vmatprep.subr.mxu0 %v18206_v59  ;;  %v8854_v53 = vand.u32 4294901760, %v8853_v56 }
 0x607   : > { %14499 = vmatprep.subr.mxu1 %v18213_v47  ;;  %14473 = vmatpush3.msra.mxu0 %v18206_v59  ;;  %v8861_v59 = vand.u32 4294901760, %v8860_v0  ;;  %v18454_v54 = vand.u32 4294901760, %v18435_v42  ;;  %v18461_v13 = vand.u32 4294901760, %v18446_v32 }
 0x608   : > { %14500 = vmatpush3.msra.mxu1 %v18213_v47  ;;  %14474 = vmatprep.subr.mxu0 %v18223_v11  ;;  %v8874_v47 = vsub.f32 %v18405_v5, %v18430_v24 }
 0x609   : > { %14502 = vmatmul.mubr.f32.vlgmr.msra.gmra.mxu1 %v18279_v62  ;;  %14523 = vmatprep.subr.mxu1 %v8847_v48  ;;  %v8895_v37 = vsub.f32 %v18446_v32, %v18461_v13 }
 0x60a   : > { %14475 = vmatpush3.msra.mxu0 %v18223_v11  ;;  %14524 = vmatpush3.msra.mxu1 %v8847_v48  ;;  %v8881_v11 = vsub.f32 %v18421_v7, %v18443_v38  ;;  %v8875_v14 = vand.u32 4294901760, %v8874_v47 }
 0x60b   : > { %14539 = vmatprep.mubr.f32.mxu1 %v18284_v43  ;;  %14476 = vmatprep.subr.mxu0 %v18237_v29 }
 0x60c   : > { %14525 = vmatprep.subr.mxu1 %v8854_v53  ;;  %14477 = vmatpush3.msra.mxu0 %v18237_v29  ;;  %v8888_v29 = vsub.f32 %v18435_v42, %v18454_v54  ;;  %v8882_v46 = vand.u32 4294901760, %v8881_v11 }
 0x60d   : > { %14526 = vmatpush3.msra.mxu1 %v8854_v53  ;;  %14478 = vmatprep.subr.mxu0 %v18248_v63 }
 0x60e   : > { %14527 = vmatprep.subr.mxu1 %v8861_v59  ;;  %14479 = vmatpush3.msra.mxu0 %v18248_v63  ;;  %v8889_v63 = vand.u32 4294901760, %v8888_v29 }
 0x60f   : > { %14528 = vmatpush3.msra.mxu1 %v8861_v59  ;;  %14480 = vmatprep.subr.mxu0 %v18256_v33 }
 0x610   : > { %14529 = vmatprep.subr.mxu1 %v8868_v17  ;;  %14481 = vmatpush3.msra.mxu0 %v18256_v33  ;;  %v8896_v33 = vand.u32 4294901760, %v8895_v37 }
 0x611   : > { %14530 = vmatpush3.msra.mxu1 %v8868_v17  ;;  %14483 = vmatmul.mubr.f32.vlgmr.msra.gmra.mxu0 %v18279_v62 }
 0x612   : > { %14504 = vmatprep.subr.mxu0 %v18343_v45  ;;  %14531 = vmatprep.subr.mxu1 %v8875_v14 }
 0x613   : > { %14505 = vmatpush3.msra.mxu0 %v18343_v45  ;;  %14520 = vmatprep.mubr.f32.mxu0 %v18317_v16  ;;  %v12492_v16 = vld [vmem:[%s19060_s23] ss:$0 sm:$0xff] }
 0x614   : > { %14532 = vmatpush3.msra.mxu1 %v8875_v14  ;;  %14506 = vmatprep.subr.mxu0 %v18351_v31 }
 0x615   : > { %14533 = vmatprep.subr.mxu1 %v8882_v46  ;;  %14507 = vmatpush3.msra.mxu0 %v18351_v31 }
 0x616   : > { %14534 = vmatpush3.msra.mxu1 %v8882_v46  ;;  %14508 = vmatprep.subr.mxu0 %v18360_v26 }
 0x617   : > { %14535 = vmatprep.subr.mxu1 %v8889_v63  ;;  %14509 = vmatpush3.msra.mxu0 %v18360_v26 }
 0x618   : > { %14536 = vmatpush3.msra.mxu1 %v8889_v63  ;;  %14510 = vmatprep.subr.mxu0 %v18369_v44 }
 0x619   : > { %14537 = vmatprep.subr.mxu1 %v8896_v33  ;;  %14511 = vmatpush3.msra.mxu0 %v18369_v44 }
 0x61a   : > { %14538 = vmatpush3.msra.mxu1 %v8896_v33  ;;  %14512 = vmatprep.subr.mxu0 %v18381_v4 }
 0x61b   : > { %14540 = vmatmul.mubr.f32.vlgmr.msra.gmra.mxu1 %v18279_v62  ;;  %14561 = vmatprep.subr.mxu1 %v18343_v45 }
 0x61c   : > { %14513 = vmatpush3.msra.mxu0 %v18381_v4  ;;  %14562 = vmatpush3.msra.mxu1 %v18343_v45 }
 0x61d   : > { %14577 = vmatprep.mubr.f32.mxu1 %v18303_v30  ;;  %14514 = vmatprep.subr.mxu0 %v18397_v21 }
 0x61e   : > { %14563 = vmatprep.subr.mxu1 %v18351_v31  ;;  %14515 = vmatpush3.msra.mxu0 %v18397_v21 }
 0x61f   : > { %14564 = vmatpush3.msra.mxu1 %v18351_v31  ;;  %14516 = vmatprep.subr.mxu0 %v18409_v20 }
 0x620   : > { %14565 = vmatprep.subr.mxu1 %v18360_v26  ;;  %14517 = vmatpush3.msra.mxu0 %v18409_v20 }
 0x621   : > { %14566 = vmatpush3.msra.mxu1 %v18360_v26  ;;  %14518 = vmatprep.subr.mxu0 %v18423_v51 }
 0x622   : > { %14567 = vmatprep.subr.mxu1 %v18369_v44  ;;  %14519 = vmatpush3.msra.mxu0 %v18423_v51 }
 0x623   : > { %14568 = vmatpush3.msra.mxu1 %v18369_v44  ;;  %14521 = vmatmul.mubr.f32.vlgmr.msra.gmra.mxu0 %v18323_v34 }
 0x624   : > { %14542 = vmatprep.subr.mxu0 %v18356_v39  ;;  %14569 = vmatprep.subr.mxu1 %v18381_v4 }
 0x625   : > { %14543 = vmatpush3.msra.mxu0 %v18356_v39  ;;  %14558 = vmatprep.mubr.f32.mxu0 %v18293_v52 }
 0x626   : > { %14570 = vmatpush3.msra.mxu1 %v18381_v4  ;;  %14544 = vmatprep.subr.mxu0 %v18367_v15 }
 0x627   : > { %14571 = vmatprep.subr.mxu1 %v18397_v21  ;;  %14545 = vmatpush3.msra.mxu0 %v18367_v15 }
 0x628   : > { %14572 = vmatpush3.msra.mxu1 %v18397_v21  ;;  %14546 = vmatprep.subr.mxu0 %v18379_v61 }
 0x629   : > { %14573 = vmatprep.subr.mxu1 %v18409_v20  ;;  %14547 = vmatpush3.msra.mxu0 %v18379_v61 }
 0x62a   : > { %14574 = vmatpush3.msra.mxu1 %v18409_v20  ;;  %14548 = vmatprep.subr.mxu0 %v18391_v19 }
 0x62b   : > { %14575 = vmatprep.subr.mxu1 %v18423_v51  ;;  %14549 = vmatpush3.msra.mxu0 %v18391_v19 }
 0x62c   : > { %14576 = vmatpush3.msra.mxu1 %v18423_v51  ;;  %14550 = vmatprep.subr.mxu0 %v18405_v5 }
 0x62d   : > { %14578 = vmatmul.mubr.f32.vlgmr.msra.gmra.mxu1 %v18296_v10  ;;  %14599 = vmatprep.subr.mxu1 %v18343_v45 }
 0x62e   : > { %14551 = vmatpush3.msra.mxu0 %v18405_v5  ;;  %14600 = vmatpush3.msra.mxu1 %v18343_v45 }
 0x62f   : > { %14615 = vmatprep.mubr.f32.mxu1 %v18284_v43  ;;  %14552 = vmatprep.subr.mxu0 %v18421_v7 }
 0x630   : > { %14601 = vmatprep.subr.mxu1 %v18351_v31  ;;  %14553 = vmatpush3.msra.mxu0 %v18421_v7 }
 0x631   : > { %14602 = vmatpush3.msra.mxu1 %v18351_v31  ;;  %14554 = vmatprep.subr.mxu0 %v18435_v42 }
 0x632   : > { %14603 = vmatprep.subr.mxu1 %v18360_v26  ;;  %14555 = vmatpush3.msra.mxu0 %v18435_v42 }
 0x633   : > { %14604 = vmatpush3.msra.mxu1 %v18360_v26  ;;  %14556 = vmatprep.subr.mxu0 %v18446_v32 }
 0x634   : > { %14605 = vmatprep.subr.mxu1 %v18369_v44  ;;  %14557 = vmatpush3.msra.mxu0 %v18446_v32 }
 0x635   : > { %14606 = vmatpush3.msra.mxu1 %v18369_v44  ;;  %14559 = vmatmul.mubr.f32.vlgmr.msra.gmra.mxu0 %v18287_v8 }
 0x636   : > { %14580 = vmatprep.subr.mxu0 %v18374_v28  ;;  %14607 = vmatprep.subr.mxu1 %v18381_v4 }
 0x637   : > { %14581 = vmatpush3.msra.mxu0 %v18374_v28  ;;  %14596 = vmatprep.mubr.f32.mxu0 %v18284_v43 }
 0x638   : > { %14608 = vmatpush3.msra.mxu1 %v18381_v4  ;;  %14582 = vmatprep.subr.mxu0 %v18388_v1 }
 0x639   : > { %14609 = vmatprep.subr.mxu1 %v18397_v21  ;;  %14583 = vmatpush3.msra.mxu0 %v18388_v1 }
 0x63a   : > { %14610 = vmatpush3.msra.mxu1 %v18397_v21  ;;  %14584 = vmatprep.subr.mxu0 %v18402_v49  ;;  %v14199_v55 = vpop.f32.mrf.mxu1 }
 0x63b   : > { %14611 = vmatprep.subr.mxu1 %v18409_v20  ;;  %14585 = vmatpush3.msra.mxu0 %v18402_v49 }
 0x63c   : > { %14612 = vmatpush3.msra.mxu1 %v18409_v20  ;;  %14586 = vmatprep.subr.mxu0 %v18416_v27  ;;  %v7128_v50 = vpop.f32.mrf.mxu1  ;;  %v12491_v20 = vld [vmem:[%s19061_s7] ss:$0 sm:$0xff] }
 0x63d   : > { %14613 = vmatprep.subr.mxu1 %v18423_v51  ;;  %14587 = vmatpush3.msra.mxu0 %v18416_v27 }
 0x63e   : > { %14614 = vmatpush3.msra.mxu1 %v18423_v51  ;;  %14588 = vmatprep.subr.mxu0 %v18430_v24 }
 0x63f   : > { %14616 = vmatmul.mubr.f32.vlgmr.msra.gmra.mxu1 %v18279_v62  ;;  %14589 = vmatpush3.msra.mxu0 %v18430_v24 }
 0x640   : > { %14590 = vmatprep.subr.mxu0 %v18443_v38 }
 0x641   : > { %14591 = vmatpush3.msra.mxu0 %v18443_v38 }
 0x642   : > { %14592 = vmatprep.subr.mxu0 %v18454_v54  ;;  %v14180_v9 = vpop.f32.mrf.mxu0 }
 0x643   : > { %14593 = vmatpush3.msra.mxu0 %v18454_v54  ;;  %v7018_v56 = vadd.f32 %v14180_v9, %v12491_v20 }
 0x644   : > { %14594 = vmatprep.subr.mxu0 %v18461_v13  ;;  %v7007_v35 = vpop.f32.mrf.mxu0 }
 0x645   : > { %14595 = vmatpush3.msra.mxu0 %v18461_v13  ;;  %v7008_v48 = vadd.f32 %v12491_v20, %v7007_v35  ;;  %v7135_v0 = vadd.f32 %v14199_v55, %v7018_v56 }
 0x646   : > { %14597 = vmatmul.mubr.f32.vlgmr.msra.gmra.mxu0 %v18279_v62 }
 0x647   : > { %v7129_v53 = vadd.f32 %v7128_v50, %v7008_v48 }
 0x64b   : > { %v14237_v58 = vpop.f32.mrf.mxu1 }
 0x64d   : > { %v7310_v52 = vpop.f32.mrf.mxu1 }
 0x653   : > { %v14218_v3 = vpop.f32.mrf.mxu0 }
 0x654   : > { %v7230_v42 = vadd.f32 %v14218_v3, %v7135_v0 }
 0x655   : > { %v7222_v43 = vpop.f32.mrf.mxu0 }
 0x656   : > { %v7223_v36 = vadd.f32 %v7222_v43, %v7129_v53  ;;  %v7319_v38 = vadd.f32 %v14237_v58, %v7230_v42 }
 0x658   : > { %v7311_v59 = vadd.f32 %v7310_v52, %v7223_v36 }
 0x65d   : > { %v14275_v10 = vpop.f32.mrf.mxu1 }
 0x65f   : > { %v7498_v18 = vpop.f32.mrf.mxu1 }
 0x665   : > { %v14256_v8 = vpop.f32.mrf.mxu0 }
 0x666   : > { %v7420_v32 = vadd.f32 %v14256_v8, %v7319_v38 }
 0x667   : > { %v7413_v30 = vpop.f32.mrf.mxu0 }
 0x668   : > { %v7414_v47 = vadd.f32 %v7413_v30, %v7311_v59  ;;  %v7505_v54 = vadd.f32 %v14275_v10, %v7420_v32 }
 0x66a   : > { %v7499_v11 = vadd.f32 %v7498_v18, %v7414_v47 }
 0x66f   : > { %v14313_v34 = vpop.f32.mrf.mxu1 }
 0x671   : > { %v7723_v62 = vpop.f32.mrf.mxu1 }
 0x677   : > { %v14294_v12 = vpop.f32.mrf.mxu0 }
 0x678   : > { %v7613_v45 = vadd.f32 %v14294_v12, %v12492_v16  ;;  %v12496_v12 = vld [vmem:[%s19062_s0] ss:$0 sm:$0xff] }
 0x679   : > { %v7602_v57 = vpop.f32.mrf.mxu0 }
 0x67a   : > { %v7603_v2 = vadd.f32 %v12492_v16, %v7602_v57  ;;  %v7730_v31 = vadd.f32 %v14313_v34, %v7613_v45 }
 0x67c   : > { %v7724_v25 = vadd.f32 %v7723_v62, %v7603_v2 }
 0x681   : > { %v14351_v39 = vpop.f32.mrf.mxu1 }
 0x683   : > { %v7905_v44 = vpop.f32.mrf.mxu1 }
 0x689   : > { %v14332_v41 = vpop.f32.mrf.mxu0 }
 0x68a   : > { %v7825_v26 = vadd.f32 %v14332_v41, %v7730_v31 }
 0x68b   : > { %v7817_v22 = vpop.f32.mrf.mxu0 }
 0x68c   : > { %v7818_v15 = vadd.f32 %v7817_v22, %v7724_v25  ;;  %v7914_v28 = vadd.f32 %v14351_v39, %v7825_v26 }
 0x68e   : > { %v7906_v1 = vadd.f32 %v7905_v44, %v7818_v15 }
 0x693   : > { %v14389_v61 = vpop.f32.mrf.mxu1 }
 0x695   : > { %v8093_v21 = vpop.f32.mrf.mxu1 }
 0x69b   : > { %v14370_v4 = vpop.f32.mrf.mxu0 }
 0x69c   : > { %v8015_v40 = vadd.f32 %v14370_v4, %v7914_v28 }
 0x69d   : > { %v8008_v19 = vpop.f32.mrf.mxu0 }
 0x69e   : > { %v8100_v6 = vadd.f32 %v14389_v61, %v8015_v40  ;;  %v8009_v23 = vadd.f32 %v8008_v19, %v7906_v1 }
 0x6a0   : > { %v12494_v49 = vmul.f32 -1.442695, %v8100_v6  ;;  %v8094_v5 = vadd.f32 %v8093_v21, %v8009_v23 }
 0x6a2   : > { %15195 = vpow2.f32 %v12494_v49  ;;  %v12493_v60 = vmul.f32 -1.442695, %v8094_v5 }
 0x6a4   : > { %15197 = vpow2.f32 %v12493_v60  ;;  %v12495_v60 = vld [vmem:[%s19063_s2] ss:$0 sm:$0xff] }
 0x6a5   : > { %v14427_v33 = vpop.f32.mrf.mxu1 }
 0x6a7   : > { %v8338_v35 = vpop.f32.mrf.mxu1 }
 0x6ae   : > { %v14408_v63 = vpop.f32.mrf.mxu0 }
 0x6af   : > { %v15196_v27 = vpop.eup %15195  ;;  %v8228_v48 = vadd.f32 %v14408_v63, %v12495_v60 }
 0x6b0   : > { %v8110_v7 = vadd.f32 1.0, %v15196_v27  ;;  %v8217_v9 = vpop.f32.mrf.mxu0 }
 0x6b1   : > { %v15198_v51 = vpop.eup %15197  ;;  %v8218_v20 = vadd.f32 %v12495_v60, %v8217_v9  ;;  %v8345_v0 = vadd.f32 %v14427_v33, %v8228_v48  ;;  %v9413_v60 = vld [vmem:[#allocation28 + $0x8] sm:$0xff] }
 0x6b2   : > { %15199 = vrcp.f32 %v8110_v7  ;;  %v8109_v24 = vadd.f32 1.0, %v15198_v51 }
 0x6b3   : > { %v8339_v51 = vadd.f32 %v8338_v35, %v8218_v20 }
 0x6b4   : > { %15201 = vrcp.f32 %v8109_v24 }
 0x6b7   : > { %v14465_v3 = vpop.f32.mrf.mxu1 }
 0x6b9   : > { %v8520_v43 = vpop.f32.mrf.mxu1 }
 0x6bf   : > { %v15200_v17 = vpop.eup %15199  ;;  %v14446_v55 = vpop.f32.mrf.mxu0 }
 0x6c0   : > { %v18564_v13 = vmul.f32 %v15200_v17, %v7505_v54  ;;  %v8440_v42 = vadd.f32 %v14446_v55, %v8345_v0 }
 0x6c1   : > { %v15202_v14 = vpop.eup %15201  ;;  %v8432_v50 = vpop.f32.mrf.mxu0 }
 0x6c2   : > { %9331 = vrot.lane.b32.xlu1 %v18564_v13, %s15921_s4  ;;  %v18567_v29 = vmul.f32 %v15202_v14, %v7499_v11  ;;  %v9338_v37 = vmul.f32 2.0, %v18564_v13  ;;  %v8433_v24 = vadd.f32 %v8432_v50, %v8339_v51  ;;  %v8529_v36 = vadd.f32 %v14465_v3, %v8440_v42  ;;  %v9412_v51 = vld [vmem:[#allocation28] sm:$0xff] }
 0x6c4   : > { %9329 = vrot.lane.b32.xlu0 %v18567_v29, %s15921_s4  ;;  %v9337_v46 = vmul.f32 2.0, %v18567_v29  ;;  %v8521_v53 = vadd.f32 %v8520_v43, %v8433_v24 }
 0x6c6   : > { %9341 = vrot.lane.b32.xlu1 %v9337_v46, %s15922_s1 }
 0x6c9   : > { %v14503_v8 = vpop.f32.mrf.mxu1 }
 0x6ca   : > { %9343 = vrot.lane.b32.xlu1 %v9338_v37, %s15922_s1 }
 0x6cb   : > { %v8708_v30 = vpop.f32.mrf.mxu1 }
 0x6d1   : > { %v14484_v58 = vpop.f32.mrf.mxu0 }
 0x6d2   : > { %v8630_v32 = vadd.f32 %v14484_v58, %v8529_v36 }
 0x6d3   : > { %v8623_v52 = vpop.f32.mrf.mxu0 }
 0x6d4   : > { %v8624_v38 = vadd.f32 %v8623_v52, %v8521_v53  ;;  %v8715_v17 = vadd.f32 %v14503_v8, %v8630_v32  ;;  %v18662_v53 = vand.u32 4294901760, %v9412_v51 }
 0x6d6   : > { %v8709_v47 = vadd.f32 %v8708_v30, %v8624_v38 }
 0x6db   : > { %v14541_v18 = vpop.f32.mrf.mxu1 }
 0x6dd   : > { %v8933_v41 = vpop.f32.mrf.mxu1 }
 0x6e3   : > { %v14522_v10 = vpop.f32.mrf.mxu0 }
 0x6e4   : > { %v8823_v34 = vadd.f32 %v14522_v10, %v12496_v12 }
 0x6e5   : > { %v8812_v16 = vpop.f32.mrf.mxu0 }
 0x6e6   : > { %v8813_v45 = vadd.f32 %v12496_v12, %v8812_v16  ;;  %v8940_v2 = vadd.f32 %v14541_v18, %v8823_v34  ;;  %v9419_v18 = vld [vmem:[#allocation28 + $0x38] sm:$0xff]  ;;  %v9418_v34 = vld [vmem:[#allocation28 + $0x30] sm:$0xff] }
 0x6e7   : > { %v18588_v16 = vand.u32 4294901760, %v9419_v18 }
 0x6e8   : > { %v8934_v22 = vadd.f32 %v8933_v41, %v8813_v45  ;;  %v18593_v45 = vand.u32 4294901760, %v9418_v34  ;;  %v9417_v41 = vld [vmem:[#allocation28 + $0x28] sm:$0xff] }
 0x6e9   : > { %14618 = vmatprep.subr.mxu0 %v18588_v16 }
 0x6ea   : > { %14619 = vmatpush3.msra.mxu0 %v18588_v16 }
 0x6eb   : > { %14620 = vmatprep.subr.mxu0 %v18593_v45 }
 0x6ec   : > { %14621 = vmatpush3.msra.mxu0 %v18593_v45 }
 0x6ed   : > { %v14579_v62 = vpop.f32.mrf.mxu1 }
 0x6ef   : > { %v9115_v25 = vpop.f32.mrf.mxu1 }
 0x6f5   : > { %v14560_v57 = vpop.f32.mrf.mxu0 }
 0x6f6   : > { %v9035_v39 = vadd.f32 %v14560_v57, %v8940_v2  ;;  %v18591_v57 = vsub.f32 %v9419_v18, %v18588_v16 }
 0x6f7   : > { %v9027_v31 = vpop.f32.mrf.mxu0 }
 0x6f8   : > { %v9028_v26 = vadd.f32 %v9027_v31, %v8934_v22  ;;  %v9124_v15 = vadd.f32 %v14579_v62, %v9035_v39  ;;  %v18598_v2 = vand.u32 4294901760, %v18591_v57  ;;  %v18601_v62 = vsub.f32 %v9418_v34, %v18593_v45  ;;  %v9416_v39 = vld [vmem:[#allocation28 + $0x20] sm:$0xff] }
 0x6f9   : > { %v18603_v31 = vand.u32 4294901760, %v9417_v41 }
 0x6fa   : > { %v9116_v4 = vadd.f32 %v9115_v25, %v9028_v26  ;;  %v9539_v22 = vsub.f32 %v18591_v57, %v18598_v2  ;;  %v18610_v26 = vand.u32 4294901760, %v18601_v62 }
 0x6fb   : > { %v18613_v25 = vsub.f32 %v9417_v41, %v18603_v31  ;;  %14622 = vmatprep.subr.mxu0 %v18603_v31 }
 0x6fc   : > { %14623 = vmatpush3.msra.mxu0 %v18603_v31 }
 0x6ff   : > { %v14617_v44 = vpop.f32.mrf.mxu1 }
 0x701   : > { %v9303_v6 = vpop.f32.mrf.mxu1 }
 0x706   : > { %v14598_v28 = vpop.f32.mrf.mxu0 }
 0x707   : > { %v9225_v61 = vadd.f32 %v14598_v28, %v9124_v15  ;;  %v18615_v15 = vand.u32 4294901760, %v9416_v39  ;;  %v9540_v28 = vand.u32 4294901760, %v9539_v22 }
 0x708   : > { %v9218_v40 = vpop.f32.mrf.mxu0 }
 0x709   : > { %v9310_v1 = vadd.f32 %v14617_v44, %v9225_v61  ;;  %v9219_v19 = vadd.f32 %v9218_v40, %v9116_v4  ;;  %v9415_v44 = vld [vmem:[#allocation28 + $0x18] sm:$0xff]  ;;  %v9546_v61 = vsub.f32 %v18601_v62, %v18610_v26  ;;  %v18622_v4 = vand.u32 4294901760, %v18613_v25  ;;  %14624 = vmatprep.subr.mxu0 %v18615_v15  ;;  %14637 = vmatprep.subr.mxu1 %v9540_v28 }
 0x70a   : > { %v18626_v40 = vsub.f32 %v9416_v39, %v18615_v15  ;;  %14625 = vmatpush3.msra.mxu0 %v18615_v15  ;;  %14638 = vmatpush3.msra.mxu1 %v9540_v28 }
 0x70b   : > { %v12498_v23 = vmul.f32 -1.442695, %v9310_v1  ;;  %v9304_v21 = vadd.f32 %v9303_v6, %v9219_v19  ;;  %v18628_v1 = vand.u32 4294901760, %v9415_v44  ;;  %v9414_v19 = vld [vmem:[#allocation28 + $0x10] sm:$0xff]  ;;  %v9547_v6 = vand.u32 4294901760, %v9546_v61 }
 0x70d   : > { %15203 = vpow2.f32 %v12498_v23  ;;  %v12497_v49 = vmul.f32 -1.442695, %v9304_v21  ;;  %v9553_v23 = vsub.f32 %v18613_v25, %v18622_v4  ;;  %v18633_v21 = vand.u32 4294901760, %v9414_v19  ;;  %14626 = vmatprep.subr.mxu0 %v18628_v1  ;;  %14639 = vmatprep.subr.mxu1 %v9547_v6 }
 0x70e   : > { %14627 = vmatpush3.msra.mxu0 %v18628_v1  ;;  %14640 = vmatpush3.msra.mxu1 %v9547_v6 }
 0x70f   : > { %15205 = vpow2.f32 %v12497_v49  ;;  %v18636_v49 = vand.u32 4294901760, %v18626_v40  ;;  %v9554_v20 = vand.u32 4294901760, %v9553_v23  ;;  %14628 = vmatprep.subr.mxu0 %v18633_v21 }
 0x710   : > { %14629 = vmatpush3.msra.mxu0 %v18633_v21 }
 0x711   : > { %v9560_v48 = vsub.f32 %v18626_v40, %v18636_v49  ;;  %14641 = vmatprep.subr.mxu1 %v9554_v20 }
 0x712   : > { %14642 = vmatpush3.msra.mxu1 %v9554_v20 }
 0x713   : > { %v9561_v38 = vand.u32 4294901760, %v9560_v48 }
 0x715   : > { %14643 = vmatprep.subr.mxu1 %v9561_v38 }
 0x716   : > { %14644 = vmatpush3.msra.mxu1 %v9561_v38 }
 0x71a   : > { %v15204_v5 = vpop.eup %15203 }
 0x71b   : > { %v9320_v56 = vadd.f32 1.0, %v15204_v5  ;;  %v18639_v5 = vsub.f32 %v9415_v44, %v18628_v1 }
 0x71c   : > { %v15206_v27 = vpop.eup %15205 }
 0x71d   : > { %v9319_v7 = vadd.f32 1.0, %v15206_v27  ;;  %15207 = vrcp.f32 %v9320_v56  ;;  %v18643_v56 = vsub.f32 %v9414_v19, %v18633_v21  ;;  %v18645_v27 = vand.u32 4294901760, %v9413_v60 }
 0x71f   : > { %15209 = vrcp.f32 %v9319_v7  ;;  %v18651_v7 = vand.u32 4294901760, %v18639_v5  ;;  %v18657_v24 = vand.u32 4294901760, %v18643_v56  ;;  %v18660_v42 = vsub.f32 %v9413_v60, %v18645_v27  ;;  %14630 = vmatprep.subr.mxu0 %v18645_v27 }
 0x720   : > { %14631 = vmatpush3.msra.mxu0 %v18645_v27 }
 0x721   : > { %v9567_v32 = vsub.f32 %v18639_v5, %v18651_v7  ;;  %14632 = vmatprep.subr.mxu0 %v18662_v53 }
 0x722   : > { %14633 = vmatpush3.msra.mxu0 %v18662_v53 }
 0x723   : > { %14656 = vmatprep.subr.mxu0 %v18591_v57 }
 0x72a   : > { %v15208_v59 = vpop.eup %15207 }
 0x72b   : > { %v9326_v46 = vmul.f32 %v15208_v59, %v8715_v17  ;;  %v9574_v59 = vsub.f32 %v18643_v56, %v18657_v24  ;;  %v9568_v17 = vand.u32 4294901760, %v9567_v32 }
 0x72c   : > { %v15210_v54 = vpop.eup %15209 }
 0x72d   : > { %v9325_v11 = vmul.f32 %v15210_v54, %v8709_v47  ;;  %v9356_v37 = vmul.f32 2.0, %v9326_v46  ;;  %v18671_v47 = vand.u32 4294901760, %v18660_v42  ;;  %14645 = vmatprep.subr.mxu1 %v9568_v17 }
 0x72e   : > { %14646 = vmatpush3.msra.mxu1 %v9568_v17 }
 0x72f   : > { %v9355_v14 = vmul.f32 2.0, %v9325_v11  ;;  %v18677_v11 = vsub.f32 %v9412_v51, %v18662_v53 }
 0x731   : > { %9359 = vrot.lane.b32.xlu0 %v9355_v14, %s15922_s1 }
 0x734   : > { %v18577_v63 = vpop.permute.xlu1 %9331 }
 0x735   : > { %9361 = vrot.lane.b32.xlu0 %v9356_v37, %s15922_s1  ;;  %v9336_v50 = vadd.f32 %v18577_v63, %v18564_v13  ;;  %v9354_v54 = vsub.f32 %v18564_v13, %v18577_v63  ;;  %v9575_v37 = vand.u32 4294901760, %v9574_v59  ;;  %v18684_v13 = vand.u32 4294901760, %v18677_v11 }
 0x736   : > { %v18580_v33 = vpop.permute.xlu0 %9329 }
 0x737   : > { %v9335_v9 = vadd.f32 %v18580_v33, %v18567_v29  ;;  %v9353_v0 = vsub.f32 %v18567_v29, %v18580_v33  ;;  %v9581_v33 = vsub.f32 %v18660_v42, %v18671_v47  ;;  %14647 = vmatprep.subr.mxu1 %v9575_v37 }
 0x738   : > { %v9342_v55 = vpop.permute.xlu1 %9341  ;;  %14648 = vmatpush3.msra.mxu1 %v9575_v37 }
 0x739   : > { %v9347_v35 = vadd.f32 %v9342_v55, %v9335_v9  ;;  %v9380_v3 = vsub.f32 %v9335_v9, %v9342_v55  ;;  %v9582_v55 = vand.u32 4294901760, %v9581_v33 }
 0x73b   : > { %v9349_v58 = vmul.f32 0.25, %v9347_v35  ;;  %v9382_v43 = vmul.f32 0.25, %v9380_v3  ;;  %v9588_v35 = vsub.f32 %v18677_v11, %v18684_v13  ;;  %14649 = vmatprep.subr.mxu1 %v9582_v55 }
 0x73c   : > { %v9344_v8 = vpop.permute.xlu1 %9343  ;;  %14650 = vmatpush3.msra.mxu1 %v9582_v55 }
 0x73d   : > { %9351 = vst.msk [vmem:[#allocation4] sm:$0xff] %vm1424_vm0, %v9349_v58  ;;  %v9348_v52 = vadd.f32 %v9344_v8, %v9336_v50  ;;  %v9381_v10 = vsub.f32 %v9336_v50, %v9344_v8  ;;  %9386 = vrot.lane.b32.xlu0 %v9382_v43, %s15923_s18  ;;  %v9589_v43 = vand.u32 4294901760, %v9588_v35 }
 0x73f   : > { %v9350_v30 = vmul.f32 0.25, %v9348_v52  ;;  %v9383_v12 = vmul.f32 0.25, %v9381_v10  ;;  %14651 = vmatprep.subr.mxu1 %v9589_v43 }
 0x740   : > { %14652 = vmatpush3.msra.mxu1 %v9589_v43 }
 0x741   : > { %9352 = vst.msk [vmem:[#allocation4 + $0x8] sm:$0xff] %vm1424_vm0, %v9350_v30  ;;  %9388 = vrot.lane.b32.xlu1 %v9383_v12, %s15923_s18  ;;  %14675 = vmatprep.subr.mxu1 %v18588_v16 }
 0x7a3   : > { %v9360_v36 = vpop.permute.xlu0 %9359 }
 0x7a4   : > { %v9365_v29 = vsub.f32 %v9353_v0, %v9360_v36  ;;  %v9395_v46 = vadd.f32 %v9360_v36, %v9353_v0 }
 0x7a6   : > { %v9367_v14 = vmul.f32 0.25, %v9365_v29  ;;  %v9397_v3 = vmul.f32 0.25, %v9395_v46 }
 0x7a7   : > { %v9362_v9 = vpop.permute.xlu0 %9361 }
 0x7a8   : > { %v9366_v63 = vsub.f32 %v9354_v54, %v9362_v9  ;;  %9371 = vrot.lane.b32.xlu0 %v9367_v14, %s15919_s11  ;;  %v9396_v58 = vadd.f32 %v9362_v9, %v9354_v54 }
 0x7aa   : > { %v9368_v50 = vmul.f32 0.25, %v9366_v63  ;;  %v9398_v8 = vmul.f32 0.25, %v9396_v58 }
 0x7ac   : > { %9401 = vrot.lane.b32.xlu0 %v9397_v3, %s15924_s3  ;;  %9373 = vrot.lane.b32.xlu1 %v9368_v50, %s15919_s11  ;;  %s19064_s11 = sld [smem:[#allocation69_spill]] }
 0x7af   : > { %v9387_v52 = vpop.permute.xlu0 %9386 }
 0x7b0   : > { %9403 = vrot.lane.b32.xlu1 %v9398_v8, %s15924_s3 }
 0x7b3   : > { %v9389_v10 = vpop.permute.xlu1 %9388 }
 0x81a   : > { %v9372_v30 = vpop.permute.xlu0 %9371 }
 0x81b   : > { %9378 = vst.msk [vmem:[#allocation4] sm:$0xff] %vm9377_vm7, %v9372_v30  ;;  %v10536_v30 = vld [vmem:[%s19064_s11 + $0x8] sm:$0xff] }
 0x81c   : > { %9393 = vst.msk [vmem:[#allocation4] sm:$0xff] %vm9392_vm8, %v9387_v52 }
 0x81e   : > { %v9402_v12 = vpop.permute.xlu0 %9401  ;;  %v9374_v18 = vpop.permute.xlu1 %9373 }
 0x81f   : > { %9408 = vst.msk [vmem:[#allocation4] sm:$0xff] %vm9407_vm9, %v9402_v12  ;;  %v10535_v12 = vld [vmem:[%s19064_s11] sm:$0xff] }
 0x820   : > { %9379 = vst.msk [vmem:[#allocation4 + $0x8] sm:$0xff] %vm9377_vm7, %v9374_v18  ;;  %v18833_v18 = vand.u32 4294901760, %v10536_v30 }
 0x821   : > { %9394 = vst.msk [vmem:[#allocation4 + $0x8] sm:$0xff] %vm9392_vm8, %v9389_v10 }
 0x822   : > { %v9404_v34 = vpop.permute.xlu1 %9403 }
 0x823   : > { %9409 = vst.msk [vmem:[#allocation4 + $0x8] sm:$0xff] %vm9407_vm9, %v9404_v34  ;;  %v18835_v34 = vand.u32 4294901760, %v10535_v12 }
 0x826   : > { %v9410_v41 = vld [vmem:[#allocation4] sm:$0xff] }
 0x827   : > { %v9421_v39 = vsel %vm4501_vm6, %v9410_v41, 0  ;;  %v18838_v41 = vsub.f32 %v10536_v30, %v18833_v18  ;;  %v15228_v30 = vld [vmem:[%s16368_s16 + $0x8] sm:$0xff] }
 0x828   : > { %v9499_v22 = vand.u32 4294901760, %v9421_v39 }
 0x82a   : > { %14653 = vmatprep.mubr.f32.mxu1 %v9499_v22  ;;  %v9411_v44 = vld [vmem:[#allocation4 + $0x8] sm:$0xff]  ;;  %v9500_v28 = vsub.f32 %v9421_v39, %v9499_v22  ;;  %v18841_v39 = vsub.f32 %v10535_v12, %v18835_v34  ;;  %v11066_v12 = vsel %vm2225_vm1, %v15228_v30, 0 }
 0x82b   : > { %v9424_v61 = vsel %vm4501_vm6, %v9411_v44, 0 }
 0x82c   : > { %v18694_v19 = vand.u32 4294901760, %v9424_v61  ;;  %v9501_v6 = vand.u32 4294901760, %v9500_v28  ;;  %v18849_v44 = vand.u32 4294901760, %v18841_v39 }
 0x82e   : > { %v9510_v23 = vsub.f32 %v9424_v61, %v18694_v19  ;;  %14654 = vmatmul.mubr.f32.vlgmr.msra.gmra.mxu1 %v18694_v19  ;;  %v9502_v60 = vsub.f32 %v9500_v28, %v9501_v6  ;;  %v10676_v61 = vsub.f32 %v18841_v39, %v18849_v44 }
 0x82f   : > { %14676 = vmatpush3.msra.mxu1 %v18588_v16  ;;  %14691 = vmatprep.mubr.f32.mxu1 %v9501_v6 }
 0x830   : > { %14677 = vmatprep.subr.mxu1 %v18593_v45  ;;  %v9503_v20 = vand.u32 4294901760, %v9502_v60  ;;  %v9511_v48 = vand.u32 4294901760, %v9510_v23  ;;  %v10677_v6 = vand.u32 4294901760, %v10676_v61 }
 0x831   : > { %14678 = vmatpush3.msra.mxu1 %v18593_v45 }
 0x832   : > { %14679 = vmatprep.subr.mxu1 %v18603_v31  ;;  %14634 = vmatprep.mubr.f32.mxu0 %v9503_v20  ;;  %v9512_v51 = vsub.f32 %v9510_v23, %v9511_v48  ;;  %v12499_v20 = vld [vmem:[#allocation31] ss:$0 sm:$0xff] }
 0x833   : > { %14680 = vmatpush3.msra.mxu1 %v18603_v31 }
 0x834   : > { %14681 = vmatprep.subr.mxu1 %v18615_v15  ;;  %v9513_v0 = vand.u32 4294901760, %v9512_v51 }
 0x835   : > { %14682 = vmatpush3.msra.mxu1 %v18615_v15 }
 0x836   : > { %14683 = vmatprep.subr.mxu1 %v18628_v1  ;;  %14635 = vmatmul.mubr.f32.vlgmr.msra.gmra.mxu0 %v9513_v0 }
 0x837   : > { %14657 = vmatpush3.msra.mxu0 %v18591_v57  ;;  %14684 = vmatpush3.msra.mxu1 %v18628_v1 }
 0x838   : > { %14658 = vmatprep.subr.mxu0 %v18601_v62  ;;  %14672 = vmatprep.mubr.f32.mxu0 %v9500_v28 }
 0x839   : > { %14685 = vmatprep.subr.mxu1 %v18633_v21  ;;  %14659 = vmatpush3.msra.mxu0 %v18601_v62 }
 0x83a   : > { %14686 = vmatpush3.msra.mxu1 %v18633_v21  ;;  %14660 = vmatprep.subr.mxu0 %v18613_v25 }
 0x83b   : > { %14687 = vmatprep.subr.mxu1 %v18645_v27  ;;  %14661 = vmatpush3.msra.mxu0 %v18613_v25 }
 0x83c   : > { %14688 = vmatpush3.msra.mxu1 %v18645_v27  ;;  %14662 = vmatprep.subr.mxu0 %v18626_v40 }
 0x83d   : > { %14689 = vmatprep.subr.mxu1 %v18662_v53  ;;  %14663 = vmatpush3.msra.mxu0 %v18626_v40 }
 0x83e   : > { %14690 = vmatpush3.msra.mxu1 %v18662_v53  ;;  %14664 = vmatprep.subr.mxu0 %v18639_v5 }
 0x83f   : > { %14692 = vmatmul.mubr.f32.vlgmr.msra.gmra.mxu1 %v9511_v48  ;;  %14713 = vmatprep.subr.mxu1 %v18588_v16 }
 0x840   : > { %14665 = vmatpush3.msra.mxu0 %v18639_v5  ;;  %14714 = vmatpush3.msra.mxu1 %v18588_v16  ;;  %v10007_v16 = vld [vmem:[#allocation30 + $0x8] sm:$0xff] }
 0x841   : > { %14729 = vmatprep.mubr.f32.mxu1 %v9499_v22  ;;  %14666 = vmatprep.subr.mxu0 %v18643_v56  ;;  %v10050_v57 = vand.u32 4294901760, %v10007_v16 }
 0x842   : > { %14715 = vmatprep.subr.mxu1 %v18593_v45  ;;  %14667 = vmatpush3.msra.mxu0 %v18643_v56 }
 0x843   : > { %14716 = vmatpush3.msra.mxu1 %v18593_v45  ;;  %14668 = vmatprep.subr.mxu0 %v18660_v42  ;;  %v10006_v45 = vld [vmem:[#allocation30] sm:$0xff] }
 0x844   : > { %14717 = vmatprep.subr.mxu1 %v18603_v31  ;;  %14669 = vmatpush3.msra.mxu0 %v18660_v42  ;;  %v18764_v62 = vand.u32 4294901760, %v10006_v45 }
 0x845   : > { %14718 = vmatpush3.msra.mxu1 %v18603_v31  ;;  %14670 = vmatprep.subr.mxu0 %v18677_v11 }
 0x846   : > { %14719 = vmatprep.subr.mxu1 %v18615_v15  ;;  %14671 = vmatpush3.msra.mxu0 %v18677_v11 }
 0x847   : > { %14720 = vmatpush3.msra.mxu1 %v18615_v15  ;;  %14673 = vmatmul.mubr.f32.vlgmr.msra.gmra.mxu0 %v9510_v23 }
 0x848   : > { %14694 = vmatprep.subr.mxu0 %v18598_v2  ;;  %14721 = vmatprep.subr.mxu1 %v18628_v1 }
 0x849   : > { %14695 = vmatpush3.msra.mxu0 %v18598_v2  ;;  %14710 = vmatprep.mubr.f32.mxu0 %v9499_v22  ;;  %v18762_v2 = vsub.f32 %v10007_v16, %v10050_v57  ;;  %v18846_v22 = vand.u32 4294901760, %v18838_v41 }
 0x84a   : > { %14722 = vmatpush3.msra.mxu1 %v18628_v1  ;;  %14696 = vmatprep.subr.mxu0 %v18610_v26 }
 0x84b   : > { %14723 = vmatprep.subr.mxu1 %v18633_v21  ;;  %14697 = vmatpush3.msra.mxu0 %v18610_v26  ;;  %v18767_v31 = vand.u32 4294901760, %v18762_v2  ;;  %v18770_v26 = vsub.f32 %v10006_v45, %v18764_v62  ;;  %v10669_v28 = vsub.f32 %v18838_v41, %v18846_v22 }
 0x84c   : > { %14724 = vmatpush3.msra.mxu1 %v18633_v21  ;;  %14698 = vmatprep.subr.mxu0 %v18622_v4 }
 0x84d   : > { %14725 = vmatprep.subr.mxu1 %v18645_v27  ;;  %14699 = vmatpush3.msra.mxu0 %v18622_v4  ;;  %v10140_v25 = vsub.f32 %v18762_v2, %v18767_v31  ;;  %v18777_v15 = vand.u32 4294901760, %v18770_v26 }
 0x84e   : > { %14726 = vmatpush3.msra.mxu1 %v18645_v27  ;;  %14700 = vmatprep.subr.mxu0 %v18636_v49 }
 0x84f   : > { %14727 = vmatprep.subr.mxu1 %v18662_v53  ;;  %14701 = vmatpush3.msra.mxu0 %v18636_v49  ;;  %v10141_v4 = vand.u32 4294901760, %v10140_v25  ;;  %v10147_v40 = vsub.f32 %v18770_v26, %v18777_v15 }
 0x850   : > { %14728 = vmatpush3.msra.mxu1 %v18662_v53  ;;  %14702 = vmatprep.subr.mxu0 %v18651_v7 }
 0x851   : > { %14730 = vmatmul.mubr.f32.vlgmr.msra.gmra.mxu1 %v18694_v19  ;;  %14703 = vmatpush3.msra.mxu0 %v18651_v7  ;;  %v10148_v1 = vand.u32 4294901760, %v10147_v40 }
 0x852   : > { %14704 = vmatprep.subr.mxu0 %v18657_v24  ;;  %14739 = vmatprep.subr.mxu1 %v10141_v4 }
 0x853   : > { %14705 = vmatpush3.msra.mxu0 %v18657_v24  ;;  %14740 = vmatpush3.msra.mxu1 %v10141_v4 }
 0x854   : > { %14706 = vmatprep.subr.mxu0 %v18671_v47  ;;  %14741 = vmatprep.subr.mxu1 %v10148_v1 }
 0x855   : > { %14707 = vmatpush3.msra.mxu0 %v18671_v47  ;;  %14742 = vmatpush3.msra.mxu1 %v10148_v1 }
 0x856   : > { %14708 = vmatprep.subr.mxu0 %v18684_v13  ;;  %14753 = vmatprep.subr.mxu1 %v10050_v57 }
 0x857   : > { %14709 = vmatpush3.msra.mxu0 %v18684_v13 }
 0x858   : > { %14711 = vmatmul.mubr.f32.vlgmr.msra.gmra.mxu0 %v18694_v19  ;;  %14732 = vmatprep.subr.mxu0 %v10050_v57  ;;  %v10670_v19 = vand.u32 4294901760, %v10669_v28 }
 0x859   : > { %14733 = vmatpush3.msra.mxu0 %v10050_v57 }
 0x85a   : > { %14734 = vmatprep.subr.mxu0 %v18764_v62 }
 0x85b   : > { %14735 = vmatpush3.msra.mxu0 %v18764_v62 }
 0x85c   : > { %14746 = vmatprep.subr.mxu0 %v18762_v2 }
 0x8ee   : > { %v14655_v49 = vpop.f32.mrf.mxu1 }
 0x8f0   : > { %v9626_v27 = vpop.f32.mrf.mxu1 }
 0x8f6   : > { %v14636_v21 = vpop.f32.mrf.mxu0 }
 0x8f7   : > { %v9633_v7 = vadd.f32 %v14655_v49, %v14636_v21 }
 0x8f8   : > { %v9505_v5 = vpop.f32.mrf.mxu0 }
 0x8f9   : > { %v9627_v53 = vadd.f32 %v9626_v27, %v9505_v5 }
 0x8ff   : > { %v14693_v24 = vpop.f32.mrf.mxu1 }
 0x901   : > { %v9808_v32 = vpop.f32.mrf.mxu1 }
 0x907   : > { %v14674_v56 = vpop.f32.mrf.mxu0 }
 0x908   : > { %v9728_v36 = vadd.f32 %v14674_v56, %v9633_v7 }
 0x909   : > { %v9720_v42 = vpop.f32.mrf.mxu0 }
 0x90a   : > { %v9721_v38 = vadd.f32 %v9720_v42, %v9627_v53  ;;  %v9817_v29 = vadd.f32 %v14693_v24, %v9728_v36 }
 0x90c   : > { %v9809_v17 = vadd.f32 %v9808_v32, %v9721_v38 }
 0x911   : > { %v14731_v59 = vpop.f32.mrf.mxu1 }
 0x913   : > { %v9996_v37 = vpop.f32.mrf.mxu1 }
 0x918   : > { %v14712_v47 = vpop.f32.mrf.mxu0 }
 0x919   : > { %v9918_v54 = vadd.f32 %v14712_v47, %v9817_v29 }
 0x91a   : > { %v9911_v11 = vpop.f32.mrf.mxu0 }
 0x91b   : > { %v10003_v14 = vadd.f32 %v14731_v59, %v9918_v54  ;;  %v9912_v46 = vadd.f32 %v9911_v11, %v9809_v17  ;;  %v11054_v59 = vld [vmem:[#allocation36] sm:$0xff] }
 0x91c   : > { %v18859_v47 = vand.u32 4294901760, %v11054_v59 }
 0x91d   : > { %v10019_v33 = vsel %vm1424_vm0, %v10003_v14, 0  ;;  %v9997_v9 = vadd.f32 %v9996_v37, %v9912_v46 }
 0x91e   : > { %v18783_v13 = vand.u32 4294901760, %v10019_v33  ;;  %v18863_v11 = vsub.f32 %v11054_v59, %v18859_v47 }
 0x91f   : > { %v10016_v63 = vsel %vm1424_vm0, %v9997_v9, 0 }
 0x920   : > { %v18787_v55 = vsub.f32 %v10019_v33, %v18783_v13  ;;  %v18789_v35 = vand.u32 4294901760, %v10016_v63 }
 0x922   : > { %v18792_v3 = vsub.f32 %v10016_v63, %v18789_v35  ;;  %14743 = vmatprep.mubr.f32.mxu1 %v18789_v35  ;;  %v18796_v50 = vand.u32 4294901760, %v18787_v55  ;;  %v15227_v63 = vld [vmem:[%s16368_s16] sm:$0xff]  ;;  %s1408_s16 = scalar_lea.vmem %s16108_s6, %s16364_s26 }
 0x923   : > { %14744 = vmatmul.mubr.f32.vlgmr.msra.gmra.mxu1 %v18783_v13 }
 0x924   : > { %14754 = vmatpush3.msra.mxu1 %v10050_v57  ;;  %v18800_v58 = vand.u32 4294901760, %v18792_v3  ;;  %v10101_v43 = vsub.f32 %v18787_v55, %v18796_v50 }
 0x925   : > { %14755 = vmatprep.subr.mxu1 %v18764_v62 }
 0x926   : > { %14756 = vmatpush3.msra.mxu1 %v18764_v62  ;;  %14757 = vmatprep.mubr.f32.mxu1 %v18800_v58  ;;  %v10091_v8 = vsub.f32 %v18792_v3, %v18800_v58  ;;  %v18814_v10 = vand.u32 4294901760, %v10101_v43  ;;  %v11063_v43 = vsel %vm2225_vm1, %v15227_v63, 0 }
 0x927   : > { %14758 = vmatmul.mubr.f32.vlgmr.msra.gmra.mxu1 %v18796_v50  ;;  %14767 = vmatprep.subr.mxu1 %v10050_v57 }
 0x928   : > { %14768 = vmatpush3.msra.mxu1 %v10050_v57  ;;  %14771 = vmatprep.mubr.f32.mxu1 %v18789_v35  ;;  %v18811_v52 = vand.u32 4294901760, %v10091_v8  ;;  %v18872_v8 = vand.u32 4294901760, %v18863_v11 }
 0x929   : > { %14769 = vmatprep.subr.mxu1 %v18764_v62 }
 0x92a   : > { %14736 = vmatprep.mubr.f32.mxu0 %v18811_v52  ;;  %14770 = vmatpush3.msra.mxu1 %v18764_v62 }
 0x92b   : > { %14737 = vmatmul.mubr.f32.vlgmr.msra.gmra.mxu0 %v18814_v10  ;;  %14772 = vmatmul.mubr.f32.vlgmr.msra.gmra.mxu1 %v18783_v13 }
 0x92c   : > { %14747 = vmatpush3.msra.mxu0 %v18762_v2  ;;  %14750 = vmatprep.mubr.f32.mxu0 %v18792_v3 }
 0x92d   : > { %14748 = vmatprep.subr.mxu0 %v18770_v26  ;;  %14781 = vmatprep.subr.mxu1 %v10670_v19 }
 0x92e   : > { %14749 = vmatpush3.msra.mxu0 %v18770_v26  ;;  %14782 = vmatpush3.msra.mxu1 %v10670_v19  ;;  %v18877_v19 = vand.u32 4294901760, %v11063_v43 }
 0x92f   : > { %14751 = vmatmul.mubr.f32.vlgmr.msra.gmra.mxu0 %v18787_v55  ;;  %14760 = vmatprep.subr.mxu0 %v18767_v31 }
 0x930   : > { %14761 = vmatpush3.msra.mxu0 %v18767_v31  ;;  %14764 = vmatprep.mubr.f32.mxu0 %v18789_v35 }
 0x931   : > { %14762 = vmatprep.subr.mxu0 %v18777_v15  ;;  %14783 = vmatprep.subr.mxu1 %v10677_v6 }
 0x932   : > { %14763 = vmatpush3.msra.mxu0 %v18777_v15  ;;  %14784 = vmatpush3.msra.mxu1 %v10677_v6  ;;  %v11558_v6 = vld [vmem:[%s19065_s10 + $0x8] sm:$0xff] }
 0x933   : > { %14765 = vmatmul.mubr.f32.vlgmr.msra.gmra.mxu0 %v18783_v13  ;;  %14774 = vmatprep.subr.mxu0 %v18833_v18 }
 0x934   : > { %14775 = vmatpush3.msra.mxu0 %v18833_v18  ;;  %14795 = vmatprep.subr.mxu1 %v18833_v18 }
 0x935   : > { %14776 = vmatprep.subr.mxu0 %v18835_v34 }
 0x936   : > { %14777 = vmatpush3.msra.mxu0 %v18835_v34 }
 0x937   : > { %14788 = vmatprep.subr.mxu0 %v18838_v41 }
 0x9e3   : > { %v14745_v23 = vpop.f32.mrf.mxu1 }
 0x9e5   : > { %v10185_v60 = vpop.f32.mrf.mxu1 }
 0x9e7   : > { %v14759_v48 = vpop.f32.mrf.mxu1 }
 0x9e9   : > { %v10349_v2 = vpop.f32.mrf.mxu1 }
 0x9eb   : > { %v14738_v51 = vpop.f32.mrf.mxu0  ;;  %v14773_v40 = vpop.f32.mrf.mxu1 }
 0x9ec   : > { %v10105_v0 = vadd.f32 %v14738_v51, %v12499_v20  ;;  %v11557_v51 = vld [vmem:[%s19065_s10] sm:$0xff] }
 0x9ed   : > { %v10094_v16 = vpop.f32.mrf.mxu0  ;;  %v10513_v7 = vpop.f32.mrf.mxu1 }
 0x9ee   : > { %v10095_v57 = vadd.f32 %v12499_v20, %v10094_v16  ;;  %v10192_v45 = vadd.f32 %v14745_v23, %v10105_v0  ;;  %v18888_v16 = vand.u32 4294901760, %v11558_v6 }
 0x9ef   : > { %v14752_v62 = vpop.f32.mrf.mxu0 }
 0x9f0   : > { %v10275_v31 = vadd.f32 %v14752_v62, %v10192_v45  ;;  %v10186_v26 = vadd.f32 %v10185_v60, %v10095_v57  ;;  %v18881_v60 = vand.u32 4294901760, %v11066_v12  ;;  %v11135_v57 = vsub.f32 %v11063_v43, %v18877_v19 }
 0x9f1   : > { %v10267_v25 = vpop.f32.mrf.mxu0  ;;  %v18894_v62 = vand.u32 4294901760, %v11557_v51 }
 0x9f2   : > { %v10268_v15 = vadd.f32 %v10267_v25, %v10186_v26  ;;  %v10358_v4 = vadd.f32 %v14759_v48, %v10275_v31  ;;  %v11188_v48 = vsub.f32 %v18863_v11, %v18872_v8  ;;  %v18899_v25 = vsub.f32 %v11558_v6, %v18888_v16 }
 0x9f3   : > { %v14766_v1 = vpop.f32.mrf.mxu0 }
 0x9f4   : > { %v10441_v21 = vadd.f32 %v14766_v1, %v10358_v4  ;;  %v10350_v49 = vadd.f32 %v10349_v2, %v10268_v15  ;;  %v11145_v2 = vsub.f32 %v11066_v12, %v18881_v60  ;;  %v11189_v26 = vand.u32 4294901760, %v11188_v48  ;;  %v12503_v12 = vld [vmem:[#allocation37] ss:$0 sm:$0xff] }
 0x9f5   : > { %v10434_v5 = vpop.f32.mrf.mxu0  ;;  %v18904_v4 = vsub.f32 %v11557_v51, %v18894_v62 }
 0x9f6   : > { %v10520_v56 = vadd.f32 %v14773_v40, %v10441_v21  ;;  %v10435_v27 = vadd.f32 %v10434_v5, %v10350_v49  ;;  %v11146_v15 = vand.u32 4294901760, %v11145_v2 }
 0x9f7   : > { %v18915_v1 = vand.u32 4294901760, %v18904_v4 }
 0x9f8   : > { %v12501_v24 = vmul.f32 -1.442695, %v10520_v56  ;;  %v10514_v42 = vadd.f32 %v10513_v7, %v10435_v27 }
 0x9fa   : > { %15211 = vpow2.f32 %v12501_v24  ;;  %v12500_v53 = vmul.f32 -1.442695, %v10514_v42 }
 0x9fc   : > { %15213 = vpow2.f32 %v12500_v53 }
 0xa07   : > { %v15212_v36 = vpop.eup %15211 }
 0xa08   : > { %v10530_v38 = vadd.f32 1.0, %v15212_v36 }
 0xa09   : > { %v15214_v32 = vpop.eup %15213 }
 0xa0a   : > { %15215 = vrcp.f32 %v10530_v38  ;;  %v10529_v29 = vadd.f32 1.0, %v15214_v32 }
 0xa0c   : > { %15217 = vrcp.f32 %v10529_v29 }
 0xa17   : > { %v15216_v54 = vpop.eup %15215 }
 0xa18   : > { %v10548_v17 = vsel %vm1424_vm0, %v15216_v54, 0 }
 0xa19   : > { %v15218_v14 = vpop.eup %15217  ;;  %v18865_v46 = vand.u32 4294901760, %v10548_v17 }
 0xa1a   : > { %v10545_v37 = vsel %vm1424_vm0, %v15218_v14, 0 }
 0xa1b   : > { %v10617_v33 = vand.u32 4294901760, %v10545_v37  ;;  %v10628_v9 = vsub.f32 %v10548_v17, %v18865_v46 }
 0xa1d   : > { %14785 = vmatprep.mubr.f32.mxu1 %v10617_v33  ;;  %v10618_v28 = vsub.f32 %v10545_v37, %v10617_v33  ;;  %v10629_v61 = vand.u32 4294901760, %v10628_v9 }
 0xa1e   : > { %14786 = vmatmul.mubr.f32.vlgmr.msra.gmra.mxu1 %v18865_v46 }
 0xa1f   : > { %14796 = vmatpush3.msra.mxu1 %v18833_v18  ;;  %v10619_v23 = vand.u32 4294901760, %v10618_v28  ;;  %v10630_v20 = vsub.f32 %v10628_v9, %v10629_v61 }
 0xa20   : > { %14797 = vmatprep.subr.mxu1 %v18835_v34 }
 0xa21   : > { %14798 = vmatpush3.msra.mxu1 %v18835_v34  ;;  %14799 = vmatprep.mubr.f32.mxu1 %v10619_v23  ;;  %v10620_v0 = vsub.f32 %v10618_v28, %v10619_v23  ;;  %v10631_v31 = vand.u32 4294901760, %v10630_v20 }
 0xa22   : > { %14800 = vmatmul.mubr.f32.vlgmr.msra.gmra.mxu1 %v10629_v61  ;;  %14809 = vmatprep.subr.mxu1 %v18833_v18 }
 0xa23   : > { %14810 = vmatpush3.msra.mxu1 %v18833_v18  ;;  %14813 = vmatprep.mubr.f32.mxu1 %v10617_v33  ;;  %v10621_v45 = vand.u32 4294901760, %v10620_v0  ;;  %v11136_v18 = vand.u32 4294901760, %v11135_v57 }
 0xa24   : > { %14811 = vmatprep.subr.mxu1 %v18835_v34 }
 0xa25   : > { %14778 = vmatprep.mubr.f32.mxu0 %v10621_v45  ;;  %14812 = vmatpush3.msra.mxu1 %v18835_v34  ;;  %v18909_v34 = vand.u32 4294901760, %v18899_v25  ;;  %v11137_v40 = vsub.f32 %v11135_v57, %v11136_v18 }
 0xa26   : > { %14779 = vmatmul.mubr.f32.vlgmr.msra.gmra.mxu0 %v10631_v31  ;;  %14814 = vmatmul.mubr.f32.vlgmr.msra.gmra.mxu1 %v18865_v46 }
 0xa27   : > { %14789 = vmatpush3.msra.mxu0 %v18838_v41  ;;  %14792 = vmatprep.mubr.f32.mxu0 %v10618_v28  ;;  %v11147_v41 = vsub.f32 %v11145_v2, %v11146_v15  ;;  %v11138_v21 = vand.u32 4294901760, %v11137_v40 }
 0xa28   : > { %14790 = vmatprep.subr.mxu0 %v18841_v39  ;;  %14821 = vmatprep.subr.mxu1 %v11189_v26 }
 0xa29   : > { %14791 = vmatpush3.msra.mxu0 %v18841_v39  ;;  %14822 = vmatpush3.msra.mxu1 %v11189_v26  ;;  %v11685_v39 = vsub.f32 %v18899_v25, %v18909_v34  ;;  %v11148_v49 = vand.u32 4294901760, %v11147_v41 }
 0xa2a   : > { %14823 = vmatprep.mubr.f32.mxu1 %v18877_v19  ;;  %14793 = vmatmul.mubr.f32.vlgmr.msra.gmra.mxu0 %v10628_v9 }
 0xa2b   : > { %14802 = vmatprep.subr.mxu0 %v18846_v22  ;;  %14824 = vmatmul.mubr.f32.vlgmr.msra.gmra.mxu1 %v18881_v60  ;;  %v11686_v5 = vand.u32 4294901760, %v11685_v39 }
 0xa2c   : > { %14803 = vmatpush3.msra.mxu0 %v18846_v22  ;;  %14806 = vmatprep.mubr.f32.mxu0 %v10617_v33  ;;  %v11692_v22 = vsub.f32 %v18904_v4, %v18915_v1 }
 0xa2d   : > { %14804 = vmatprep.subr.mxu0 %v18849_v44  ;;  %14831 = vmatprep.subr.mxu1 %v18859_v47 }
 0xa2e   : > { %14805 = vmatpush3.msra.mxu0 %v18849_v44  ;;  %14832 = vmatpush3.msra.mxu1 %v18859_v47  ;;  %v11693_v44 = vand.u32 4294901760, %v11692_v22 }
 0xa2f   : > { %14833 = vmatprep.mubr.f32.mxu1 %v11136_v18  ;;  %14807 = vmatmul.mubr.f32.vlgmr.msra.gmra.mxu0 %v18865_v46 }
 0xa30   : > { %14816 = vmatprep.subr.mxu0 %v18859_v47  ;;  %14834 = vmatmul.mubr.f32.vlgmr.msra.gmra.mxu1 %v11146_v15 }
 0xa31   : > { %14817 = vmatpush3.msra.mxu0 %v18859_v47  ;;  %14841 = vmatprep.subr.mxu1 %v18859_v47 }
 0xa32   : > { %14818 = vmatprep.mubr.f32.mxu0 %v11138_v21  ;;  %14842 = vmatpush3.msra.mxu1 %v18859_v47 }
 0xa33   : > { %14843 = vmatprep.mubr.f32.mxu1 %v18877_v19  ;;  %14819 = vmatmul.mubr.f32.vlgmr.msra.gmra.mxu0 %v11148_v49 }
 0xa34   : > { %14826 = vmatprep.subr.mxu0 %v18863_v11  ;;  %14844 = vmatmul.mubr.f32.vlgmr.msra.gmra.mxu1 %v18881_v60 }
 0xa35   : > { %14853 = vmatprep.subr.mxu1 %v11686_v5  ;;  %14827 = vmatpush3.msra.mxu0 %v18863_v11 }
 0xa36   : > { %14854 = vmatpush3.msra.mxu1 %v11686_v5  ;;  %14857 = vmatprep.mubr.f32.mxu1 %v18789_v35 }
 0xa37   : > { %14855 = vmatprep.subr.mxu1 %v11693_v44  ;;  %14828 = vmatprep.mubr.f32.mxu0 %v11135_v57  ;;  %v12504_v57 = vld [vmem:[#allocation34] ss:$0 sm:$0xff] }
 0xa38   : > { %14856 = vmatpush3.msra.mxu1 %v11693_v44  ;;  %14829 = vmatmul.mubr.f32.vlgmr.msra.gmra.mxu0 %v11145_v2 }
 0xa39   : > { %14836 = vmatprep.subr.mxu0 %v18872_v8  ;;  %14858 = vmatmul.mubr.f32.vlgmr.msra.gmra.mxu1 %v18783_v13 }
 0xa3a   : > { %14867 = vmatprep.subr.mxu1 %v18888_v16  ;;  %14837 = vmatpush3.msra.mxu0 %v18872_v8 }
 0xa3b   : > { %14868 = vmatpush3.msra.mxu1 %v18888_v16  ;;  %14871 = vmatprep.mubr.f32.mxu1 %v18800_v58 }
 0xa3c   : > { %14869 = vmatprep.subr.mxu1 %v18894_v62  ;;  %14838 = vmatprep.mubr.f32.mxu0 %v18877_v19 }
 0xa3d   : > { %14870 = vmatpush3.msra.mxu1 %v18894_v62  ;;  %14839 = vmatmul.mubr.f32.vlgmr.msra.gmra.mxu0 %v18881_v60 }
 0xa3e   : > { %14846 = vmatprep.subr.mxu0 %v18888_v16  ;;  %14872 = vmatmul.mubr.f32.vlgmr.msra.gmra.mxu1 %v18796_v50 }
 0xa3f   : > { %14881 = vmatprep.subr.mxu1 %v18888_v16  ;;  %14847 = vmatpush3.msra.mxu0 %v18888_v16 }
 0xa40   : > { %14850 = vmatprep.mubr.f32.mxu0 %v18811_v52  ;;  %14882 = vmatpush3.msra.mxu1 %v18888_v16 }
 0xa41   : > { %14885 = vmatprep.mubr.f32.mxu1 %v18789_v35  ;;  %14848 = vmatprep.subr.mxu0 %v18894_v62 }
 0xa42   : > { %14883 = vmatprep.subr.mxu1 %v18894_v62  ;;  %14849 = vmatpush3.msra.mxu0 %v18894_v62 }
 0xa43   : > { %14884 = vmatpush3.msra.mxu1 %v18894_v62  ;;  %14851 = vmatmul.mubr.f32.vlgmr.msra.gmra.mxu0 %v18814_v10  ;;  %v12502_v10 = vld [vmem:[#allocation33] ss:$0 sm:$0xff] }
 0xa44   : > { %14860 = vmatprep.subr.mxu0 %v18899_v25  ;;  %14886 = vmatmul.mubr.f32.vlgmr.msra.gmra.mxu1 %v18783_v13 }
 0xa45   : > { %14861 = vmatpush3.msra.mxu0 %v18899_v25  ;;  %14864 = vmatprep.mubr.f32.mxu0 %v18792_v3 }
 0xa46   : > { %14862 = vmatprep.subr.mxu0 %v18904_v4 }
 0xa47   : > { %14863 = vmatpush3.msra.mxu0 %v18904_v4 }
 0xa48   : > { %14865 = vmatmul.mubr.f32.vlgmr.msra.gmra.mxu0 %v18787_v55  ;;  %14874 = vmatprep.subr.mxu0 %v18909_v34 }
 0xa49   : > { %14875 = vmatpush3.msra.mxu0 %v18909_v34  ;;  %14878 = vmatprep.mubr.f32.mxu0 %v18789_v35 }
 0xa4a   : > { %14876 = vmatprep.subr.mxu0 %v18915_v1 }
 0xa4b   : > { %14877 = vmatpush3.msra.mxu0 %v18915_v1 }
 0xa4c   : > { %14879 = vmatmul.mubr.f32.vlgmr.msra.gmra.mxu0 %v18783_v13 }
 0xade   : > { %v14787_v50 = vpop.f32.mrf.mxu1 }
 0xae0   : > { %v10714_v3 = vpop.f32.mrf.mxu1 }
 0xae2   : > { %v14801_v58 = vpop.f32.mrf.mxu1 }
 0xae4   : > { %v10878_v52 = vpop.f32.mrf.mxu1 }
 0xae6   : > { %v14780_v56 = vpop.f32.mrf.mxu0  ;;  %v14815_v27 = vpop.f32.mrf.mxu1 }
 0xae7   : > { %v10634_v55 = vadd.f32 %v14780_v56, %v12502_v10 }
 0xae8   : > { %v10623_v7 = vpop.f32.mrf.mxu0  ;;  %v11042_v24 = vpop.f32.mrf.mxu1 }
 0xae9   : > { %v10624_v42 = vadd.f32 %v12502_v10, %v10623_v7  ;;  %v10721_v35 = vadd.f32 %v14787_v50, %v10634_v55 }
 0xaea   : > { %v14794_v53 = vpop.f32.mrf.mxu0 }
 0xaeb   : > { %v10804_v36 = vadd.f32 %v14794_v53, %v10721_v35  ;;  %v14825_v38 = vpop.f32.mrf.mxu1  ;;  %v10715_v32 = vadd.f32 %v10714_v3, %v10624_v42 }
 0xaec   : > { %v10796_v29 = vpop.f32.mrf.mxu0 }
 0xaed   : > { %v10797_v13 = vadd.f32 %v10796_v29, %v10715_v32  ;;  %v11226_v59 = vpop.f32.mrf.mxu1  ;;  %v10887_v47 = vadd.f32 %v14801_v58, %v10804_v36 }
 0xaef   : > { %v14808_v54 = vpop.f32.mrf.mxu0  ;;  %v10879_v17 = vadd.f32 %v10878_v52, %v10797_v13 }
 0xaf0   : > { %v10970_v11 = vadd.f32 %v14808_v54, %v10887_v47  ;;  %v14835_v14 = vpop.f32.mrf.mxu1 }
 0xaf1   : > { %v10963_v46 = vpop.f32.mrf.mxu0 }
 0xaf2   : > { %v11049_v37 = vadd.f32 %v14815_v27, %v10970_v11  ;;  %v10964_v33 = vadd.f32 %v10963_v46, %v10879_v17  ;;  %v11387_v9 = vpop.f32.mrf.mxu1 }
 0xaf3   : > { %v14820_v63 = vpop.f32.mrf.mxu0 }
 0xaf4   : > { %11053 = vst.msk [vmem:[%s1408_s16 + $0x8] sm:$0xff] %vm2225_vm1, %v11049_v37  ;;  %v11043_v43 = vadd.f32 %v11042_v24, %v10964_v33  ;;  %v14845_v8 = vpop.f32.mrf.mxu1  ;;  %v11151_v6 = vadd.f32 %v14820_v63, %v12503_v12 }
 0xaf5   : > { %v11140_v30 = vpop.f32.mrf.mxu0 }
 0xaf6   : > { %11052 = vst.msk [vmem:[%s1408_s16] sm:$0xff] %vm2225_vm1, %v11043_v43  ;;  %v11547_v28 = vpop.f32.mrf.mxu1  ;;  %v11141_v60 = vadd.f32 %v12503_v12, %v11140_v30  ;;  %v11233_v48 = vadd.f32 %v14825_v38, %v11151_v6 }
 0xaf8   : > { %v14830_v61 = vpop.f32.mrf.mxu0  ;;  %v11227_v16 = vadd.f32 %v11226_v59, %v11141_v60 }
 0xaf9   : > { %v14859_v23 = vpop.f32.mrf.mxu1  ;;  %v11314_v45 = vadd.f32 %v14830_v61, %v11233_v48 }
 0xafa   : > { %v11306_v19 = vpop.f32.mrf.mxu0 }
 0xafb   : > { %v11730_v0 = vpop.f32.mrf.mxu1  ;;  %v11307_v26 = vadd.f32 %v11306_v19, %v11227_v16  ;;  %v11396_v4 = vadd.f32 %v14835_v14, %v11314_v45 }
 0xafd   : > { %v14840_v20 = vpop.f32.mrf.mxu0  ;;  %v11388_v1 = vadd.f32 %v11387_v9, %v11307_v26 }
 0xafe   : > { %v14873_v62 = vpop.f32.mrf.mxu1  ;;  %v11476_v49 = vadd.f32 %v14840_v20, %v11396_v4 }
 0xaff   : > { %v11469_v51 = vpop.f32.mrf.mxu0 }
 0xb00   : > { %v11894_v34 = vpop.f32.mrf.mxu1  ;;  %v11470_v3 = vadd.f32 %v11469_v51, %v11388_v1  ;;  %v11554_v56 = vadd.f32 %v14845_v8, %v11476_v49 }
 0xb02   : > { %v11548_v24 = vadd.f32 %v11547_v28, %v11470_v3 }
 0xb03   : > { %v14852_v2 = vpop.f32.mrf.mxu0 }
 0xb04   : > { %v11650_v31 = vadd.f32 %v14852_v2, %v12504_v57  ;;  %v14887_v44 = vpop.f32.mrf.mxu1 }
 0xb05   : > { %v11639_v25 = vpop.f32.mrf.mxu0 }
 0xb06   : > { %v11640_v18 = vadd.f32 %v12504_v57, %v11639_v25  ;;  %v11737_v15 = vadd.f32 %v14859_v23, %v11650_v31  ;;  %v12058_v7 = vpop.f32.mrf.mxu1 }
 0xb08   : > { %v14866_v40 = vpop.f32.mrf.mxu0  ;;  %v11731_v41 = vadd.f32 %v11730_v0, %v11640_v18 }
 0xb09   : > { %v11820_v39 = vadd.f32 %v14866_v40, %v11737_v15 }
 0xb0a   : > { %v11812_v21 = vpop.f32.mrf.mxu0 }
 0xb0b   : > { %v11813_v22 = vadd.f32 %v11812_v21, %v11731_v41  ;;  %v11903_v5 = vadd.f32 %v14873_v62, %v11820_v39 }
 0xb0c   : > { %v14880_v50 = vpop.f32.mrf.mxu0 }
 0xb0d   : > { %v11986_v58 = vadd.f32 %v14880_v50, %v11903_v5  ;;  %v11895_v52 = vadd.f32 %v11894_v34, %v11813_v22 }
 0xb0e   : > { %v11979_v10 = vpop.f32.mrf.mxu0 }
 0xb0f   : > { %v12065_v27 = vadd.f32 %v14887_v44, %v11986_v58  ;;  %v11980_v55 = vadd.f32 %v11979_v10, %v11895_v52 }
 0xb11   : > { %v12069_v42 = vsub.f32 %v12065_v27, %v11554_v56  ;;  %v12059_v35 = vadd.f32 %v12058_v7, %v11980_v55 }
 0xb13   : > { %v12506_v53 = vmul.f32 -1.442695, %v12069_v42  ;;  %v12068_v36 = vsub.f32 %v12059_v35, %v11548_v24 }
 0xb15   : > { %15219 = vpow2.f32 %v12506_v53  ;;  %v12505_v38 = vmul.f32 -1.442695, %v12068_v36 }
 0xb17   : > { %15221 = vpow2.f32 %v12505_v38 }
 0xb22   : > { %v15220_v32 = vpop.eup %15219 }
 0xb23   : > { %v12077_v29 = vadd.f32 1.0, %v15220_v32 }
 0xb24   : > { %v15222_v13 = vpop.eup %15221 }
 0xb25   : > { %15223 = vrcp.f32 %v12077_v29  ;;  %v12076_v59 = vadd.f32 1.0, %v15222_v13 }
 0xb27   : > { %15225 = vrcp.f32 %v12076_v59 }
 0xb32   : > { %v15224_v47 = vpop.eup %15223 }
 0xb33   : > { %12083 = vst.msk [vmem:[%s1413_s22 + $0x8] sm:$0xff] %vm2225_vm1, %v15224_v47 }
 0xb34   : > { %v15226_v54 = vpop.eup %15225 }
 0xb35   : > { %12082 = vst.msk [vmem:[%s1413_s22] sm:$0xff] %vm2225_vm1, %v15226_v54 }
 0xb36 PF: > { %s96_s28 = sadd.s32 1, %s15855_s28  }
 0xb37   : > { %p93_p3 = scmp.ge.s32.totalorder %s96_s28, 4  }
 0xb39   :  { %95 = sbr.rel (!%p93_p3) target bundleno = 72 (0x48), region = 327 }
 0xb3e   :  { %12121 = vsyncpa [#allocation6], 1 }
 0xb3f   :  { %12123 = vsyncpa [#allocation6 + $0x1], 1 }
 0xb40   :  { %12124 = vsyncpa [#allocation8], 1 }
 0xb41   :  { %12125 = vsyncpa [#allocation11], 1 }
 0xb42   :  { %12126 = vsyncpa [#allocation14], 1 }
 0xb43   :  { %12127 = vsyncpa [#allocation17], 1 }
 0xb44   :  { %12128 = vsyncpa [#allocation20], 1 }
 0xb45   :  { %12129 = vsyncpa [#allocation23], 1 }
 0xb46   :  { %12130 = vsyncpa [#allocation26], 1 }
 0xb47   :  { %12131 = vsyncpa [#allocation29], 1 }
 0xb48   :  { %12132 = vsyncpa [#allocation32], 1 }
 0xb49   :  { %12133 = vsyncpa [#allocation35], 1 }
 0xb4a   :  { %12134 = vsyncpa [#allocation38], 1 }

</bundles_post_ra>
